<compile_context>
chip_gen: v7x
topology: tpu7x:2x2x1
jax: 0.10.0
libtpu: 0.0.40
codegen_flags: <defaults>
</compile_context>

<pallas_src>
import jax
import jax.numpy as jnp
from jax.experimental import pallas as pl
from jax.experimental.pallas import tpu as pltpu

# MXU operand dtype.  bf16 operands + f32 accumulation is MXU-native on all
# generations; set to jnp.float32 for bit-closer PyTorch-reference numerics.
_MATMUL_DTYPE = jnp.bfloat16

# 3x3 tap offsets in (ky, kx) row-major order — must match the HWIO weight
# reshape (3, 3, cin, cout) -> (9*cin, cout) used in the wrapper.
_OFFSETS = tuple((dy, dx) for dy in (-1, 0, 1) for dx in (-1, 0, 1))


def _sublane_pack(dtype):
    # Sublane packing of the patch scratch dtype (bf16 packs 16 rows/tile).
    return 16 if jnp.dtype(dtype) == jnp.dtype(jnp.bfloat16) else 8


def _make_fused_kernel(H, W, C, cin_pad, mm_dtype):
    """Fused whole-network kernel body for one batch element (channel-major)."""
    HW = H * W

    def kernel(x_ref, w_e1_ref, w_mid_ref, w_pred_ref, b_ref, b_pred_ref,
               masks_ref, o_ref, act_a, act_b, patches):

        def conv3x3_relu(src, cin, w_t, bias_idx):
            # src : (cin, HW) f32 activation (channel-major, lane-dense)
            # w_t : (C, 9*cin) bf16; contraction rows are tap-major, chan-minor.
            # Build im2col patches: nine rolled + border-masked taps stored as
            # sublane-aligned blocks of one persistent (9*C, HW) scratch.
            for k, (dy, dx) in enumerate(_OFFSETS):
                off = dy * W + dx
                if off == 0:
                    tap = src                                    # center tap
                else:
                    tap = pltpu.roll(src, (-off) % HW, 1)        # XLU rotate
                    tap = tap * masks_ref[k:k + 1, :]            # zero borders
                patches[k * cin:(k + 1) * cin, :] = tap.astype(mm_dtype)
            p = patches[0:9 * cin, :]                            # (9*cin, HW)
            acc = jnp.dot(w_t, p, preferred_element_type=jnp.float32)  # (C, HW)
            acc = acc + b_ref[:, bias_idx:bias_idx + 1]          # bias (C, 1)
            return jnp.maximum(acc, 0.0)

        # ---- encoders E1, E2 -------------------------------------------------
        act_a[...] = conv3x3_relu(x_ref[0], cin_pad, w_e1_ref[...], 0)
        act_b[...] = conv3x3_relu(act_a[...], C, w_mid_ref[0], 1)      # a2

        # ---- residual block R1 (skip re-read from act_b at the add site) -----
        act_a[...] = conv3x3_relu(act_b[...], C, w_mid_ref[1], 2)
        act_a[...] = conv3x3_relu(act_a[...], C, w_mid_ref[2], 3) + act_b[...]

        # ---- encoder E3 -------------------------------------------------------
        act_b[...] = conv3x3_relu(act_a[...], C, w_mid_ref[3], 4)      # a3

        # ---- residual block R2 ------------------------------------------------
        act_a[...] = conv3x3_relu(act_b[...], C, w_mid_ref[4], 5)
        r2 = conv3x3_relu(act_a[...], C, w_mid_ref[5], 6) + act_b[...]

        # ---- pred: 1x1 conv + tanh, channel-major lane-dense output -----------
        flow = jnp.dot(w_pred_ref[...], r2.astype(mm_dtype),
                       preferred_element_type=jnp.float32)             # (2, HW)
        flow = jnp.tanh(flow + b_pred_ref[...])
        o_ref[...] = flow.reshape(1, 2, HW)

    return kernel


def init_params(key, base_channels=32, num_bins=4):
    """Deterministic (seeded) parameter init, HWIO weight layout."""
    C = base_channels

    def conv_param(k, ksize, cin, cout):
        kw, kb = jax.random.split(k)
        fan_in = ksize * ksize * cin
        w = jax.random.normal(kw, (ksize, ksize, cin, cout), jnp.float32)
        w = w * (2.0 / fan_in) ** 0.5
        b = 0.01 * jax.random.normal(kb, (cout,), jnp.float32)
        return w, b

    keys = jax.random.split(key, 8)
    return {
        "E1":   conv_param(keys[0], 3, num_bins, C),
        "E2":   conv_param(keys[1], 3, C, C),
        "R1a":  conv_param(keys[2], 3, C, C),
        "R1b":  conv_param(keys[3], 3, C, C),
        "E3":   conv_param(keys[4], 3, C, C),
        "R2a":  conv_param(keys[5], 3, C, C),
        "R2b":  conv_param(keys[6], 3, C, C),
        "pred": conv_param(keys[7], 1, C, 2),
    }


def fireflownet_forward(params, inputs_nchw):
    """inputs: (N, num_bins=4, H, W) NCHW.  Returns {'flow3': (N, 2, H, W)}."""
    N, Cin, H, W = inputs_nchw.shape
    HW = H * W
    C = params["E2"][0].shape[-1]
    pack = _sublane_pack(_MATMUL_DTYPE)
    cin_pad = -(-Cin // pack) * pack

    # TODO(synk): support HW not a multiple of 128 / C not a multiple of the
    #             patch-dtype sublane packing (would need lane/channel padding).
    assert HW % 128 == 0 and C % pack == 0

    # Input lane-dense: NCHW -> (N, Cin, H*W); zero-pad channels so every
    # im2col tap store is sublane-aligned for the patch dtype.
    x = inputs_nchw.reshape(N, Cin, HW)
    if cin_pad != Cin:
        x = jnp.pad(x, ((0, 0), (0, cin_pad - Cin), (0, 0)))

    # Weights pre-packed channel-major in bf16: HWIO (3,3,ci,co) -> (co, 9*ci).
    mid_names = ("E2", "R1a", "R1b", "E3", "R2a", "R2b")
    w_e1 = jnp.pad(params["E1"][0],
                   ((0, 0), (0, 0), (0, cin_pad - Cin), (0, 0)))
    w_e1_t = w_e1.reshape(9 * cin_pad, C).T.astype(_MATMUL_DTYPE)   # (C, 9*cin_pad)
    w_mid_t = jnp.stack(
        [params[k][0].reshape(9 * C, C).T for k in mid_names]
    ).astype(_MATMUL_DTYPE)                                         # (6, C, 9*C)
    w_pred_t = params["pred"][0].reshape(C, 2).T.astype(_MATMUL_DTYPE)  # (2, C)
    b_convs = jnp.stack([params["E1"][1]] + [params[k][1] for k in mid_names],
                        axis=1)                                     # (C, 7) f32
    b_pred = params["pred"][1].reshape(2, 1)                        # (2, 1) f32

    # Per-tap 0/1 border masks over the flat pixel index, (9, HW), matching the
    # pltpu.roll taps ('same' zero padding without padded buffers).
    yy, xx = jnp.meshgrid(jnp.arange(H), jnp.arange(W), indexing="ij")
    yy = yy.reshape(-1)
    xx = xx.reshape(-1)
    masks = jnp.stack(
        [((yy + dy >= 0) & (yy + dy < H) & (xx + dx >= 0) & (xx + dx < W)
          ).astype(jnp.float32) for dy, dx in _OFFSETS])            # (9, HW)

    kernel = _make_fused_kernel(H, W, C, cin_pad, _MATMUL_DTYPE)

    flow = pl.pallas_call(
        kernel,
        out_shape=jax.ShapeDtypeStruct((N, 2, HW), jnp.float32),
        grid=(N,),
        in_specs=[
            pl.BlockSpec((1, cin_pad, HW), lambda n: (n, 0, 0)),
            pl.BlockSpec(w_e1_t.shape, lambda n: (0, 0)),
            pl.BlockSpec(w_mid_t.shape, lambda n: (0, 0, 0)),
            pl.BlockSpec(w_pred_t.shape, lambda n: (0, 0)),
            pl.BlockSpec(b_convs.shape, lambda n: (0, 0)),
            pl.BlockSpec(b_pred.shape, lambda n: (0, 0)),
            pl.BlockSpec(masks.shape, lambda n: (0, 0)),
        ],
        out_specs=pl.BlockSpec((1, 2, HW), lambda n: (n, 0, 0)),
        scratch_shapes=[
            pltpu.VMEM((C, HW), jnp.float32),                       # ping act
            pltpu.VMEM((C, HW), jnp.float32),                       # pong act
            pltpu.VMEM((9 * max(C, cin_pad), HW), _MATMUL_DTYPE),   # im2col patches
        ],
        compiler_params=pltpu.CompilerParams(
            dimension_semantics=("parallel",)),
    )(x, w_e1_t, w_mid_t, w_pred_t, b_convs, b_pred, masks)

    return {"flow3": flow.reshape(N, 2, H, W)}        # already channel-major


if __name__ == "__main__":
    key = jax.random.PRNGKey(0)
    k_param, k_input = jax.random.split(key)

    BASE_CHANNELS = 32
    N, BINS, H, W = 2, 4, 16, 16

    params = init_params(k_param, base_channels=BASE_CHANNELS, num_bins=BINS)
    x = jax.random.normal(k_input, (N, BINS, H, W), jnp.float32)

    out = fireflownet_forward(params, x)
    flow = jax.block_until_ready(out["flow3"])

    assert flow.shape == (N, 2, H, W), flow.shape
    assert flow.dtype == jnp.float32
    assert bool(jnp.all(jnp.isfinite(flow)))
    assert bool(jnp.all(jnp.abs(flow) <= 1.0))        # tanh output range

    print("KERNEL_OK")
</pallas_src>

<mosaic_0001>
module attributes {stable_mosaic.version = 11 : i64} {
  func.func @kernel(%arg0: i32, %arg1: memref<1x16x256xf32, #tpu.memory_space<vmem>>, %arg2: memref<32x144xbf16, #tpu.memory_space<vmem>>, %arg3: memref<6x32x288xbf16, #tpu.memory_space<vmem>>, %arg4: memref<2x32xbf16, #tpu.memory_space<vmem>>, %arg5: memref<32x7xf32, #tpu.memory_space<vmem>>, %arg6: memref<2x1xf32, #tpu.memory_space<vmem>>, %arg7: memref<9x256xf32, #tpu.memory_space<vmem>>, %arg8: memref<1x2x256xf32, #tpu.memory_space<vmem>>, %arg9: memref<32x256xf32, #tpu.memory_space<vmem>>, %arg10: memref<32x256xf32, #tpu.memory_space<vmem>>, %arg11: memref<288x256xbf16, #tpu.memory_space<vmem>>) attributes {dimension_semantics = [#tpu.dimension_semantics<parallel>], iteration_bounds = array<i64: 2>, scalar_prefetch = 0 : i64, scratch_operands = 3 : i64, tpu.core_type = #tpu.core_type<tc>, window_params = [{transform_indices = @transform_0, window_bounds = array<i64: 1, 16, 256>}, {pipeline_mode = #tpu.pipeline_mode<synchronous>, transform_indices = @transform_1, window_bounds = array<i64: 32, 144>}, {pipeline_mode = #tpu.pipeline_mode<synchronous>, transform_indices = @transform_2, window_bounds = array<i64: 6, 32, 288>}, {pipeline_mode = #tpu.pipeline_mode<synchronous>, transform_indices = @transform_3, window_bounds = array<i64: 2, 32>}, {pipeline_mode = #tpu.pipeline_mode<synchronous>, transform_indices = @transform_4, window_bounds = array<i64: 32, 7>}, {pipeline_mode = #tpu.pipeline_mode<synchronous>, transform_indices = @transform_5, window_bounds = array<i64: 2, 1>}, {pipeline_mode = #tpu.pipeline_mode<synchronous>, transform_indices = @transform_6, window_bounds = array<i64: 9, 256>}, {transform_indices = @transform_7, window_bounds = array<i64: 1, 2, 256>}]} {
    %c0 = arith.constant 0 : index
    %c0_0 = arith.constant 0 : index
    %c0_1 = arith.constant 0 : index
    %0 = vector.load %arg1[%c0, %c0_0, %c0_1] : memref<1x16x256xf32, #tpu.memory_space<vmem>>, vector<1x16x256xf32>
    %1 = vector.shape_cast %0 : vector<1x16x256xf32> to vector<16x256xf32>
    %c0_2 = arith.constant 0 : index
    %c0_3 = arith.constant 0 : index
    %2 = vector.load %arg2[%c0_2, %c0_3] : memref<32x144xbf16, #tpu.memory_space<vmem>>, vector<32x144xbf16>
    %c17_i32 = arith.constant 17 : i32
    %3 = tpu.dynamic_rotate %1 by %c17_i32 dim 1 : vector<16x256xf32>, i32 -> vector<16x256xf32>
    %c0_4 = arith.constant 0 : index
    %c0_5 = arith.constant 0 : index
    %4 = vector.load %arg7[%c0_4, %c0_5] : memref<9x256xf32, #tpu.memory_space<vmem>>, vector<1x256xf32>
    %5 = vector.broadcast %4 : vector<1x256xf32> to vector<16x256xf32>
    %6 = arith.mulf %3, %5 : vector<16x256xf32>
    %7 = arith.truncf %6 : vector<16x256xf32> to vector<16x256xbf16>
    %c0_6 = arith.constant 0 : index
    %c0_7 = arith.constant 0 : index
    %8 = vector.load %arg11[%c0_6, %c0_7] : memref<288x256xbf16, #tpu.memory_space<vmem>>, vector<16x256xbf16>
    tpu.vector_store %arg11[%c0_6, %c0_7], %7 {strides = array<i32>} : memref<288x256xbf16, #tpu.memory_space<vmem>>, vector<16x256xbf16>,
    %c16_i32 = arith.constant 16 : i32
    %9 = tpu.dynamic_rotate %1 by %c16_i32 dim 1 : vector<16x256xf32>, i32 -> vector<16x256xf32>
    %c1 = arith.constant 1 : index
    %c0_8 = arith.constant 0 : index
    %10 = vector.load %arg7[%c1, %c0_8] : memref<9x256xf32, #tpu.memory_space<vmem>>, vector<1x256xf32>
    %11 = vector.broadcast %10 : vector<1x256xf32> to vector<16x256xf32>
    %12 = arith.mulf %9, %11 : vector<16x256xf32>
    %13 = arith.truncf %12 : vector<16x256xf32> to vector<16x256xbf16>
    %c16 = arith.constant 16 : index
    %c0_9 = arith.constant 0 : index
    %14 = vector.load %arg11[%c16, %c0_9] : memref<288x256xbf16, #tpu.memory_space<vmem>>, vector<16x256xbf16>
    tpu.vector_store %arg11[%c16, %c0_9], %13 {strides = array<i32>} : memref<288x256xbf16, #tpu.memory_space<vmem>>, vector<16x256xbf16>,
    %c15_i32 = arith.constant 15 : i32
    %15 = tpu.dynamic_rotate %1 by %c15_i32 dim 1 : vector<16x256xf32>, i32 -> vector<16x256xf32>
    %c2 = arith.constant 2 : index
    %c0_10 = arith.constant 0 : index
    %16 = vector.load %arg7[%c2, %c0_10] : memref<9x256xf32, #tpu.memory_space<vmem>>, vector<1x256xf32>
    %17 = vector.broadcast %16 : vector<1x256xf32> to vector<16x256xf32>
    %18 = arith.mulf %15, %17 : vector<16x256xf32>
    %19 = arith.truncf %18 : vector<16x256xf32> to vector<16x256xbf16>
    %c32 = arith.constant 32 : index
    %c0_11 = arith.constant 0 : index
    %20 = vector.load %arg11[%c32, %c0_11] : memref<288x256xbf16, #tpu.memory_space<vmem>>, vector<16x256xbf16>
    tpu.vector_store %arg11[%c32, %c0_11], %19 {strides = array<i32>} : memref<288x256xbf16, #tpu.memory_space<vmem>>, vector<16x256xbf16>,
    %c1_i32 = arith.constant 1 : i32
    %21 = tpu.dynamic_rotate %1 by %c1_i32 dim 1 : vector<16x256xf32>, i32 -> vector<16x256xf32>
    %c3 = arith.constant 3 : index
    %c0_12 = arith.constant 0 : index
    %22 = vector.load %arg7[%c3, %c0_12] : memref<9x256xf32, #tpu.memory_space<vmem>>, vector<1x256xf32>
    %23 = vector.broadcast %22 : vector<1x256xf32> to vector<16x256xf32>
    %24 = arith.mulf %21, %23 : vector<16x256xf32>
    %25 = arith.truncf %24 : vector<16x256xf32> to vector<16x256xbf16>
    %c48 = arith.constant 48 : index
    %c0_13 = arith.constant 0 : index
    %26 = vector.load %arg11[%c48, %c0_13] : memref<288x256xbf16, #tpu.memory_space<vmem>>, vector<16x256xbf16>
    tpu.vector_store %arg11[%c48, %c0_13], %25 {strides = array<i32>} : memref<288x256xbf16, #tpu.memory_space<vmem>>, vector<16x256xbf16>,
    %27 = arith.truncf %1 : vector<16x256xf32> to vector<16x256xbf16>
    %c64 = arith.constant 64 : index
    %c0_14 = arith.constant 0 : index
    %28 = vector.load %arg11[%c64, %c0_14] : memref<288x256xbf16, #tpu.memory_space<vmem>>, vector<16x256xbf16>
    tpu.vector_store %arg11[%c64, %c0_14], %27 {strides = array<i32>} : memref<288x256xbf16, #tpu.memory_space<vmem>>, vector<16x256xbf16>,
    %c255_i32 = arith.constant 255 : i32
    %29 = tpu.dynamic_rotate %1 by %c255_i32 dim 1 : vector<16x256xf32>, i32 -> vector<16x256xf32>
    %c5 = arith.constant 5 : index
    %c0_15 = arith.constant 0 : index
    %30 = vector.load %arg7[%c5, %c0_15] : memref<9x256xf32, #tpu.memory_space<vmem>>, vector<1x256xf32>
    %31 = vector.broadcast %30 : vector<1x256xf32> to vector<16x256xf32>
    %32 = arith.mulf %29, %31 : vector<16x256xf32>
    %33 = arith.truncf %32 : vector<16x256xf32> to vector<16x256xbf16>
    %c80 = arith.constant 80 : index
    %c0_16 = arith.constant 0 : index
    %34 = vector.load %arg11[%c80, %c0_16] : memref<288x256xbf16, #tpu.memory_space<vmem>>, vector<16x256xbf16>
    tpu.vector_store %arg11[%c80, %c0_16], %33 {strides = array<i32>} : memref<288x256xbf16, #tpu.memory_space<vmem>>, vector<16x256xbf16>,
    %c241_i32 = arith.constant 241 : i32
    %35 = tpu.dynamic_rotate %1 by %c241_i32 dim 1 : vector<16x256xf32>, i32 -> vector<16x256xf32>
    %c6 = arith.constant 6 : index
    %c0_17 = arith.constant 0 : index
    %36 = vector.load %arg7[%c6, %c0_17] : memref<9x256xf32, #tpu.memory_space<vmem>>, vector<1x256xf32>
    %37 = vector.broadcast %36 : vector<1x256xf32> to vector<16x256xf32>
    %38 = arith.mulf %35, %37 : vector<16x256xf32>
    %39 = arith.truncf %38 : vector<16x256xf32> to vector<16x256xbf16>
    %c96 = arith.constant 96 : index
    %c0_18 = arith.constant 0 : index
    %40 = vector.load %arg11[%c96, %c0_18] : memref<288x256xbf16, #tpu.memory_space<vmem>>, vector<16x256xbf16>
    tpu.vector_store %arg11[%c96, %c0_18], %39 {strides = array<i32>} : memref<288x256xbf16, #tpu.memory_space<vmem>>, vector<16x256xbf16>,
    %c240_i32 = arith.constant 240 : i32
    %41 = tpu.dynamic_rotate %1 by %c240_i32 dim 1 : vector<16x256xf32>, i32 -> vector<16x256xf32>
    %c7 = arith.constant 7 : index
    %c0_19 = arith.constant 0 : index
    %42 = vector.load %arg7[%c7, %c0_19] : memref<9x256xf32, #tpu.memory_space<vmem>>, vector<1x256xf32>
    %43 = vector.broadcast %42 : vector<1x256xf32> to vector<16x256xf32>
    %44 = arith.mulf %41, %43 : vector<16x256xf32>
    %45 = arith.truncf %44 : vector<16x256xf32> to vector<16x256xbf16>
    %c112 = arith.constant 112 : index
    %c0_20 = arith.constant 0 : index
    %46 = vector.load %arg11[%c112, %c0_20] : memref<288x256xbf16, #tpu.memory_space<vmem>>, vector<16x256xbf16>
    tpu.vector_store %arg11[%c112, %c0_20], %45 {strides = array<i32>} : memref<288x256xbf16, #tpu.memory_space<vmem>>, vector<16x256xbf16>,
    %c239_i32 = arith.constant 239 : i32
    %47 = tpu.dynamic_rotate %1 by %c239_i32 dim 1 : vector<16x256xf32>, i32 -> vector<16x256xf32>
    %c8 = arith.constant 8 : index
    %c0_21 = arith.constant 0 : index
    %48 = vector.load %arg7[%c8, %c0_21] : memref<9x256xf32, #tpu.memory_space<vmem>>, vector<1x256xf32>
    %49 = vector.broadcast %48 : vector<1x256xf32> to vector<16x256xf32>
    %50 = arith.mulf %47, %49 : vector<16x256xf32>
    %51 = arith.truncf %50 : vector<16x256xf32> to vector<16x256xbf16>
    %c128 = arith.constant 128 : index
    %c0_22 = arith.constant 0 : index
    %52 = vector.load %arg11[%c128, %c0_22] : memref<288x256xbf16, #tpu.memory_space<vmem>>, vector<16x256xbf16>
    tpu.vector_store %arg11[%c128, %c0_22], %51 {strides = array<i32>} : memref<288x256xbf16, #tpu.memory_space<vmem>>, vector<16x256xbf16>,
    %c0_23 = arith.constant 0 : index
    %c0_24 = arith.constant 0 : index
    %53 = vector.load %arg11[%c0_23, %c0_24] : memref<288x256xbf16, #tpu.memory_space<vmem>>, vector<144x256xbf16>
    %cst = arith.constant dense<0.000000e+00> : vector<32x256xf32>
    %54 = tpu.matmul %2, %53, %cst {dimension_numbers = #tpu.dot_dimension_numbers<[1], [0], [0], [1], [0, 0, 1, 1], [], []>} : vector<32x144xbf16>, vector<144x256xbf16>, vector<32x256xf32> -> vector<32x256xf32>
    %c0_25 = arith.constant 0 : index
    %c0_26 = arith.constant 0 : index
    %55 = vector.load %arg5[%c0_25, %c0_26] : memref<32x7xf32, #tpu.memory_space<vmem>>, vector<32x1xf32>
    %56 = vector.broadcast %55 : vector<32x1xf32> to vector<32x256xf32>
    %57 = arith.addf %54, %56 : vector<32x256xf32>
    %cst_27 = arith.constant 0.000000e+00 : f32
    %58 = vector.broadcast %cst_27 : f32 to vector<32x256xf32>
    %59 = arith.maximumf %57, %58 : vector<32x256xf32>
    %c0_28 = arith.constant 0 : index
    %c0_29 = arith.constant 0 : index
    %60 = vector.load %arg9[%c0_28, %c0_29] : memref<32x256xf32, #tpu.memory_space<vmem>>, vector<32x256xf32>
    tpu.vector_store %arg9[%c0_28, %c0_29], %59 {strides = array<i32>} : memref<32x256xf32, #tpu.memory_space<vmem>>, vector<32x256xf32>,
    %c0_30 = arith.constant 0 : index
    %c0_31 = arith.constant 0 : index
    %61 = vector.load %arg9[%c0_30, %c0_31] : memref<32x256xf32, #tpu.memory_space<vmem>>, vector<32x256xf32>
    %c0_32 = arith.constant 0 : index
    %c0_33 = arith.constant 0 : index
    %c0_34 = arith.constant 0 : index
    %62 = vector.load %arg3[%c0_32, %c0_33, %c0_34] : memref<6x32x288xbf16, #tpu.memory_space<vmem>>, vector<1x32x288xbf16>
    %63 = vector.shape_cast %62 : vector<1x32x288xbf16> to vector<32x288xbf16>
    %c17_i32_35 = arith.constant 17 : i32
    %64 = tpu.dynamic_rotate %61 by %c17_i32_35 dim 1 : vector<32x256xf32>, i32 -> vector<32x256xf32>
    %c0_36 = arith.constant 0 : index
    %c0_37 = arith.constant 0 : index
    %65 = vector.load %arg7[%c0_36, %c0_37] : memref<9x256xf32, #tpu.memory_space<vmem>>, vector<1x256xf32>
    %66 = vector.broadcast %65 : vector<1x256xf32> to vector<32x256xf32>
    %67 = arith.mulf %64, %66 : vector<32x256xf32>
    %68 = arith.truncf %67 : vector<32x256xf32> to vector<32x256xbf16>
    %c0_38 = arith.constant 0 : index
    %c0_39 = arith.constant 0 : index
    %69 = vector.load %arg11[%c0_38, %c0_39] : memref<288x256xbf16, #tpu.memory_space<vmem>>, vector<32x256xbf16>
    tpu.vector_store %arg11[%c0_38, %c0_39], %68 {strides = array<i32>} : memref<288x256xbf16, #tpu.memory_space<vmem>>, vector<32x256xbf16>,
    %c16_i32_40 = arith.constant 16 : i32
    %70 = tpu.dynamic_rotate %61 by %c16_i32_40 dim 1 : vector<32x256xf32>, i32 -> vector<32x256xf32>
    %c1_41 = arith.constant 1 : index
    %c0_42 = arith.constant 0 : index
    %71 = vector.load %arg7[%c1_41, %c0_42] : memref<9x256xf32, #tpu.memory_space<vmem>>, vector<1x256xf32>
    %72 = vector.broadcast %71 : vector<1x256xf32> to vector<32x256xf32>
    %73 = arith.mulf %70, %72 : vector<32x256xf32>
    %74 = arith.truncf %73 : vector<32x256xf32> to vector<32x256xbf16>
    %c32_43 = arith.constant 32 : index
    %c0_44 = arith.constant 0 : index
    %75 = vector.load %arg11[%c32_43, %c0_44] : memref<288x256xbf16, #tpu.memory_space<vmem>>, vector<32x256xbf16>
    tpu.vector_store %arg11[%c32_43, %c0_44], %74 {strides = array<i32>} : memref<288x256xbf16, #tpu.memory_space<vmem>>, vector<32x256xbf16>,
    %c15_i32_45 = arith.constant 15 : i32
    %76 = tpu.dynamic_rotate %61 by %c15_i32_45 dim 1 : vector<32x256xf32>, i32 -> vector<32x256xf32>
    %c2_46 = arith.constant 2 : index
    %c0_47 = arith.constant 0 : index
    %77 = vector.load %arg7[%c2_46, %c0_47] : memref<9x256xf32, #tpu.memory_space<vmem>>, vector<1x256xf32>
    %78 = vector.broadcast %77 : vector<1x256xf32> to vector<32x256xf32>
    %79 = arith.mulf %76, %78 : vector<32x256xf32>
    %80 = arith.truncf %79 : vector<32x256xf32> to vector<32x256xbf16>
    %c64_48 = arith.constant 64 : index
    %c0_49 = arith.constant 0 : index
    %81 = vector.load %arg11[%c64_48, %c0_49] : memref<288x256xbf16, #tpu.memory_space<vmem>>, vector<32x256xbf16>
    tpu.vector_store %arg11[%c64_48, %c0_49], %80 {strides = array<i32>} : memref<288x256xbf16, #tpu.memory_space<vmem>>, vector<32x256xbf16>,
    %c1_i32_50 = arith.constant 1 : i32
    %82 = tpu.dynamic_rotate %61 by %c1_i32_50 dim 1 : vector<32x256xf32>, i32 -> vector<32x256xf32>
    %c3_51 = arith.constant 3 : index
    %c0_52 = arith.constant 0 : index
    %83 = vector.load %arg7[%c3_51, %c0_52] : memref<9x256xf32, #tpu.memory_space<vmem>>, vector<1x256xf32>
    %84 = vector.broadcast %83 : vector<1x256xf32> to vector<32x256xf32>
    %85 = arith.mulf %82, %84 : vector<32x256xf32>
    %86 = arith.truncf %85 : vector<32x256xf32> to vector<32x256xbf16>
    %c96_53 = arith.constant 96 : index
    %c0_54 = arith.constant 0 : index
    %87 = vector.load %arg11[%c96_53, %c0_54] : memref<288x256xbf16, #tpu.memory_space<vmem>>, vector<32x256xbf16>
    tpu.vector_store %arg11[%c96_53, %c0_54], %86 {strides = array<i32>} : memref<288x256xbf16, #tpu.memory_space<vmem>>, vector<32x256xbf16>,
    %88 = arith.truncf %61 : vector<32x256xf32> to vector<32x256xbf16>
    %c128_55 = arith.constant 128 : index
    %c0_56 = arith.constant 0 : index
    %89 = vector.load %arg11[%c128_55, %c0_56] : memref<288x256xbf16, #tpu.memory_space<vmem>>, vector<32x256xbf16>
    tpu.vector_store %arg11[%c128_55, %c0_56], %88 {strides = array<i32>} : memref<288x256xbf16, #tpu.memory_space<vmem>>, vector<32x256xbf16>,
    %c255_i32_57 = arith.constant 255 : i32
    %90 = tpu.dynamic_rotate %61 by %c255_i32_57 dim 1 : vector<32x256xf32>, i32 -> vector<32x256xf32>
    %c5_58 = arith.constant 5 : index
    %c0_59 = arith.constant 0 : index
    %91 = vector.load %arg7[%c5_58, %c0_59] : memref<9x256xf32, #tpu.memory_space<vmem>>, vector<1x256xf32>
    %92 = vector.broadcast %91 : vector<1x256xf32> to vector<32x256xf32>
    %93 = arith.mulf %90, %92 : vector<32x256xf32>
    %94 = arith.truncf %93 : vector<32x256xf32> to vector<32x256xbf16>
    %c160 = arith.constant 160 : index
    %c0_60 = arith.constant 0 : index
    %95 = vector.load %arg11[%c160, %c0_60] : memref<288x256xbf16, #tpu.memory_space<vmem>>, vector<32x256xbf16>
    tpu.vector_store %arg11[%c160, %c0_60], %94 {strides = array<i32>} : memref<288x256xbf16, #tpu.memory_space<vmem>>, vector<32x256xbf16>,
    %c241_i32_61 = arith.constant 241 : i32
    %96 = tpu.dynamic_rotate %61 by %c241_i32_61 dim 1 : vector<32x256xf32>, i32 -> vector<32x256xf32>
    %c6_62 = arith.constant 6 : index
    %c0_63 = arith.constant 0 : index
    %97 = vector.load %arg7[%c6_62, %c0_63] : memref<9x256xf32, #tpu.memory_space<vmem>>, vector<1x256xf32>
    %98 = vector.broadcast %97 : vector<1x256xf32> to vector<32x256xf32>
    %99 = arith.mulf %96, %98 : vector<32x256xf32>
    %100 = arith.truncf %99 : vector<32x256xf32> to vector<32x256xbf16>
    %c192 = arith.constant 192 : index
    %c0_64 = arith.constant 0 : index
    %101 = vector.load %arg11[%c192, %c0_64] : memref<288x256xbf16, #tpu.memory_space<vmem>>, vector<32x256xbf16>
    tpu.vector_store %arg11[%c192, %c0_64], %100 {strides = array<i32>} : memref<288x256xbf16, #tpu.memory_space<vmem>>, vector<32x256xbf16>,
    %c240_i32_65 = arith.constant 240 : i32
    %102 = tpu.dynamic_rotate %61 by %c240_i32_65 dim 1 : vector<32x256xf32>, i32 -> vector<32x256xf32>
    %c7_66 = arith.constant 7 : index
    %c0_67 = arith.constant 0 : index
    %103 = vector.load %arg7[%c7_66, %c0_67] : memref<9x256xf32, #tpu.memory_space<vmem>>, vector<1x256xf32>
    %104 = vector.broadcast %103 : vector<1x256xf32> to vector<32x256xf32>
    %105 = arith.mulf %102, %104 : vector<32x256xf32>
    %106 = arith.truncf %105 : vector<32x256xf32> to vector<32x256xbf16>
    %c224 = arith.constant 224 : index
    %c0_68 = arith.constant 0 : index
    %107 = vector.load %arg11[%c224, %c0_68] : memref<288x256xbf16, #tpu.memory_space<vmem>>, vector<32x256xbf16>
    tpu.vector_store %arg11[%c224, %c0_68], %106 {strides = array<i32>} : memref<288x256xbf16, #tpu.memory_space<vmem>>, vector<32x256xbf16>,
    %c239_i32_69 = arith.constant 239 : i32
    %108 = tpu.dynamic_rotate %61 by %c239_i32_69 dim 1 : vector<32x256xf32>, i32 -> vector<32x256xf32>
    %c8_70 = arith.constant 8 : index
    %c0_71 = arith.constant 0 : index
    %109 = vector.load %arg7[%c8_70, %c0_71] : memref<9x256xf32, #tpu.memory_space<vmem>>, vector<1x256xf32>
    %110 = vector.broadcast %109 : vector<1x256xf32> to vector<32x256xf32>
    %111 = arith.mulf %108, %110 : vector<32x256xf32>
    %112 = arith.truncf %111 : vector<32x256xf32> to vector<32x256xbf16>
    %c256 = arith.constant 256 : index
    %c0_72 = arith.constant 0 : index
    %113 = vector.load %arg11[%c256, %c0_72] : memref<288x256xbf16, #tpu.memory_space<vmem>>, vector<32x256xbf16>
    tpu.vector_store %arg11[%c256, %c0_72], %112 {strides = array<i32>} : memref<288x256xbf16, #tpu.memory_space<vmem>>, vector<32x256xbf16>,
    %c0_73 = arith.constant 0 : index
    %c0_74 = arith.constant 0 : index
    %114 = vector.load %arg11[%c0_73, %c0_74] : memref<288x256xbf16, #tpu.memory_space<vmem>>, vector<288x256xbf16>
    %cst_75 = arith.constant dense<0.000000e+00> : vector<32x256xf32>
    %115 = tpu.matmul %63, %114, %cst_75 {dimension_numbers = #tpu.dot_dimension_numbers<[1], [0], [0], [1], [0, 0, 1, 1], [], []>} : vector<32x288xbf16>, vector<288x256xbf16>, vector<32x256xf32> -> vector<32x256xf32>
    %c0_76 = arith.constant 0 : index
    %c1_77 = arith.constant 1 : index
    %116 = vector.load %arg5[%c0_76, %c1_77] : memref<32x7xf32, #tpu.memory_space<vmem>>, vector<32x1xf32>
    %117 = vector.broadcast %116 : vector<32x1xf32> to vector<32x256xf32>
    %118 = arith.addf %115, %117 : vector<32x256xf32>
    %cst_78 = arith.constant 0.000000e+00 : f32
    %119 = vector.broadcast %cst_78 : f32 to vector<32x256xf32>
    %120 = arith.maximumf %118, %119 : vector<32x256xf32>
    %c0_79 = arith.constant 0 : index
    %c0_80 = arith.constant 0 : index
    %121 = vector.load %arg10[%c0_79, %c0_80] : memref<32x256xf32, #tpu.memory_space<vmem>>, vector<32x256xf32>
    tpu.vector_store %arg10[%c0_79, %c0_80], %120 {strides = array<i32>} : memref<32x256xf32, #tpu.memory_space<vmem>>, vector<32x256xf32>,
    %c0_81 = arith.constant 0 : index
    %c0_82 = arith.constant 0 : index
    %122 = vector.load %arg10[%c0_81, %c0_82] : memref<32x256xf32, #tpu.memory_space<vmem>>, vector<32x256xf32>
    %c1_83 = arith.constant 1 : index
    %c0_84 = arith.constant 0 : index
    %c0_85 = arith.constant 0 : index
    %123 = vector.load %arg3[%c1_83, %c0_84, %c0_85] : memref<6x32x288xbf16, #tpu.memory_space<vmem>>, vector<1x32x288xbf16>
    %124 = vector.shape_cast %123 : vector<1x32x288xbf16> to vector<32x288xbf16>
    %c17_i32_86 = arith.constant 17 : i32
    %125 = tpu.dynamic_rotate %122 by %c17_i32_86 dim 1 : vector<32x256xf32>, i32 -> vector<32x256xf32>
    %c0_87 = arith.constant 0 : index
    %c0_88 = arith.constant 0 : index
    %126 = vector.load %arg7[%c0_87, %c0_88] : memref<9x256xf32, #tpu.memory_space<vmem>>, vector<1x256xf32>
    %127 = vector.broadcast %126 : vector<1x256xf32> to vector<32x256xf32>
    %128 = arith.mulf %125, %127 : vector<32x256xf32>
    %129 = arith.truncf %128 : vector<32x256xf32> to vector<32x256xbf16>
    %c0_89 = arith.constant 0 : index
    %c0_90 = arith.constant 0 : index
    %130 = vector.load %arg11[%c0_89, %c0_90] : memref<288x256xbf16, #tpu.memory_space<vmem>>, vector<32x256xbf16>
    tpu.vector_store %arg11[%c0_89, %c0_90], %129 {strides = array<i32>} : memref<288x256xbf16, #tpu.memory_space<vmem>>, vector<32x256xbf16>,
    %c16_i32_91 = arith.constant 16 : i32
    %131 = tpu.dynamic_rotate %122 by %c16_i32_91 dim 1 : vector<32x256xf32>, i32 -> vector<32x256xf32>
    %c1_92 = arith.constant 1 : index
    %c0_93 = arith.constant 0 : index
    %132 = vector.load %arg7[%c1_92, %c0_93] : memref<9x256xf32, #tpu.memory_space<vmem>>, vector<1x256xf32>
    %133 = vector.broadcast %132 : vector<1x256xf32> to vector<32x256xf32>
    %134 = arith.mulf %131, %133 : vector<32x256xf32>
    %135 = arith.truncf %134 : vector<32x256xf32> to vector<32x256xbf16>
    %c32_94 = arith.constant 32 : index
    %c0_95 = arith.constant 0 : index
    %136 = vector.load %arg11[%c32_94, %c0_95] : memref<288x256xbf16, #tpu.memory_space<vmem>>, vector<32x256xbf16>
    tpu.vector_store %arg11[%c32_94, %c0_95], %135 {strides = array<i32>} : memref<288x256xbf16, #tpu.memory_space<vmem>>, vector<32x256xbf16>,
    %c15_i32_96 = arith.constant 15 : i32
    %137 = tpu.dynamic_rotate %122 by %c15_i32_96 dim 1 : vector<32x256xf32>, i32 -> vector<32x256xf32>
    %c2_97 = arith.constant 2 : index
    %c0_98 = arith.constant 0 : index
    %138 = vector.load %arg7[%c2_97, %c0_98] : memref<9x256xf32, #tpu.memory_space<vmem>>, vector<1x256xf32>
    %139 = vector.broadcast %138 : vector<1x256xf32> to vector<32x256xf32>
    %140 = arith.mulf %137, %139 : vector<32x256xf32>
    %141 = arith.truncf %140 : vector<32x256xf32> to vector<32x256xbf16>
    %c64_99 = arith.constant 64 : index
    %c0_100 = arith.constant 0 : index
    %142 = vector.load %arg11[%c64_99, %c0_100] : memref<288x256xbf16, #tpu.memory_space<vmem>>, vector<32x256xbf16>
    tpu.vector_store %arg11[%c64_99, %c0_100], %141 {strides = array<i32>} : memref<288x256xbf16, #tpu.memory_space<vmem>>, vector<32x256xbf16>,
    %c1_i32_101 = arith.constant 1 : i32
    %143 = tpu.dynamic_rotate %122 by %c1_i32_101 dim 1 : vector<32x256xf32>, i32 -> vector<32x256xf32>
    %c3_102 = arith.constant 3 : index
    %c0_103 = arith.constant 0 : index
    %144 = vector.load %arg7[%c3_102, %c0_103] : memref<9x256xf32, #tpu.memory_space<vmem>>, vector<1x256xf32>
    %145 = vector.broadcast %144 : vector<1x256xf32> to vector<32x256xf32>
    %146 = arith.mulf %143, %145 : vector<32x256xf32>
    %147 = arith.truncf %146 : vector<32x256xf32> to vector<32x256xbf16>
    %c96_104 = arith.constant 96 : index
    %c0_105 = arith.constant 0 : index
    %148 = vector.load %arg11[%c96_104, %c0_105] : memref<288x256xbf16, #tpu.memory_space<vmem>>, vector<32x256xbf16>
    tpu.vector_store %arg11[%c96_104, %c0_105], %147 {strides = array<i32>} : memref<288x256xbf16, #tpu.memory_space<vmem>>, vector<32x256xbf16>,
    %149 = arith.truncf %122 : vector<32x256xf32> to vector<32x256xbf16>
    %c128_106 = arith.constant 128 : index
    %c0_107 = arith.constant 0 : index
    %150 = vector.load %arg11[%c128_106, %c0_107] : memref<288x256xbf16, #tpu.memory_space<vmem>>, vector<32x256xbf16>
    tpu.vector_store %arg11[%c128_106, %c0_107], %149 {strides = array<i32>} : memref<288x256xbf16, #tpu.memory_space<vmem>>, vector<32x256xbf16>,
    %c255_i32_108 = arith.constant 255 : i32
    %151 = tpu.dynamic_rotate %122 by %c255_i32_108 dim 1 : vector<32x256xf32>, i32 -> vector<32x256xf32>
    %c5_109 = arith.constant 5 : index
    %c0_110 = arith.constant 0 : index
    %152 = vector.load %arg7[%c5_109, %c0_110] : memref<9x256xf32, #tpu.memory_space<vmem>>, vector<1x256xf32>
    %153 = vector.broadcast %152 : vector<1x256xf32> to vector<32x256xf32>
    %154 = arith.mulf %151, %153 : vector<32x256xf32>
    %155 = arith.truncf %154 : vector<32x256xf32> to vector<32x256xbf16>
    %c160_111 = arith.constant 160 : index
    %c0_112 = arith.constant 0 : index
    %156 = vector.load %arg11[%c160_111, %c0_112] : memref<288x256xbf16, #tpu.memory_space<vmem>>, vector<32x256xbf16>
    tpu.vector_store %arg11[%c160_111, %c0_112], %155 {strides = array<i32>} : memref<288x256xbf16, #tpu.memory_space<vmem>>, vector<32x256xbf16>,
    %c241_i32_113 = arith.constant 241 : i32
    %157 = tpu.dynamic_rotate %122 by %c241_i32_113 dim 1 : vector<32x256xf32>, i32 -> vector<32x256xf32>
    %c6_114 = arith.constant 6 : index
    %c0_115 = arith.constant 0 : index
    %158 = vector.load %arg7[%c6_114, %c0_115] : memref<9x256xf32, #tpu.memory_space<vmem>>, vector<1x256xf32>
    %159 = vector.broadcast %158 : vector<1x256xf32> to vector<32x256xf32>
    %160 = arith.mulf %157, %159 : vector<32x256xf32>
    %161 = arith.truncf %160 : vector<32x256xf32> to vector<32x256xbf16>
    %c192_116 = arith.constant 192 : index
    %c0_117 = arith.constant 0 : index
    %162 = vector.load %arg11[%c192_116, %c0_117] : memref<288x256xbf16, #tpu.memory_space<vmem>>, vector<32x256xbf16>
    tpu.vector_store %arg11[%c192_116, %c0_117], %161 {strides = array<i32>} : memref<288x256xbf16, #tpu.memory_space<vmem>>, vector<32x256xbf16>,
    %c240_i32_118 = arith.constant 240 : i32
    %163 = tpu.dynamic_rotate %122 by %c240_i32_118 dim 1 : vector<32x256xf32>, i32 -> vector<32x256xf32>
    %c7_119 = arith.constant 7 : index
    %c0_120 = arith.constant 0 : index
    %164 = vector.load %arg7[%c7_119, %c0_120] : memref<9x256xf32, #tpu.memory_space<vmem>>, vector<1x256xf32>
    %165 = vector.broadcast %164 : vector<1x256xf32> to vector<32x256xf32>
    %166 = arith.mulf %163, %165 : vector<32x256xf32>
    %167 = arith.truncf %166 : vector<32x256xf32> to vector<32x256xbf16>
    %c224_121 = arith.constant 224 : index
    %c0_122 = arith.constant 0 : index
    %168 = vector.load %arg11[%c224_121, %c0_122] : memref<288x256xbf16, #tpu.memory_space<vmem>>, vector<32x256xbf16>
    tpu.vector_store %arg11[%c224_121, %c0_122], %167 {strides = array<i32>} : memref<288x256xbf16, #tpu.memory_space<vmem>>, vector<32x256xbf16>,
    %c239_i32_123 = arith.constant 239 : i32
    %169 = tpu.dynamic_rotate %122 by %c239_i32_123 dim 1 : vector<32x256xf32>, i32 -> vector<32x256xf32>
    %c8_124 = arith.constant 8 : index
    %c0_125 = arith.constant 0 : index
    %170 = vector.load %arg7[%c8_124, %c0_125] : memref<9x256xf32, #tpu.memory_space<vmem>>, vector<1x256xf32>
    %171 = vector.broadcast %170 : vector<1x256xf32> to vector<32x256xf32>
    %172 = arith.mulf %169, %171 : vector<32x256xf32>
    %173 = arith.truncf %172 : vector<32x256xf32> to vector<32x256xbf16>
    %c256_126 = arith.constant 256 : index
    %c0_127 = arith.constant 0 : index
    %174 = vector.load %arg11[%c256_126, %c0_127] : memref<288x256xbf16, #tpu.memory_space<vmem>>, vector<32x256xbf16>
    tpu.vector_store %arg11[%c256_126, %c0_127], %173 {strides = array<i32>} : memref<288x256xbf16, #tpu.memory_space<vmem>>, vector<32x256xbf16>,
    %c0_128 = arith.constant 0 : index
    %c0_129 = arith.constant 0 : index
    %175 = vector.load %arg11[%c0_128, %c0_129] : memref<288x256xbf16, #tpu.memory_space<vmem>>, vector<288x256xbf16>
    %cst_130 = arith.constant dense<0.000000e+00> : vector<32x256xf32>
    %176 = tpu.matmul %124, %175, %cst_130 {dimension_numbers = #tpu.dot_dimension_numbers<[1], [0], [0], [1], [0, 0, 1, 1], [], []>} : vector<32x288xbf16>, vector<288x256xbf16>, vector<32x256xf32> -> vector<32x256xf32>
    %c0_131 = arith.constant 0 : index
    %c2_132 = arith.constant 2 : index
    %177 = vector.load %arg5[%c0_131, %c2_132] : memref<32x7xf32, #tpu.memory_space<vmem>>, vector<32x1xf32>
    %178 = vector.broadcast %177 : vector<32x1xf32> to vector<32x256xf32>
    %179 = arith.addf %176, %178 : vector<32x256xf32>
    %cst_133 = arith.constant 0.000000e+00 : f32
    %180 = vector.broadcast %cst_133 : f32 to vector<32x256xf32>
    %181 = arith.maximumf %179, %180 : vector<32x256xf32>
    %c0_134 = arith.constant 0 : index
    %c0_135 = arith.constant 0 : index
    %182 = vector.load %arg9[%c0_134, %c0_135] : memref<32x256xf32, #tpu.memory_space<vmem>>, vector<32x256xf32>
    tpu.vector_store %arg9[%c0_134, %c0_135], %181 {strides = array<i32>} : memref<32x256xf32, #tpu.memory_space<vmem>>, vector<32x256xf32>,
    %c0_136 = arith.constant 0 : index
    %c0_137 = arith.constant 0 : index
    %183 = vector.load %arg9[%c0_136, %c0_137] : memref<32x256xf32, #tpu.memory_space<vmem>>, vector<32x256xf32>
    %c2_138 = arith.constant 2 : index
    %c0_139 = arith.constant 0 : index
    %c0_140 = arith.constant 0 : index
    %184 = vector.load %arg3[%c2_138, %c0_139, %c0_140] : memref<6x32x288xbf16, #tpu.memory_space<vmem>>, vector<1x32x288xbf16>
    %185 = vector.shape_cast %184 : vector<1x32x288xbf16> to vector<32x288xbf16>
    %c17_i32_141 = arith.constant 17 : i32
    %186 = tpu.dynamic_rotate %183 by %c17_i32_141 dim 1 : vector<32x256xf32>, i32 -> vector<32x256xf32>
    %c0_142 = arith.constant 0 : index
    %c0_143 = arith.constant 0 : index
    %187 = vector.load %arg7[%c0_142, %c0_143] : memref<9x256xf32, #tpu.memory_space<vmem>>, vector<1x256xf32>
    %188 = vector.broadcast %187 : vector<1x256xf32> to vector<32x256xf32>
    %189 = arith.mulf %186, %188 : vector<32x256xf32>
    %190 = arith.truncf %189 : vector<32x256xf32> to vector<32x256xbf16>
    %c0_144 = arith.constant 0 : index
    %c0_145 = arith.constant 0 : index
    %191 = vector.load %arg11[%c0_144, %c0_145] : memref<288x256xbf16, #tpu.memory_space<vmem>>, vector<32x256xbf16>
    tpu.vector_store %arg11[%c0_144, %c0_145], %190 {strides = array<i32>} : memref<288x256xbf16, #tpu.memory_space<vmem>>, vector<32x256xbf16>,
    %c16_i32_146 = arith.constant 16 : i32
    %192 = tpu.dynamic_rotate %183 by %c16_i32_146 dim 1 : vector<32x256xf32>, i32 -> vector<32x256xf32>
    %c1_147 = arith.constant 1 : index
    %c0_148 = arith.constant 0 : index
    %193 = vector.load %arg7[%c1_147, %c0_148] : memref<9x256xf32, #tpu.memory_space<vmem>>, vector<1x256xf32>
    %194 = vector.broadcast %193 : vector<1x256xf32> to vector<32x256xf32>
    %195 = arith.mulf %192, %194 : vector<32x256xf32>
    %196 = arith.truncf %195 : vector<32x256xf32> to vector<32x256xbf16>
    %c32_149 = arith.constant 32 : index
    %c0_150 = arith.constant 0 : index
    %197 = vector.load %arg11[%c32_149, %c0_150] : memref<288x256xbf16, #tpu.memory_space<vmem>>, vector<32x256xbf16>
    tpu.vector_store %arg11[%c32_149, %c0_150], %196 {strides = array<i32>} : memref<288x256xbf16, #tpu.memory_space<vmem>>, vector<32x256xbf16>,
    %c15_i32_151 = arith.constant 15 : i32
    %198 = tpu.dynamic_rotate %183 by %c15_i32_151 dim 1 : vector<32x256xf32>, i32 -> vector<32x256xf32>
    %c2_152 = arith.constant 2 : index
    %c0_153 = arith.constant 0 : index
    %199 = vector.load %arg7[%c2_152, %c0_153] : memref<9x256xf32, #tpu.memory_space<vmem>>, vector<1x256xf32>
    %200 = vector.broadcast %199 : vector<1x256xf32> to vector<32x256xf32>
    %201 = arith.mulf %198, %200 : vector<32x256xf32>
    %202 = arith.truncf %201 : vector<32x256xf32> to vector<32x256xbf16>
    %c64_154 = arith.constant 64 : index
    %c0_155 = arith.constant 0 : index
    %203 = vector.load %arg11[%c64_154, %c0_155] : memref<288x256xbf16, #tpu.memory_space<vmem>>, vector<32x256xbf16>
    tpu.vector_store %arg11[%c64_154, %c0_155], %202 {strides = array<i32>} : memref<288x256xbf16, #tpu.memory_space<vmem>>, vector<32x256xbf16>,
    %c1_i32_156 = arith.constant 1 : i32
    %204 = tpu.dynamic_rotate %183 by %c1_i32_156 dim 1 : vector<32x256xf32>, i32 -> vector<32x256xf32>
    %c3_157 = arith.constant 3 : index
    %c0_158 = arith.constant 0 : index
    %205 = vector.load %arg7[%c3_157, %c0_158] : memref<9x256xf32, #tpu.memory_space<vmem>>, vector<1x256xf32>
    %206 = vector.broadcast %205 : vector<1x256xf32> to vector<32x256xf32>
    %207 = arith.mulf %204, %206 : vector<32x256xf32>
    %208 = arith.truncf %207 : vector<32x256xf32> to vector<32x256xbf16>
    %c96_159 = arith.constant 96 : index
    %c0_160 = arith.constant 0 : index
    %209 = vector.load %arg11[%c96_159, %c0_160] : memref<288x256xbf16, #tpu.memory_space<vmem>>, vector<32x256xbf16>
    tpu.vector_store %arg11[%c96_159, %c0_160], %208 {strides = array<i32>} : memref<288x256xbf16, #tpu.memory_space<vmem>>, vector<32x256xbf16>,
    %210 = arith.truncf %183 : vector<32x256xf32> to vector<32x256xbf16>
    %c128_161 = arith.constant 128 : index
    %c0_162 = arith.constant 0 : index
    %211 = vector.load %arg11[%c128_161, %c0_162] : memref<288x256xbf16, #tpu.memory_space<vmem>>, vector<32x256xbf16>
    tpu.vector_store %arg11[%c128_161, %c0_162], %210 {strides = array<i32>} : memref<288x256xbf16, #tpu.memory_space<vmem>>, vector<32x256xbf16>,
    %c255_i32_163 = arith.constant 255 : i32
    %212 = tpu.dynamic_rotate %183 by %c255_i32_163 dim 1 : vector<32x256xf32>, i32 -> vector<32x256xf32>
    %c5_164 = arith.constant 5 : index
    %c0_165 = arith.constant 0 : index
    %213 = vector.load %arg7[%c5_164, %c0_165] : memref<9x256xf32, #tpu.memory_space<vmem>>, vector<1x256xf32>
    %214 = vector.broadcast %213 : vector<1x256xf32> to vector<32x256xf32>
    %215 = arith.mulf %212, %214 : vector<32x256xf32>
    %216 = arith.truncf %215 : vector<32x256xf32> to vector<32x256xbf16>
    %c160_166 = arith.constant 160 : index
    %c0_167 = arith.constant 0 : index
    %217 = vector.load %arg11[%c160_166, %c0_167] : memref<288x256xbf16, #tpu.memory_space<vmem>>, vector<32x256xbf16>
    tpu.vector_store %arg11[%c160_166, %c0_167], %216 {strides = array<i32>} : memref<288x256xbf16, #tpu.memory_space<vmem>>, vector<32x256xbf16>,
    %c241_i32_168 = arith.constant 241 : i32
    %218 = tpu.dynamic_rotate %183 by %c241_i32_168 dim 1 : vector<32x256xf32>, i32 -> vector<32x256xf32>
    %c6_169 = arith.constant 6 : index
    %c0_170 = arith.constant 0 : index
    %219 = vector.load %arg7[%c6_169, %c0_170] : memref<9x256xf32, #tpu.memory_space<vmem>>, vector<1x256xf32>
    %220 = vector.broadcast %219 : vector<1x256xf32> to vector<32x256xf32>
    %221 = arith.mulf %218, %220 : vector<32x256xf32>
    %222 = arith.truncf %221 : vector<32x256xf32> to vector<32x256xbf16>
    %c192_171 = arith.constant 192 : index
    %c0_172 = arith.constant 0 : index
    %223 = vector.load %arg11[%c192_171, %c0_172] : memref<288x256xbf16, #tpu.memory_space<vmem>>, vector<32x256xbf16>
    tpu.vector_store %arg11[%c192_171, %c0_172], %222 {strides = array<i32>} : memref<288x256xbf16, #tpu.memory_space<vmem>>, vector<32x256xbf16>,
    %c240_i32_173 = arith.constant 240 : i32
    %224 = tpu.dynamic_rotate %183 by %c240_i32_173 dim 1 : vector<32x256xf32>, i32 -> vector<32x256xf32>
    %c7_174 = arith.constant 7 : index
    %c0_175 = arith.constant 0 : index
    %225 = vector.load %arg7[%c7_174, %c0_175] : memref<9x256xf32, #tpu.memory_space<vmem>>, vector<1x256xf32>
    %226 = vector.broadcast %225 : vector<1x256xf32> to vector<32x256xf32>
    %227 = arith.mulf %224, %226 : vector<32x256xf32>
    %228 = arith.truncf %227 : vector<32x256xf32> to vector<32x256xbf16>
    %c224_176 = arith.constant 224 : index
    %c0_177 = arith.constant 0 : index
    %229 = vector.load %arg11[%c224_176, %c0_177] : memref<288x256xbf16, #tpu.memory_space<vmem>>, vector<32x256xbf16>
    tpu.vector_store %arg11[%c224_176, %c0_177], %228 {strides = array<i32>} : memref<288x256xbf16, #tpu.memory_space<vmem>>, vector<32x256xbf16>,
    %c239_i32_178 = arith.constant 239 : i32
    %230 = tpu.dynamic_rotate %183 by %c239_i32_178 dim 1 : vector<32x256xf32>, i32 -> vector<32x256xf32>
    %c8_179 = arith.constant 8 : index
    %c0_180 = arith.constant 0 : index
    %231 = vector.load %arg7[%c8_179, %c0_180] : memref<9x256xf32, #tpu.memory_space<vmem>>, vector<1x256xf32>
    %232 = vector.broadcast %231 : vector<1x256xf32> to vector<32x256xf32>
    %233 = arith.mulf %230, %232 : vector<32x256xf32>
    %234 = arith.truncf %233 : vector<32x256xf32> to vector<32x256xbf16>
    %c256_181 = arith.constant 256 : index
    %c0_182 = arith.constant 0 : index
    %235 = vector.load %arg11[%c256_181, %c0_182] : memref<288x256xbf16, #tpu.memory_space<vmem>>, vector<32x256xbf16>
    tpu.vector_store %arg11[%c256_181, %c0_182], %234 {strides = array<i32>} : memref<288x256xbf16, #tpu.memory_space<vmem>>, vector<32x256xbf16>,
    %c0_183 = arith.constant 0 : index
    %c0_184 = arith.constant 0 : index
    %236 = vector.load %arg11[%c0_183, %c0_184] : memref<288x256xbf16, #tpu.memory_space<vmem>>, vector<288x256xbf16>
    %cst_185 = arith.constant dense<0.000000e+00> : vector<32x256xf32>
    %237 = tpu.matmul %185, %236, %cst_185 {dimension_numbers = #tpu.dot_dimension_numbers<[1], [0], [0], [1], [0, 0, 1, 1], [], []>} : vector<32x288xbf16>, vector<288x256xbf16>, vector<32x256xf32> -> vector<32x256xf32>
    %c0_186 = arith.constant 0 : index
    %c3_187 = arith.constant 3 : index
    %238 = vector.load %arg5[%c0_186, %c3_187] : memref<32x7xf32, #tpu.memory_space<vmem>>, vector<32x1xf32>
    %239 = vector.broadcast %238 : vector<32x1xf32> to vector<32x256xf32>
    %240 = arith.addf %237, %239 : vector<32x256xf32>
    %cst_188 = arith.constant 0.000000e+00 : f32
    %241 = vector.broadcast %cst_188 : f32 to vector<32x256xf32>
    %242 = arith.maximumf %240, %241 : vector<32x256xf32>
    %c0_189 = arith.constant 0 : index
    %c0_190 = arith.constant 0 : index
    %243 = vector.load %arg10[%c0_189, %c0_190] : memref<32x256xf32, #tpu.memory_space<vmem>>, vector<32x256xf32>
    %244 = arith.addf %242, %243 : vector<32x256xf32>
    %c0_191 = arith.constant 0 : index
    %c0_192 = arith.constant 0 : index
    %245 = vector.load %arg9[%c0_191, %c0_192] : memref<32x256xf32, #tpu.memory_space<vmem>>, vector<32x256xf32>
    tpu.vector_store %arg9[%c0_191, %c0_192], %244 {strides = array<i32>} : memref<32x256xf32, #tpu.memory_space<vmem>>, vector<32x256xf32>,
    %c0_193 = arith.constant 0 : index
    %c0_194 = arith.constant 0 : index
    %246 = vector.load %arg9[%c0_193, %c0_194] : memref<32x256xf32, #tpu.memory_space<vmem>>, vector<32x256xf32>
    %c3_195 = arith.constant 3 : index
    %c0_196 = arith.constant 0 : index
    %c0_197 = arith.constant 0 : index
    %247 = vector.load %arg3[%c3_195, %c0_196, %c0_197] : memref<6x32x288xbf16, #tpu.memory_space<vmem>>, vector<1x32x288xbf16>
    %248 = vector.shape_cast %247 : vector<1x32x288xbf16> to vector<32x288xbf16>
    %c17_i32_198 = arith.constant 17 : i32
    %249 = tpu.dynamic_rotate %246 by %c17_i32_198 dim 1 : vector<32x256xf32>, i32 -> vector<32x256xf32>
    %c0_199 = arith.constant 0 : index
    %c0_200 = arith.constant 0 : index
    %250 = vector.load %arg7[%c0_199, %c0_200] : memref<9x256xf32, #tpu.memory_space<vmem>>, vector<1x256xf32>
    %251 = vector.broadcast %250 : vector<1x256xf32> to vector<32x256xf32>
    %252 = arith.mulf %249, %251 : vector<32x256xf32>
    %253 = arith.truncf %252 : vector<32x256xf32> to vector<32x256xbf16>
    %c0_201 = arith.constant 0 : index
    %c0_202 = arith.constant 0 : index
    %254 = vector.load %arg11[%c0_201, %c0_202] : memref<288x256xbf16, #tpu.memory_space<vmem>>, vector<32x256xbf16>
    tpu.vector_store %arg11[%c0_201, %c0_202], %253 {strides = array<i32>} : memref<288x256xbf16, #tpu.memory_space<vmem>>, vector<32x256xbf16>,
    %c16_i32_203 = arith.constant 16 : i32
    %255 = tpu.dynamic_rotate %246 by %c16_i32_203 dim 1 : vector<32x256xf32>, i32 -> vector<32x256xf32>
    %c1_204 = arith.constant 1 : index
    %c0_205 = arith.constant 0 : index
    %256 = vector.load %arg7[%c1_204, %c0_205] : memref<9x256xf32, #tpu.memory_space<vmem>>, vector<1x256xf32>
    %257 = vector.broadcast %256 : vector<1x256xf32> to vector<32x256xf32>
    %258 = arith.mulf %255, %257 : vector<32x256xf32>
    %259 = arith.truncf %258 : vector<32x256xf32> to vector<32x256xbf16>
    %c32_206 = arith.constant 32 : index
    %c0_207 = arith.constant 0 : index
    %260 = vector.load %arg11[%c32_206, %c0_207] : memref<288x256xbf16, #tpu.memory_space<vmem>>, vector<32x256xbf16>
    tpu.vector_store %arg11[%c32_206, %c0_207], %259 {strides = array<i32>} : memref<288x256xbf16, #tpu.memory_space<vmem>>, vector<32x256xbf16>,
    %c15_i32_208 = arith.constant 15 : i32
    %261 = tpu.dynamic_rotate %246 by %c15_i32_208 dim 1 : vector<32x256xf32>, i32 -> vector<32x256xf32>
    %c2_209 = arith.constant 2 : index
    %c0_210 = arith.constant 0 : index
    %262 = vector.load %arg7[%c2_209, %c0_210] : memref<9x256xf32, #tpu.memory_space<vmem>>, vector<1x256xf32>
    %263 = vector.broadcast %262 : vector<1x256xf32> to vector<32x256xf32>
    %264 = arith.mulf %261, %263 : vector<32x256xf32>
    %265 = arith.truncf %264 : vector<32x256xf32> to vector<32x256xbf16>
    %c64_211 = arith.constant 64 : index
    %c0_212 = arith.constant 0 : index
    %266 = vector.load %arg11[%c64_211, %c0_212] : memref<288x256xbf16, #tpu.memory_space<vmem>>, vector<32x256xbf16>
    tpu.vector_store %arg11[%c64_211, %c0_212], %265 {strides = array<i32>} : memref<288x256xbf16, #tpu.memory_space<vmem>>, vector<32x256xbf16>,
    %c1_i32_213 = arith.constant 1 : i32
    %267 = tpu.dynamic_rotate %246 by %c1_i32_213 dim 1 : vector<32x256xf32>, i32 -> vector<32x256xf32>
    %c3_214 = arith.constant 3 : index
    %c0_215 = arith.constant 0 : index
    %268 = vector.load %arg7[%c3_214, %c0_215] : memref<9x256xf32, #tpu.memory_space<vmem>>, vector<1x256xf32>
    %269 = vector.broadcast %268 : vector<1x256xf32> to vector<32x256xf32>
    %270 = arith.mulf %267, %269 : vector<32x256xf32>
    %271 = arith.truncf %270 : vector<32x256xf32> to vector<32x256xbf16>
    %c96_216 = arith.constant 96 : index
    %c0_217 = arith.constant 0 : index
    %272 = vector.load %arg11[%c96_216, %c0_217] : memref<288x256xbf16, #tpu.memory_space<vmem>>, vector<32x256xbf16>
    tpu.vector_store %arg11[%c96_216, %c0_217], %271 {strides = array<i32>} : memref<288x256xbf16, #tpu.memory_space<vmem>>, vector<32x256xbf16>,
    %273 = arith.truncf %246 : vector<32x256xf32> to vector<32x256xbf16>
    %c128_218 = arith.constant 128 : index
    %c0_219 = arith.constant 0 : index
    %274 = vector.load %arg11[%c128_218, %c0_219] : memref<288x256xbf16, #tpu.memory_space<vmem>>, vector<32x256xbf16>
    tpu.vector_store %arg11[%c128_218, %c0_219], %273 {strides = array<i32>} : memref<288x256xbf16, #tpu.memory_space<vmem>>, vector<32x256xbf16>,
    %c255_i32_220 = arith.constant 255 : i32
    %275 = tpu.dynamic_rotate %246 by %c255_i32_220 dim 1 : vector<32x256xf32>, i32 -> vector<32x256xf32>
    %c5_221 = arith.constant 5 : index
    %c0_222 = arith.constant 0 : index
    %276 = vector.load %arg7[%c5_221, %c0_222] : memref<9x256xf32, #tpu.memory_space<vmem>>, vector<1x256xf32>
    %277 = vector.broadcast %276 : vector<1x256xf32> to vector<32x256xf32>
    %278 = arith.mulf %275, %277 : vector<32x256xf32>
    %279 = arith.truncf %278 : vector<32x256xf32> to vector<32x256xbf16>
    %c160_223 = arith.constant 160 : index
    %c0_224 = arith.constant 0 : index
    %280 = vector.load %arg11[%c160_223, %c0_224] : memref<288x256xbf16, #tpu.memory_space<vmem>>, vector<32x256xbf16>
    tpu.vector_store %arg11[%c160_223, %c0_224], %279 {strides = array<i32>} : memref<288x256xbf16, #tpu.memory_space<vmem>>, vector<32x256xbf16>,
    %c241_i32_225 = arith.constant 241 : i32
    %281 = tpu.dynamic_rotate %246 by %c241_i32_225 dim 1 : vector<32x256xf32>, i32 -> vector<32x256xf32>
    %c6_226 = arith.constant 6 : index
    %c0_227 = arith.constant 0 : index
    %282 = vector.load %arg7[%c6_226, %c0_227] : memref<9x256xf32, #tpu.memory_space<vmem>>, vector<1x256xf32>
    %283 = vector.broadcast %282 : vector<1x256xf32> to vector<32x256xf32>
    %284 = arith.mulf %281, %283 : vector<32x256xf32>
    %285 = arith.truncf %284 : vector<32x256xf32> to vector<32x256xbf16>
    %c192_228 = arith.constant 192 : index
    %c0_229 = arith.constant 0 : index
    %286 = vector.load %arg11[%c192_228, %c0_229] : memref<288x256xbf16, #tpu.memory_space<vmem>>, vector<32x256xbf16>
    tpu.vector_store %arg11[%c192_228, %c0_229], %285 {strides = array<i32>} : memref<288x256xbf16, #tpu.memory_space<vmem>>, vector<32x256xbf16>,
    %c240_i32_230 = arith.constant 240 : i32
    %287 = tpu.dynamic_rotate %246 by %c240_i32_230 dim 1 : vector<32x256xf32>, i32 -> vector<32x256xf32>
    %c7_231 = arith.constant 7 : index
    %c0_232 = arith.constant 0 : index
    %288 = vector.load %arg7[%c7_231, %c0_232] : memref<9x256xf32, #tpu.memory_space<vmem>>, vector<1x256xf32>
    %289 = vector.broadcast %288 : vector<1x256xf32> to vector<32x256xf32>
    %290 = arith.mulf %287, %289 : vector<32x256xf32>
    %291 = arith.truncf %290 : vector<32x256xf32> to vector<32x256xbf16>
    %c224_233 = arith.constant 224 : index
    %c0_234 = arith.constant 0 : index
    %292 = vector.load %arg11[%c224_233, %c0_234] : memref<288x256xbf16, #tpu.memory_space<vmem>>, vector<32x256xbf16>
    tpu.vector_store %arg11[%c224_233, %c0_234], %291 {strides = array<i32>} : memref<288x256xbf16, #tpu.memory_space<vmem>>, vector<32x256xbf16>,
    %c239_i32_235 = arith.constant 239 : i32
    %293 = tpu.dynamic_rotate %246 by %c239_i32_235 dim 1 : vector<32x256xf32>, i32 -> vector<32x256xf32>
    %c8_236 = arith.constant 8 : index
    %c0_237 = arith.constant 0 : index
    %294 = vector.load %arg7[%c8_236, %c0_237] : memref<9x256xf32, #tpu.memory_space<vmem>>, vector<1x256xf32>
    %295 = vector.broadcast %294 : vector<1x256xf32> to vector<32x256xf32>
    %296 = arith.mulf %293, %295 : vector<32x256xf32>
    %297 = arith.truncf %296 : vector<32x256xf32> to vector<32x256xbf16>
    %c256_238 = arith.constant 256 : index
    %c0_239 = arith.constant 0 : index
    %298 = vector.load %arg11[%c256_238, %c0_239] : memref<288x256xbf16, #tpu.memory_space<vmem>>, vector<32x256xbf16>
    tpu.vector_store %arg11[%c256_238, %c0_239], %297 {strides = array<i32>} : memref<288x256xbf16, #tpu.memory_space<vmem>>, vector<32x256xbf16>,
    %c0_240 = arith.constant 0 : index
    %c0_241 = arith.constant 0 : index
    %299 = vector.load %arg11[%c0_240, %c0_241] : memref<288x256xbf16, #tpu.memory_space<vmem>>, vector<288x256xbf16>
    %cst_242 = arith.constant dense<0.000000e+00> : vector<32x256xf32>
    %300 = tpu.matmul %248, %299, %cst_242 {dimension_numbers = #tpu.dot_dimension_numbers<[1], [0], [0], [1], [0, 0, 1, 1], [], []>} : vector<32x288xbf16>, vector<288x256xbf16>, vector<32x256xf32> -> vector<32x256xf32>
    %c0_243 = arith.constant 0 : index
    %c4 = arith.constant 4 : index
    %301 = vector.load %arg5[%c0_243, %c4] : memref<32x7xf32, #tpu.memory_space<vmem>>, vector<32x1xf32>
    %302 = vector.broadcast %301 : vector<32x1xf32> to vector<32x256xf32>
    %303 = arith.addf %300, %302 : vector<32x256xf32>
    %cst_244 = arith.constant 0.000000e+00 : f32
    %304 = vector.broadcast %cst_244 : f32 to vector<32x256xf32>
    %305 = arith.maximumf %303, %304 : vector<32x256xf32>
    %c0_245 = arith.constant 0 : index
    %c0_246 = arith.constant 0 : index
    %306 = vector.load %arg10[%c0_245, %c0_246] : memref<32x256xf32, #tpu.memory_space<vmem>>, vector<32x256xf32>
    tpu.vector_store %arg10[%c0_245, %c0_246], %305 {strides = array<i32>} : memref<32x256xf32, #tpu.memory_space<vmem>>, vector<32x256xf32>,
    %c0_247 = arith.constant 0 : index
    %c0_248 = arith.constant 0 : index
    %307 = vector.load %arg10[%c0_247, %c0_248] : memref<32x256xf32, #tpu.memory_space<vmem>>, vector<32x256xf32>
    %c4_249 = arith.constant 4 : index
    %c0_250 = arith.constant 0 : index
    %c0_251 = arith.constant 0 : index
    %308 = vector.load %arg3[%c4_249, %c0_250, %c0_251] : memref<6x32x288xbf16, #tpu.memory_space<vmem>>, vector<1x32x288xbf16>
    %309 = vector.shape_cast %308 : vector<1x32x288xbf16> to vector<32x288xbf16>
    %c17_i32_252 = arith.constant 17 : i32
    %310 = tpu.dynamic_rotate %307 by %c17_i32_252 dim 1 : vector<32x256xf32>, i32 -> vector<32x256xf32>
    %c0_253 = arith.constant 0 : index
    %c0_254 = arith.constant 0 : index
    %311 = vector.load %arg7[%c0_253, %c0_254] : memref<9x256xf32, #tpu.memory_space<vmem>>, vector<1x256xf32>
    %312 = vector.broadcast %311 : vector<1x256xf32> to vector<32x256xf32>
    %313 = arith.mulf %310, %312 : vector<32x256xf32>
    %314 = arith.truncf %313 : vector<32x256xf32> to vector<32x256xbf16>
    %c0_255 = arith.constant 0 : index
    %c0_256 = arith.constant 0 : index
    %315 = vector.load %arg11[%c0_255, %c0_256] : memref<288x256xbf16, #tpu.memory_space<vmem>>, vector<32x256xbf16>
    tpu.vector_store %arg11[%c0_255, %c0_256], %314 {strides = array<i32>} : memref<288x256xbf16, #tpu.memory_space<vmem>>, vector<32x256xbf16>,
    %c16_i32_257 = arith.constant 16 : i32
    %316 = tpu.dynamic_rotate %307 by %c16_i32_257 dim 1 : vector<32x256xf32>, i32 -> vector<32x256xf32>
    %c1_258 = arith.constant 1 : index
    %c0_259 = arith.constant 0 : index
    %317 = vector.load %arg7[%c1_258, %c0_259] : memref<9x256xf32, #tpu.memory_space<vmem>>, vector<1x256xf32>
    %318 = vector.broadcast %317 : vector<1x256xf32> to vector<32x256xf32>
    %319 = arith.mulf %316, %318 : vector<32x256xf32>
    %320 = arith.truncf %319 : vector<32x256xf32> to vector<32x256xbf16>
    %c32_260 = arith.constant 32 : index
    %c0_261 = arith.constant 0 : index
    %321 = vector.load %arg11[%c32_260, %c0_261] : memref<288x256xbf16, #tpu.memory_space<vmem>>, vector<32x256xbf16>
    tpu.vector_store %arg11[%c32_260, %c0_261], %320 {strides = array<i32>} : memref<288x256xbf16, #tpu.memory_space<vmem>>, vector<32x256xbf16>,
    %c15_i32_262 = arith.constant 15 : i32
    %322 = tpu.dynamic_rotate %307 by %c15_i32_262 dim 1 : vector<32x256xf32>, i32 -> vector<32x256xf32>
    %c2_263 = arith.constant 2 : index
    %c0_264 = arith.constant 0 : index
    %323 = vector.load %arg7[%c2_263, %c0_264] : memref<9x256xf32, #tpu.memory_space<vmem>>, vector<1x256xf32>
    %324 = vector.broadcast %323 : vector<1x256xf32> to vector<32x256xf32>
    %325 = arith.mulf %322, %324 : vector<32x256xf32>
    %326 = arith.truncf %325 : vector<32x256xf32> to vector<32x256xbf16>
    %c64_265 = arith.constant 64 : index
    %c0_266 = arith.constant 0 : index
    %327 = vector.load %arg11[%c64_265, %c0_266] : memref<288x256xbf16, #tpu.memory_space<vmem>>, vector<32x256xbf16>
    tpu.vector_store %arg11[%c64_265, %c0_266], %326 {strides = array<i32>} : memref<288x256xbf16, #tpu.memory_space<vmem>>, vector<32x256xbf16>,
    %c1_i32_267 = arith.constant 1 : i32
    %328 = tpu.dynamic_rotate %307 by %c1_i32_267 dim 1 : vector<32x256xf32>, i32 -> vector<32x256xf32>
    %c3_268 = arith.constant 3 : index
    %c0_269 = arith.constant 0 : index
    %329 = vector.load %arg7[%c3_268, %c0_269] : memref<9x256xf32, #tpu.memory_space<vmem>>, vector<1x256xf32>
    %330 = vector.broadcast %329 : vector<1x256xf32> to vector<32x256xf32>
    %331 = arith.mulf %328, %330 : vector<32x256xf32>
    %332 = arith.truncf %331 : vector<32x256xf32> to vector<32x256xbf16>
    %c96_270 = arith.constant 96 : index
    %c0_271 = arith.constant 0 : index
    %333 = vector.load %arg11[%c96_270, %c0_271] : memref<288x256xbf16, #tpu.memory_space<vmem>>, vector<32x256xbf16>
    tpu.vector_store %arg11[%c96_270, %c0_271], %332 {strides = array<i32>} : memref<288x256xbf16, #tpu.memory_space<vmem>>, vector<32x256xbf16>,
    %334 = arith.truncf %307 : vector<32x256xf32> to vector<32x256xbf16>
    %c128_272 = arith.constant 128 : index
    %c0_273 = arith.constant 0 : index
    %335 = vector.load %arg11[%c128_272, %c0_273] : memref<288x256xbf16, #tpu.memory_space<vmem>>, vector<32x256xbf16>
    tpu.vector_store %arg11[%c128_272, %c0_273], %334 {strides = array<i32>} : memref<288x256xbf16, #tpu.memory_space<vmem>>, vector<32x256xbf16>,
    %c255_i32_274 = arith.constant 255 : i32
    %336 = tpu.dynamic_rotate %307 by %c255_i32_274 dim 1 : vector<32x256xf32>, i32 -> vector<32x256xf32>
    %c5_275 = arith.constant 5 : index
    %c0_276 = arith.constant 0 : index
    %337 = vector.load %arg7[%c5_275, %c0_276] : memref<9x256xf32, #tpu.memory_space<vmem>>, vector<1x256xf32>
    %338 = vector.broadcast %337 : vector<1x256xf32> to vector<32x256xf32>
    %339 = arith.mulf %336, %338 : vector<32x256xf32>
    %340 = arith.truncf %339 : vector<32x256xf32> to vector<32x256xbf16>
    %c160_277 = arith.constant 160 : index
    %c0_278 = arith.constant 0 : index
    %341 = vector.load %arg11[%c160_277, %c0_278] : memref<288x256xbf16, #tpu.memory_space<vmem>>, vector<32x256xbf16>
    tpu.vector_store %arg11[%c160_277, %c0_278], %340 {strides = array<i32>} : memref<288x256xbf16, #tpu.memory_space<vmem>>, vector<32x256xbf16>,
    %c241_i32_279 = arith.constant 241 : i32
    %342 = tpu.dynamic_rotate %307 by %c241_i32_279 dim 1 : vector<32x256xf32>, i32 -> vector<32x256xf32>
    %c6_280 = arith.constant 6 : index
    %c0_281 = arith.constant 0 : index
    %343 = vector.load %arg7[%c6_280, %c0_281] : memref<9x256xf32, #tpu.memory_space<vmem>>, vector<1x256xf32>
    %344 = vector.broadcast %343 : vector<1x256xf32> to vector<32x256xf32>
    %345 = arith.mulf %342, %344 : vector<32x256xf32>
    %346 = arith.truncf %345 : vector<32x256xf32> to vector<32x256xbf16>
    %c192_282 = arith.constant 192 : index
    %c0_283 = arith.constant 0 : index
    %347 = vector.load %arg11[%c192_282, %c0_283] : memref<288x256xbf16, #tpu.memory_space<vmem>>, vector<32x256xbf16>
    tpu.vector_store %arg11[%c192_282, %c0_283], %346 {strides = array<i32>} : memref<288x256xbf16, #tpu.memory_space<vmem>>, vector<32x256xbf16>,
    %c240_i32_284 = arith.constant 240 : i32
    %348 = tpu.dynamic_rotate %307 by %c240_i32_284 dim 1 : vector<32x256xf32>, i32 -> vector<32x256xf32>
    %c7_285 = arith.constant 7 : index
    %c0_286 = arith.constant 0 : index
    %349 = vector.load %arg7[%c7_285, %c0_286] : memref<9x256xf32, #tpu.memory_space<vmem>>, vector<1x256xf32>
    %350 = vector.broadcast %349 : vector<1x256xf32> to vector<32x256xf32>
    %351 = arith.mulf %348, %350 : vector<32x256xf32>
    %352 = arith.truncf %351 : vector<32x256xf32> to vector<32x256xbf16>
    %c224_287 = arith.constant 224 : index
    %c0_288 = arith.constant 0 : index
    %353 = vector.load %arg11[%c224_287, %c0_288] : memref<288x256xbf16, #tpu.memory_space<vmem>>, vector<32x256xbf16>
    tpu.vector_store %arg11[%c224_287, %c0_288], %352 {strides = array<i32>} : memref<288x256xbf16, #tpu.memory_space<vmem>>, vector<32x256xbf16>,
    %c239_i32_289 = arith.constant 239 : i32
    %354 = tpu.dynamic_rotate %307 by %c239_i32_289 dim 1 : vector<32x256xf32>, i32 -> vector<32x256xf32>
    %c8_290 = arith.constant 8 : index
    %c0_291 = arith.constant 0 : index
    %355 = vector.load %arg7[%c8_290, %c0_291] : memref<9x256xf32, #tpu.memory_space<vmem>>, vector<1x256xf32>
    %356 = vector.broadcast %355 : vector<1x256xf32> to vector<32x256xf32>
    %357 = arith.mulf %354, %356 : vector<32x256xf32>
    %358 = arith.truncf %357 : vector<32x256xf32> to vector<32x256xbf16>
    %c256_292 = arith.constant 256 : index
    %c0_293 = arith.constant 0 : index
    %359 = vector.load %arg11[%c256_292, %c0_293] : memref<288x256xbf16, #tpu.memory_space<vmem>>, vector<32x256xbf16>
    tpu.vector_store %arg11[%c256_292, %c0_293], %358 {strides = array<i32>} : memref<288x256xbf16, #tpu.memory_space<vmem>>, vector<32x256xbf16>,
    %c0_294 = arith.constant 0 : index
    %c0_295 = arith.constant 0 : index
    %360 = vector.load %arg11[%c0_294, %c0_295] : memref<288x256xbf16, #tpu.memory_space<vmem>>, vector<288x256xbf16>
    %cst_296 = arith.constant dense<0.000000e+00> : vector<32x256xf32>
    %361 = tpu.matmul %309, %360, %cst_296 {dimension_numbers = #tpu.dot_dimension_numbers<[1], [0], [0], [1], [0, 0, 1, 1], [], []>} : vector<32x288xbf16>, vector<288x256xbf16>, vector<32x256xf32> -> vector<32x256xf32>
    %c0_297 = arith.constant 0 : index
    %c5_298 = arith.constant 5 : index
    %362 = vector.load %arg5[%c0_297, %c5_298] : memref<32x7xf32, #tpu.memory_space<vmem>>, vector<32x1xf32>
    %363 = vector.broadcast %362 : vector<32x1xf32> to vector<32x256xf32>
    %364 = arith.addf %361, %363 : vector<32x256xf32>
    %cst_299 = arith.constant 0.000000e+00 : f32
    %365 = vector.broadcast %cst_299 : f32 to vector<32x256xf32>
    %366 = arith.maximumf %364, %365 : vector<32x256xf32>
    %c0_300 = arith.constant 0 : index
    %c0_301 = arith.constant 0 : index
    %367 = vector.load %arg9[%c0_300, %c0_301] : memref<32x256xf32, #tpu.memory_space<vmem>>, vector<32x256xf32>
    tpu.vector_store %arg9[%c0_300, %c0_301], %366 {strides = array<i32>} : memref<32x256xf32, #tpu.memory_space<vmem>>, vector<32x256xf32>,
    %c0_302 = arith.constant 0 : index
    %c0_303 = arith.constant 0 : index
    %368 = vector.load %arg9[%c0_302, %c0_303] : memref<32x256xf32, #tpu.memory_space<vmem>>, vector<32x256xf32>
    %c5_304 = arith.constant 5 : index
    %c0_305 = arith.constant 0 : index
    %c0_306 = arith.constant 0 : index
    %369 = vector.load %arg3[%c5_304, %c0_305, %c0_306] : memref<6x32x288xbf16, #tpu.memory_space<vmem>>, vector<1x32x288xbf16>
    %370 = vector.shape_cast %369 : vector<1x32x288xbf16> to vector<32x288xbf16>
    %c17_i32_307 = arith.constant 17 : i32
    %371 = tpu.dynamic_rotate %368 by %c17_i32_307 dim 1 : vector<32x256xf32>, i32 -> vector<32x256xf32>
    %c0_308 = arith.constant 0 : index
    %c0_309 = arith.constant 0 : index
    %372 = vector.load %arg7[%c0_308, %c0_309] : memref<9x256xf32, #tpu.memory_space<vmem>>, vector<1x256xf32>
    %373 = vector.broadcast %372 : vector<1x256xf32> to vector<32x256xf32>
    %374 = arith.mulf %371, %373 : vector<32x256xf32>
    %375 = arith.truncf %374 : vector<32x256xf32> to vector<32x256xbf16>
    %c0_310 = arith.constant 0 : index
    %c0_311 = arith.constant 0 : index
    %376 = vector.load %arg11[%c0_310, %c0_311] : memref<288x256xbf16, #tpu.memory_space<vmem>>, vector<32x256xbf16>
    tpu.vector_store %arg11[%c0_310, %c0_311], %375 {strides = array<i32>} : memref<288x256xbf16, #tpu.memory_space<vmem>>, vector<32x256xbf16>,
    %c16_i32_312 = arith.constant 16 : i32
    %377 = tpu.dynamic_rotate %368 by %c16_i32_312 dim 1 : vector<32x256xf32>, i32 -> vector<32x256xf32>
    %c1_313 = arith.constant 1 : index
    %c0_314 = arith.constant 0 : index
    %378 = vector.load %arg7[%c1_313, %c0_314] : memref<9x256xf32, #tpu.memory_space<vmem>>, vector<1x256xf32>
    %379 = vector.broadcast %378 : vector<1x256xf32> to vector<32x256xf32>
    %380 = arith.mulf %377, %379 : vector<32x256xf32>
    %381 = arith.truncf %380 : vector<32x256xf32> to vector<32x256xbf16>
    %c32_315 = arith.constant 32 : index
    %c0_316 = arith.constant 0 : index
    %382 = vector.load %arg11[%c32_315, %c0_316] : memref<288x256xbf16, #tpu.memory_space<vmem>>, vector<32x256xbf16>
    tpu.vector_store %arg11[%c32_315, %c0_316], %381 {strides = array<i32>} : memref<288x256xbf16, #tpu.memory_space<vmem>>, vector<32x256xbf16>,
    %c15_i32_317 = arith.constant 15 : i32
    %383 = tpu.dynamic_rotate %368 by %c15_i32_317 dim 1 : vector<32x256xf32>, i32 -> vector<32x256xf32>
    %c2_318 = arith.constant 2 : index
    %c0_319 = arith.constant 0 : index
    %384 = vector.load %arg7[%c2_318, %c0_319] : memref<9x256xf32, #tpu.memory_space<vmem>>, vector<1x256xf32>
    %385 = vector.broadcast %384 : vector<1x256xf32> to vector<32x256xf32>
    %386 = arith.mulf %383, %385 : vector<32x256xf32>
    %387 = arith.truncf %386 : vector<32x256xf32> to vector<32x256xbf16>
    %c64_320 = arith.constant 64 : index
    %c0_321 = arith.constant 0 : index
    %388 = vector.load %arg11[%c64_320, %c0_321] : memref<288x256xbf16, #tpu.memory_space<vmem>>, vector<32x256xbf16>
    tpu.vector_store %arg11[%c64_320, %c0_321], %387 {strides = array<i32>} : memref<288x256xbf16, #tpu.memory_space<vmem>>, vector<32x256xbf16>,
    %c1_i32_322 = arith.constant 1 : i32
    %389 = tpu.dynamic_rotate %368 by %c1_i32_322 dim 1 : vector<32x256xf32>, i32 -> vector<32x256xf32>
    %c3_323 = arith.constant 3 : index
    %c0_324 = arith.constant 0 : index
    %390 = vector.load %arg7[%c3_323, %c0_324] : memref<9x256xf32, #tpu.memory_space<vmem>>, vector<1x256xf32>
    %391 = vector.broadcast %390 : vector<1x256xf32> to vector<32x256xf32>
    %392 = arith.mulf %389, %391 : vector<32x256xf32>
    %393 = arith.truncf %392 : vector<32x256xf32> to vector<32x256xbf16>
    %c96_325 = arith.constant 96 : index
    %c0_326 = arith.constant 0 : index
    %394 = vector.load %arg11[%c96_325, %c0_326] : memref<288x256xbf16, #tpu.memory_space<vmem>>, vector<32x256xbf16>
    tpu.vector_store %arg11[%c96_325, %c0_326], %393 {strides = array<i32>} : memref<288x256xbf16, #tpu.memory_space<vmem>>, vector<32x256xbf16>,
    %395 = arith.truncf %368 : vector<32x256xf32> to vector<32x256xbf16>
    %c128_327 = arith.constant 128 : index
    %c0_328 = arith.constant 0 : index
    %396 = vector.load %arg11[%c128_327, %c0_328] : memref<288x256xbf16, #tpu.memory_space<vmem>>, vector<32x256xbf16>
    tpu.vector_store %arg11[%c128_327, %c0_328], %395 {strides = array<i32>} : memref<288x256xbf16, #tpu.memory_space<vmem>>, vector<32x256xbf16>,
    %c255_i32_329 = arith.constant 255 : i32
    %397 = tpu.dynamic_rotate %368 by %c255_i32_329 dim 1 : vector<32x256xf32>, i32 -> vector<32x256xf32>
    %c5_330 = arith.constant 5 : index
    %c0_331 = arith.constant 0 : index
    %398 = vector.load %arg7[%c5_330, %c0_331] : memref<9x256xf32, #tpu.memory_space<vmem>>, vector<1x256xf32>
    %399 = vector.broadcast %398 : vector<1x256xf32> to vector<32x256xf32>
    %400 = arith.mulf %397, %399 : vector<32x256xf32>
    %401 = arith.truncf %400 : vector<32x256xf32> to vector<32x256xbf16>
    %c160_332 = arith.constant 160 : index
    %c0_333 = arith.constant 0 : index
    %402 = vector.load %arg11[%c160_332, %c0_333] : memref<288x256xbf16, #tpu.memory_space<vmem>>, vector<32x256xbf16>
    tpu.vector_store %arg11[%c160_332, %c0_333], %401 {strides = array<i32>} : memref<288x256xbf16, #tpu.memory_space<vmem>>, vector<32x256xbf16>,
    %c241_i32_334 = arith.constant 241 : i32
    %403 = tpu.dynamic_rotate %368 by %c241_i32_334 dim 1 : vector<32x256xf32>, i32 -> vector<32x256xf32>
    %c6_335 = arith.constant 6 : index
    %c0_336 = arith.constant 0 : index
    %404 = vector.load %arg7[%c6_335, %c0_336] : memref<9x256xf32, #tpu.memory_space<vmem>>, vector<1x256xf32>
    %405 = vector.broadcast %404 : vector<1x256xf32> to vector<32x256xf32>
    %406 = arith.mulf %403, %405 : vector<32x256xf32>
    %407 = arith.truncf %406 : vector<32x256xf32> to vector<32x256xbf16>
    %c192_337 = arith.constant 192 : index
    %c0_338 = arith.constant 0 : index
    %408 = vector.load %arg11[%c192_337, %c0_338] : memref<288x256xbf16, #tpu.memory_space<vmem>>, vector<32x256xbf16>
    tpu.vector_store %arg11[%c192_337, %c0_338], %407 {strides = array<i32>} : memref<288x256xbf16, #tpu.memory_space<vmem>>, vector<32x256xbf16>,
    %c240_i32_339 = arith.constant 240 : i32
    %409 = tpu.dynamic_rotate %368 by %c240_i32_339 dim 1 : vector<32x256xf32>, i32 -> vector<32x256xf32>
    %c7_340 = arith.constant 7 : index
    %c0_341 = arith.constant 0 : index
    %410 = vector.load %arg7[%c7_340, %c0_341] : memref<9x256xf32, #tpu.memory_space<vmem>>, vector<1x256xf32>
    %411 = vector.broadcast %410 : vector<1x256xf32> to vector<32x256xf32>
    %412 = arith.mulf %409, %411 : vector<32x256xf32>
    %413 = arith.truncf %412 : vector<32x256xf32> to vector<32x256xbf16>
    %c224_342 = arith.constant 224 : index
    %c0_343 = arith.constant 0 : index
    %414 = vector.load %arg11[%c224_342, %c0_343] : memref<288x256xbf16, #tpu.memory_space<vmem>>, vector<32x256xbf16>
    tpu.vector_store %arg11[%c224_342, %c0_343], %413 {strides = array<i32>} : memref<288x256xbf16, #tpu.memory_space<vmem>>, vector<32x256xbf16>,
    %c239_i32_344 = arith.constant 239 : i32
    %415 = tpu.dynamic_rotate %368 by %c239_i32_344 dim 1 : vector<32x256xf32>, i32 -> vector<32x256xf32>
    %c8_345 = arith.constant 8 : index
    %c0_346 = arith.constant 0 : index
    %416 = vector.load %arg7[%c8_345, %c0_346] : memref<9x256xf32, #tpu.memory_space<vmem>>, vector<1x256xf32>
    %417 = vector.broadcast %416 : vector<1x256xf32> to vector<32x256xf32>
    %418 = arith.mulf %415, %417 : vector<32x256xf32>
    %419 = arith.truncf %418 : vector<32x256xf32> to vector<32x256xbf16>
    %c256_347 = arith.constant 256 : index
    %c0_348 = arith.constant 0 : index
    %420 = vector.load %arg11[%c256_347, %c0_348] : memref<288x256xbf16, #tpu.memory_space<vmem>>, vector<32x256xbf16>
    tpu.vector_store %arg11[%c256_347, %c0_348], %419 {strides = array<i32>} : memref<288x256xbf16, #tpu.memory_space<vmem>>, vector<32x256xbf16>,
    %c0_349 = arith.constant 0 : index
    %c0_350 = arith.constant 0 : index
    %421 = vector.load %arg11[%c0_349, %c0_350] : memref<288x256xbf16, #tpu.memory_space<vmem>>, vector<288x256xbf16>
    %cst_351 = arith.constant dense<0.000000e+00> : vector<32x256xf32>
    %422 = tpu.matmul %370, %421, %cst_351 {dimension_numbers = #tpu.dot_dimension_numbers<[1], [0], [0], [1], [0, 0, 1, 1], [], []>} : vector<32x288xbf16>, vector<288x256xbf16>, vector<32x256xf32> -> vector<32x256xf32>
    %c0_352 = arith.constant 0 : index
    %c6_353 = arith.constant 6 : index
    %423 = vector.load %arg5[%c0_352, %c6_353] : memref<32x7xf32, #tpu.memory_space<vmem>>, vector<32x1xf32>
    %424 = vector.broadcast %423 : vector<32x1xf32> to vector<32x256xf32>
    %425 = arith.addf %422, %424 : vector<32x256xf32>
    %cst_354 = arith.constant 0.000000e+00 : f32
    %426 = vector.broadcast %cst_354 : f32 to vector<32x256xf32>
    %427 = arith.maximumf %425, %426 : vector<32x256xf32>
    %c0_355 = arith.constant 0 : index
    %c0_356 = arith.constant 0 : index
    %428 = vector.load %arg10[%c0_355, %c0_356] : memref<32x256xf32, #tpu.memory_space<vmem>>, vector<32x256xf32>
    %429 = arith.addf %427, %428 : vector<32x256xf32>
    %c0_357 = arith.constant 0 : index
    %c0_358 = arith.constant 0 : index
    %430 = vector.load %arg4[%c0_357, %c0_358] : memref<2x32xbf16, #tpu.memory_space<vmem>>, vector<2x32xbf16>
    %431 = arith.truncf %429 : vector<32x256xf32> to vector<32x256xbf16>
    %cst_359 = arith.constant dense<0.000000e+00> : vector<2x256xf32>
    %432 = tpu.matmul %430, %431, %cst_359 {dimension_numbers = #tpu.dot_dimension_numbers<[1], [0], [0], [1], [0, 0, 1, 1], [], []>} : vector<2x32xbf16>, vector<32x256xbf16>, vector<2x256xf32> -> vector<2x256xf32>
    %c0_360 = arith.constant 0 : index
    %c0_361 = arith.constant 0 : index
    %433 = vector.load %arg6[%c0_360, %c0_361] : memref<2x1xf32, #tpu.memory_space<vmem>>, vector<2x1xf32>
    %434 = vector.broadcast %433 : vector<2x1xf32> to vector<2x256xf32>
    %435 = arith.addf %432, %434 : vector<2x256xf32>
    %436 = math.tanh %435 : vector<2x256xf32>
    %437 = vector.shape_cast %436 : vector<2x256xf32> to vector<1x2x256xf32>
    %c0_362 = arith.constant 0 : index
    %c0_363 = arith.constant 0 : index
    %c0_364 = arith.constant 0 : index
    %438 = vector.load %arg8[%c0_362, %c0_363, %c0_364] : memref<1x2x256xf32, #tpu.memory_space<vmem>>, vector<1x2x256xf32>
    tpu.vector_store %arg8[%c0_362, %c0_363, %c0_364], %437 {strides = array<i32>} : memref<1x2x256xf32, #tpu.memory_space<vmem>>, vector<1x2x256xf32>,
    return
  }
  func.func @transform_0(%arg0: i32) -> (i32, i32, i32) {
    %c0_i32 = arith.constant 0 : i32
    %c0_i32_0 = arith.constant 0 : i32
    %c0_i32_1 = arith.constant 0 : i32
    return %arg0, %c0_i32, %c0_i32_0 : i32, i32, i32
  }
  func.func @transform_1(%arg0: i32) -> (i32, i32) {
    %c0_i32 = arith.constant 0 : i32
    %c0_i32_0 = arith.constant 0 : i32
    %c0_i32_1 = arith.constant 0 : i32
    return %c0_i32, %c0_i32_0 : i32, i32
  }
  func.func @transform_2(%arg0: i32) -> (i32, i32, i32) {
    %c0_i32 = arith.constant 0 : i32
    %c0_i32_0 = arith.constant 0 : i32
    %c0_i32_1 = arith.constant 0 : i32
    %c0_i32_2 = arith.constant 0 : i32
    return %c0_i32, %c0_i32_0, %c0_i32_1 : i32, i32, i32
  }
  func.func @transform_3(%arg0: i32) -> (i32, i32) {
    %c0_i32 = arith.constant 0 : i32
    %c0_i32_0 = arith.constant 0 : i32
    %c0_i32_1 = arith.constant 0 : i32
    return %c0_i32, %c0_i32_0 : i32, i32
  }
  func.func @transform_4(%arg0: i32) -> (i32, i32) {
    %c0_i32 = arith.constant 0 : i32
    %c0_i32_0 = arith.constant 0 : i32
    %c0_i32_1 = arith.constant 0 : i32
    return %c0_i32, %c0_i32_0 : i32, i32
  }
  func.func @transform_5(%arg0: i32) -> (i32, i32) {
    %c0_i32 = arith.constant 0 : i32
    %c0_i32_0 = arith.constant 0 : i32
    %c0_i32_1 = arith.constant 0 : i32
    return %c0_i32, %c0_i32_0 : i32, i32
  }
  func.func @transform_6(%arg0: i32) -> (i32, i32) {
    %c0_i32 = arith.constant 0 : i32
    %c0_i32_0 = arith.constant 0 : i32
    %c0_i32_1 = arith.constant 0 : i32
    return %c0_i32, %c0_i32_0 : i32, i32
  }
  func.func @transform_7(%arg0: i32) -> (i32, i32, i32) {
    %c0_i32 = arith.constant 0 : i32
    %c0_i32_0 = arith.constant 0 : i32
    %c0_i32_1 = arith.constant 0 : i32
    return %arg0, %c0_i32, %c0_i32_0 : i32, i32, i32
  }
}

</mosaic_0001>

<bundles_post_ra>
// kernel: tpu_custom_call.1
= control target key start
LH: loop header
LB: loop body
LE: loop exit
PB: predicated region body
PF: predicated region fallthrough
CT: control target
= control target key end

     0   :  { %12 = vsyncpa [#allocation6], 0  ;;  %s8451_s0 = inlined_call_operand.hbm [shape: f32[2,16,256], index: 0, kind: input, shape index: {}]   ;;  %s8452_s1 = inlined_call_operand.vmem [shape: bf16[32,144], index: 1, kind: input, shape index: {}]   ;;  %s8453_s2 = inlined_call_operand.hbm [shape: bf16[6,32,288], index: 2, kind: input, shape index: {}]   ;;  %s8454_s3 = inlined_call_operand.vmem [shape: bf16[2,32], index: 3, kind: input, shape index: {}]   ;;  %s8455_s4 = inlined_call_operand.vmem [shape: f32[32,7], index: 4, kind: input, shape index: {}]   ;;  %s8456_s5 = inlined_call_operand.vmem [shape: f32[2,1], index: 5, kind: input, shape index: {}]   ;;  %s8457_s6 = inlined_call_operand.vmem [shape: f32[9,256], index: 6, kind: input, shape index: {}]   ;;  %s8458_s7 = inlined_call_operand.hbm [shape: f32[2,2,256], index: 7, kind: output, shape index: {}]  }
   0x1   :  { %14 = vsyncpa [#allocation6 + $0x1], 0 }
   0x2   :  { %15 = vsyncpa [#allocation9], 0 }
   0x3   :  { %16 = vsyncpa [#allocation7], 0 }
   0x4   :  { %18 = vsyncpa [#allocation7 + $0x1], 0  ;;  %s5437_s24 = smov 0   ;;  %s5439_s25 = smov 0  }
   0x5   :  { %s5441_s26 = smov 0   ;;  %s5443_s27 = smov 0  }
   0x6 LB: > { %s5458_s28 = sadd.s32 4294967295, %s5373_s27   ;;  %s4876_s29 = sadd.s32 4294967294, %s5373_s27   ;;  %s5373_s27 = sphi %s5443_s27, %s8487_s27   ;;  %s5369_s26 = sphi %s5441_s26, %s8486_s26   ;;  %s5365_s25 = sphi %s5439_s25, %s8485_s25   ;;  %s5361_s24 = sphi %s5437_s24, %s8484_s24  }
   0x7   : > { %p44_p0 = scmp.ne.s32.totalorder %s5365_s25, %s5361_s24  ;;  %p8459_p1 = scmp.eq.s32.totalorder %s5458_s28, 0 }
   0x8   : > { %p200_p3 = scmp.eq.s32.totalorder %s4876_s29, 1  ;;  %p4877_p5 = scmp.ge.s32.totalorder %s5373_s27, 1 }
   0x9   : > { %p5467_p4 = por %p8459_p1, %p44_p0  ;;  %p207_p7 = scmp.lt.s32.totalorder %s5373_s27, 3 }
   0xa   : > { %p5472_p6 = por %p200_p3, %p44_p0  ;;  %s5375_s10 = smov [#allocation8]  }
   0xb   : > { %s8468_s30 = scalar_select %p5467_p4, 1, 0 }
   0xc   : > { %s8469_s8 = scalar_select %p5472_p6, 1, 0 }
   0xd   : > { %p5477_p8 = pnand %p4877_p5, %p207_p7  ;;  %s222_s11 = sshll.u32 %s5375_s10, 4  ;;  %s5481_s11 = int_to_ptr.vmem [resolvable:$true] %s222_s11 }
   0xe   : > { %s5493_s13 = sadd.s32 1, %s5373_s27   ;;  %s31_s14 = sadd.s32 1, %s5369_s26 }
   0xf   : > { %s8470_s9 = scalar_select %p5477_p8, 1, 0 }
  0x10   : > { %p5103_p9 = pneg %p5477_p8  ;;  %s28_s15 = ssub.s32 %s5373_s27, %s5493_s13 }
  0x11   : > { %s5245_s18 = scalar_lea.hbm %s8453_s2, 4608 }
  0x12   : > { %p5488_p11 = pnand %p5103_p9, %p8459_p1  ;;  %p5246_p12 = scmp.ne.s32.totalorder %s8453_s2, %s5245_s18 }
  0x13   : > { %p5252_p5 = scmp.lt.u32.totalorder %s5245_s18, %s8453_s2 }
  0x14   : > { %p5247_p13 = pneg %p5488_p11 }
  0x16   : > { %p5248_p0 = pnand %p5247_p13, %p5246_p12 }
  0x18   : > { %p5249_p3 = pneg %p5248_p0 }
  0x1a   : > { %p5254_p7 = pnand %p5252_p5, %p5249_p3 }
  0x1c   : > { %5257 = shalt.err (!%p5254_p7)
}
  0x1d   : > { %s5258_s23 = scalar_lea.vmem %s5481_s11, 4608  ;;  %p5266_p2 = scmp.lt.s32.totalorder %s5481_s11, %s5481_s11 }
  0x1e   : > { %p5259_p9 = scmp.ne.s32.totalorder %s5481_s11, %s5258_s23  ;;  %p5267_p6 = scmp.lt.s32.totalorder %s5258_s23, %s5258_s23 }
  0x20   : > { %p5261_p10 = pnand %p5259_p9, %p5247_p13  ;;  %p5268_p4 = por %p5267_p6, %p5266_p2 }
  0x22   : > { %p5262_p1 = pneg %p5261_p10 }
  0x24   : > { %p5269_p8 = pnand %p5268_p4, %p5262_p1 }
  0x26   : > { %5272 = shalt.err (!%p5269_p8)
}
  0x27   : > { %s5376_s29 = smov 192   ;;  %s5377_s10 = smov 12  }
  0x28   : > { %5106 = dma.hbm_to_vmem [thread:$0]  (!%p5488_p11), %s8453_s2, 4608, %s5481_s11, [#allocation9], %s5376_s29, %s5376_s29, %s5377_s10  }
  0x29   : > { %p29_p2 = scmp.eq.s32.totalorder %s28_s15, 0  ;;  %p38_p1 = scmp.ne.s32.totalorder %s5369_s26, %s5365_s25 }
  0x2a   : > { %p39_p4 = scmp.eq.s32.totalorder %s5373_s27, 0  ;;  %p5116_p6 = scmp.lt.s32.totalorder %s5373_s27, 2 }
  0x2b   : > { %s5524_s18 = scalar_select %p29_p2, %s5369_s26, %s31_s14  }
  0x2c   : > { %p40_p8 = por %p39_p4, %p38_p1  ;;  %p8472_p10 = scmp.eq.s32.totalorder %s5458_s28, 1 }
  0x2d   : > { %s248_s20 = sand.u32 1, %s5369_s26   ;;  %s4997_s21 = sshll.u32 %s5373_s27, 9 }
  0x2e   : > { %p5528_p12 = por %p8472_p10, %p38_p1  ;;  %s4880_s22 = sshll.u32 %s248_s20, 5 }
  0x2f   : > { %s5537_s16 = scalar_lea.hbm %s8451_s0, %s4997_s21  ;;  %s252_s11 = scalar_lea.vmem [#allocation5], %s4880_s22 }
  0x30   : > { %s259_s14 = sshll.u32 %s252_s11, 4  ;;  %p5539_p11 = pnand %p5116_p6, %p40_p8  ;;  %s5543_s14 = int_to_ptr.vmem [resolvable:$true] %s259_s14 }
  0x31   : > { %s5545_s29 = scalar_lea.sflag [#allocation6], %s248_s20  ;;  %s5273_s10 = scalar_lea.hbm %s5537_s16, 512 }
  0x32   : > { %p5274_p13 = scmp.ne.s32.totalorder %s5537_s16, %s5273_s10  ;;  %p5275_p0 = pneg %p5539_p11 }
  0x33   : > { %s5278_s22 = scalar_lea.hbm %s8451_s0, 1024  ;;  %p5279_p7 = scmp.lt.u32.totalorder %s5537_s16, %s8451_s0 }
  0x34   : > { %p5276_p3 = pnand %p5275_p0, %p5274_p13  ;;  %p5280_p9 = scmp.lt.u32.totalorder %s5278_s22, %s5273_s10 }
  0x35   : > { %p5282_p1 = scmp.lt.u32.totalorder %s5273_s10, %s5537_s16 }
  0x36   : > { %p5277_p5 = pneg %p5276_p3  ;;  %p5281_p2 = por %p5280_p9, %p5279_p7 }
  0x38   : > { %p5283_p4 = por %p5282_p1, %p5281_p2 }
  0x3a   : > { %p5284_p6 = pnand %p5283_p4, %p5277_p5 }
  0x3c   : > { %5287 = shalt.err (!%p5284_p6)
}
  0x3d   : > { %s5288_s20 = scalar_lea.vmem %s5543_s14, 512  ;;  %s5378_s11 = smov [#allocation5]  }
  0x3e   : > { %p5289_p8 = scmp.ne.s32.totalorder %s5543_s14, %s5288_s20  ;;  %s5293_s17 = sshll.u32 %s5378_s11, 4  ;;  %s5294_s17 = int_to_ptr.vmem [resolvable:$false] %s5293_s17 }
  0x3f   : > { %s5295_s21 = scalar_lea.vmem %s5294_s17, 1024  ;;  %p5296_p3 = scmp.lt.s32.totalorder %s5543_s14, %s5294_s17 }
  0x40   : > { %p5291_p10 = pnand %p5289_p8, %p5275_p0  ;;  %p5297_p7 = scmp.lt.s32.totalorder %s5295_s21, %s5288_s20 }
  0x42   : > { %p5292_p13 = pneg %p5291_p10  ;;  %p5298_p9 = por %p5297_p7, %p5296_p3 }
  0x44   : > { %p5299_p2 = pnand %p5298_p9, %p5292_p13 }
  0x46   : > { %5302 = shalt.err (!%p5299_p2)
}
  0x47   : > { %s5379_s10 = smov 256   ;;  %s5380_s22 = smov 16  }
  0x48   : > { %5110 = dma.hbm_to_vmem [thread:$0]  (!%p5539_p11), %s5537_s16, 512, %s5543_s14, %s5545_s29, %s5379_s10, %s5379_s10, %s5380_s22  }
  0x49   : > { %p8475_p0 = scmp.ne.s32.totalorder %s8470_s9, 0 }
  0x4a   : > { %s5576_s12 = sand.u32 (!%p8475_p0), 1, %s5365_s25   ;;  %p8476_p5 = scmp.ne.s32.totalorder (!%p8475_p0), %s8468_s30, 0 }
  0x4b   : > { %271 = sbr.rel (%p8475_p0) target bundleno = 3546 (0xdda), region = 48  ;;  %s4884_s23 = sshll.u32 (!%p8475_p0), %s5576_s12, 5 }
  0x4c   : > { %s274_s20 = scalar_lea.sflag (!%p8475_p0), [#allocation6], %s5576_s12  ;;  %s277_s11 = scalar_lea.vmem (!%p8475_p0), [#allocation5], %s4884_s23 }
  0x52   : > { %5348 = dma.done.wait (%p8476_p5), %s274_s20, 512  }
  0x53   : > { %5350 = vsyncadd (%p8476_p5), %s274_s20, 4294966784  ;;  %p8477_p1 = scmp.eq.s32.totalorder %s5458_s28, 0 }
  0x55   : > { %5352 = dma.done.wait (%p8477_p1), [#allocation9], 4608   ;;  %p8478_p11 = pmov %p8477_p1 }
  0x56   : > { %v5588_v0 = vld [vmem:[%s277_s11 + $0x8] sm:$0xff]  ;;  %v5590_v1 = vld [vmem:[%s277_s11] sm:$0xff]  ;;  %s5381_s9 = smov 17   ;;  %v5596_v2 = vld [vmem:[%s277_s11 + $0x18] sm:$0xff]  ;;  %s5382_s30 = smov 16   ;;  %vm658_vm0 = vcmask 130048   ;;  %v329_v12 = vlaneseq }
  0x57   : > { %5354 = vsyncadd (%p8478_p11), [#allocation9], 4294962688  ;;  %325 = vrot.lane.b32.xlu1 %v5588_v0, %s5381_s9  ;;  %321 = vrot.lane.b32.xlu0 %v5590_v1, %s5381_s9  ;;  %v5598_v3 = vld [vmem:[%s277_s11 + $0x10] sm:$0xff]  ;;  %s5383_s16 = smov 15   ;;  %v459_v4 = vpack.c.bf16 %v5596_v2, %v5588_v0  ;;  %s5384_s14 = smov 1   ;;  %v5671_v7 = vld [vmem:[%s8455_s4 + $0x8] sm:$0xff] }
  0x58   : > { %v458_v5 = vpack.c.bf16 %v5598_v3, %v5590_v1  ;;  %s5385_s15 = smov 127   ;;  %s8466_s29 = smov 113   ;;  %v5189_v6 = vld [vmem:[%s8452_s1 + $0x4] ss:$8 sps:$4 sm:$0xff]   ;;  %v5389_v9 = vmov 0   ;;  %v5685_v10 = vld [vmem:[%s8455_s4 + $0x10] sm:$0xff] }
  0x59   : > { %s8464_s17 = smov 112   ;;  %4898 = vmatprep.mubr.msk.bf16.mxu0 %vm658_vm0, %v5189_v6  ;;  %s8462_s22 = smov 111   ;;  %v5676_v8 = vld [vmem:[%s8455_s4] sm:$0xff]  ;;  %5172 = vset.pattern.permute.xlu1 %v5389_v9  ;;  %v5690_v11 = vld [vmem:[%s8455_s4 + $0x18] sm:$0xff]  ;;  %v339_v13 = vshrl.u32 %v329_v12, 7  ;;  %v5694_v14 = vand.u32 127, %v329_v12 }
  0x5a   : > { %5171 = vset.pattern.permute.xlu0 %v5389_v9  ;;  %v336_v17 = vld [vmem:[%s8457_s6] ss:$8 sm:$0x3]  ;;  %v4887_v32 = vld [vmem:[%s8457_s6 + $0x1] ss:$8 sm:$0x3] }
  0x5b   : > { %327 = vrot.lane.b32.xlu1 %v5596_v2, %s5381_s9  ;;  %323 = vrot.lane.b32.xlu0 %v5598_v3, %s5381_s9  ;;  %v5696_v15 = vsub.s32 0, %v339_v13  ;;  %v5698_v16 = vsub.s32 1, %v339_v13  ;;  %vm331_vm1 = vcmp.lt.s32.totalorder %v5694_v14, 17  ;;  %vm364_vm2 = vcmp.lt.s32.totalorder %v5694_v14, 16  ;;  %s8479_s23 = smov 111   ;;  %s8481_s21 = smov 113  }
  0x5c   : > { %v4888_v49 = vld [vmem:[%s8457_s6 + $0x2] ss:$8 sm:$0x3]  ;;  %vm398_vm3 = vcmp.lt.s32.totalorder %v5694_v14, 15  ;;  %vm432_vm4 = vcmp.lt.s32.totalorder %v5694_v14, 1  ;;  %vm470_vm5 = vcmp.lt.s32.totalorder %v5694_v14, 127 }
  0x5d   : > { %v345_v20 = vrot.slane %v336_v17, %v5698_v16  ;;  %v341_v21 = vrot.slane %v336_v17, %v5696_v15  ;;  %v375_v37 = vrot.slane %v4887_v32, %v5696_v15  ;;  %v379_v38 = vrot.slane %v4887_v32, %v5698_v16  ;;  %v4889_v13 = vld [vmem:[%s8457_s6 + $0x3] ss:$8 sm:$0x3]  ;;  %s4782_s20 = scalar_lea.sflag [#allocation7], %s5576_s12 }
  0x5e   : > { %v409_v54 = vrot.slane %v4888_v49, %v5696_v15  ;;  %v413_v55 = vrot.slane %v4888_v49, %v5698_v16  ;;  %vm504_vm6 = vcmp.lt.s32.totalorder %v5694_v14, 113  ;;  %vm538_vm7 = vcmp.lt.s32.totalorder %v5694_v14, 112 }
  0x5f   : > { %358 = vrot.lane.b32.xlu1 %v5598_v3, %s5382_s30  ;;  %356 = vrot.lane.b32.xlu0 %v5590_v1, %s5382_s30  ;;  %vm572_vm8 = vcmp.lt.s32.totalorder %v5694_v14, 111  ;;  %vm1264_vm9 = vcmask 261120   ;;  %v4717_v14 = vld [vmem:[%s8456_s5] sm:$0x3] }
  0x63   : > { %362 = vrot.lane.b32.xlu1 %v5596_v2, %s5382_s30  ;;  %360 = vrot.lane.b32.xlu0 %v5588_v0, %s5382_s30 }
  0x67   : > { %392 = vrot.lane.b32.xlu1 %v5598_v3, %s5383_s16  ;;  %390 = vrot.lane.b32.xlu0 %v5590_v1, %s5383_s16 }
  0x6b   : > { %396 = vrot.lane.b32.xlu1 %v5596_v2, %s5383_s16  ;;  %394 = vrot.lane.b32.xlu0 %v5588_v0, %s5383_s16 }
  0x6f   : > { %426 = vrot.lane.b32.xlu1 %v5598_v3, %s5384_s14  ;;  %424 = vrot.lane.b32.xlu0 %v5590_v1, %s5384_s14 }
  0x73   : > { %430 = vrot.lane.b32.xlu1 %v5596_v2, %s5384_s14  ;;  %428 = vrot.lane.b32.xlu0 %v5588_v0, %s5384_s14 }
  0x77   : > { %464 = vrot.lane.b32.xlu1 %v5598_v3, %s5385_s15  ;;  %462 = vrot.lane.b32.xlu0 %v5590_v1, %s5385_s15 }
  0x7b   : > { %468 = vrot.lane.b32.xlu1 %v5596_v2, %s5385_s15  ;;  %466 = vrot.lane.b32.xlu0 %v5588_v0, %s5385_s15 }
  0x7f   : > { %498 = vrot.lane.b32.xlu1 %v5598_v3, %s8466_s29  ;;  %496 = vrot.lane.b32.xlu0 %v5590_v1, %s8466_s29 }
  0x83   : > { %502 = vrot.lane.b32.xlu1 %v5596_v2, %s8466_s29  ;;  %500 = vrot.lane.b32.xlu0 %v5588_v0, %s8466_s29 }
  0x87   : > { %532 = vrot.lane.b32.xlu1 %v5598_v3, %s8464_s17  ;;  %530 = vrot.lane.b32.xlu0 %v5590_v1, %s8464_s17 }
  0x8b   : > { %536 = vrot.lane.b32.xlu1 %v5596_v2, %s8464_s17  ;;  %534 = vrot.lane.b32.xlu0 %v5588_v0, %s8464_s17 }
  0x8f   : > { %566 = vrot.lane.b32.xlu1 %v5598_v3, %s8462_s22  ;;  %564 = vrot.lane.b32.xlu0 %v5590_v1, %s8462_s22 }
  0x93   : > { %570 = vrot.lane.b32.xlu1 %v5596_v2, %s8462_s22  ;;  %568 = vrot.lane.b32.xlu0 %v5588_v0, %s8462_s22  ;;  %v4891_v0 = vld [vmem:[%s8457_s6 + $0x6] ss:$8 sm:$0x3]  ;;  %s8480_s22 = smov 112  }
  0x97   : > { %627 = vperm.xlu1 %5172, %v5671_v7   ;;  %622 = vperm.xlu0 %5171, %v5676_v8  }
  0x9b   : > { %632 = vperm.xlu1 %5172, %v5685_v10   ;;  %637 = vperm.xlu0 %5171, %v5690_v11  }
  0xc9   : > { %v326_v18 = vpop.permute.xlu1 %325  ;;  %v322_v19 = vpop.permute.xlu0 %321 }
  0xca   : > { %v334_v22 = vsel %vm331_vm1, %v326_v18, %v322_v19  ;;  %v332_v23 = vsel %vm331_vm1, %v322_v19, %v326_v18 }
  0xcb   : > { %v349_v28 = vmul.f32 %v345_v20, %v332_v23  ;;  %v348_v30 = vmul.f32 %v341_v21, %v334_v22  ;;  %v447_v22 = vrot.slane %v4889_v13, %v5698_v16 }
  0xcd   : > { %v328_v24 = vpop.permute.xlu1 %327  ;;  %v324_v25 = vpop.permute.xlu0 %323 }
  0xce   : > { %v335_v26 = vsel %vm331_vm1, %v328_v24, %v324_v25  ;;  %v333_v27 = vsel %vm331_vm1, %v324_v25, %v328_v24 }
  0xcf   : > { %v351_v29 = vmul.f32 %v345_v20, %v333_v27  ;;  %v350_v31 = vmul.f32 %v341_v21, %v335_v26  ;;  %v443_v21 = vrot.slane %v4889_v13, %v5696_v15 }
  0xd1   : > { %v359_v33 = vpop.permute.xlu1 %358  ;;  %v357_v34 = vpop.permute.xlu0 %356  ;;  %v353_v35 = vpack.c.bf16 %v351_v29, %v349_v28  ;;  %v352_v36 = vpack.c.bf16 %v350_v31, %v348_v30 }
  0xd3   : > { %665 = vmatprep.subr.bf16.mxu0 %v353_v35 }
  0xd4   : > { %666 = vmatpush1.bf16.msra.mxu0 %v352_v36 }
  0xd5   : > { %v363_v39 = vpop.permute.xlu1 %362  ;;  %v361_v40 = vpop.permute.xlu0 %360 }
  0xd6   : > { %v366_v41 = vsel %vm364_vm2, %v359_v33, %v363_v39  ;;  %v368_v42 = vsel %vm364_vm2, %v363_v39, %v359_v33  ;;  %v365_v43 = vsel %vm364_vm2, %v357_v34, %v361_v40  ;;  %v367_v44 = vsel %vm364_vm2, %v361_v40, %v357_v34  ;;  %v4890_v33 = vld [vmem:[%s8457_s6 + $0x5] ss:$8 sm:$0x3] }
  0xd7   : > { %v384_v45 = vmul.f32 %v375_v37, %v368_v42  ;;  %v385_v46 = vmul.f32 %v379_v38, %v366_v41  ;;  %v382_v47 = vmul.f32 %v375_v37, %v367_v44  ;;  %v383_v48 = vmul.f32 %v379_v38, %v365_v43 }
  0xd8   : > { %v481_v38 = vrot.slane %v4890_v33, %v5696_v15  ;;  %v485_v39 = vrot.slane %v4890_v33, %v5698_v16 }
  0xd9   : > { %v393_v50 = vpop.permute.xlu1 %392  ;;  %v391_v51 = vpop.permute.xlu0 %390  ;;  %v387_v52 = vpack.c.bf16 %v385_v46, %v383_v48  ;;  %v386_v53 = vpack.c.bf16 %v384_v45, %v382_v47 }
  0xdb   : > { %667 = vmatprep.subr.bf16.mxu0 %v387_v52  ;;  %v515_v52 = vrot.slane %v4891_v0, %v5696_v15 }
  0xdc   : > { %668 = vmatpush1.bf16.msra.mxu0 %v386_v53  ;;  %v519_v53 = vrot.slane %v4891_v0, %v5698_v16 }
  0xdd   : > { %v397_v56 = vpop.permute.xlu1 %396  ;;  %v395_v57 = vpop.permute.xlu0 %394 }
  0xde   : > { %v400_v58 = vsel %vm398_vm3, %v393_v50, %v397_v56  ;;  %v402_v59 = vsel %vm398_vm3, %v397_v56, %v393_v50  ;;  %v399_v60 = vsel %vm398_vm3, %v391_v51, %v395_v57  ;;  %v401_v61 = vsel %vm398_vm3, %v395_v57, %v391_v51 }
  0xdf   : > { %v418_v62 = vmul.f32 %v409_v54, %v402_v59  ;;  %v419_v63 = vmul.f32 %v413_v55, %v400_v58  ;;  %v416_v6 = vmul.f32 %v409_v54, %v401_v61  ;;  %v417_v12 = vmul.f32 %v413_v55, %v399_v60  ;;  %v4892_v61 = vld [vmem:[%s8457_s6 + $0x7] ss:$8 sm:$0x3] }
  0xe0   : > { %v549_v13 = vrot.slane %v4892_v61, %v5696_v15 }
  0xe1   : > { %v427_v17 = vpop.permute.xlu1 %426  ;;  %v425_v18 = vpop.permute.xlu0 %424  ;;  %v421_v19 = vpack.c.bf16 %v419_v63, %v417_v12  ;;  %v420_v20 = vpack.c.bf16 %v418_v62, %v416_v6 }
  0xe3   : > { %669 = vmatprep.subr.bf16.mxu0 %v421_v19 }
  0xe4   : > { %670 = vmatpush1.bf16.msra.mxu0 %v420_v20 }
  0xe5   : > { %v431_v23 = vpop.permute.xlu1 %430  ;;  %v429_v24 = vpop.permute.xlu0 %428 }
  0xe6   : > { %v434_v25 = vsel %vm432_vm4, %v427_v17, %v431_v23  ;;  %v436_v26 = vsel %vm432_vm4, %v431_v23, %v427_v17  ;;  %v433_v27 = vsel %vm432_vm4, %v425_v18, %v429_v24  ;;  %v435_v28 = vsel %vm432_vm4, %v429_v24, %v425_v18 }
  0xe7   : > { %v452_v29 = vmul.f32 %v443_v21, %v436_v26  ;;  %v453_v30 = vmul.f32 %v447_v22, %v434_v25  ;;  %v450_v31 = vmul.f32 %v443_v21, %v435_v28  ;;  %v451_v32 = vmul.f32 %v447_v22, %v433_v27  ;;  %v4893_v28 = vld [vmem:[%s8457_s6 + $0x10] ss:$8 sm:$0x3] }
  0xe8   : > { %v553_v17 = vrot.slane %v4892_v61, %v5698_v16  ;;  %v583_v33 = vrot.slane %v4893_v28, %v5696_v15 }
  0xe9   : > { %v465_v34 = vpop.permute.xlu1 %464  ;;  %v463_v35 = vpop.permute.xlu0 %462  ;;  %v455_v36 = vpack.c.bf16 %v453_v30, %v451_v32  ;;  %v454_v37 = vpack.c.bf16 %v452_v29, %v450_v31 }
  0xeb   : > { %671 = vmatprep.subr.bf16.mxu0 %v455_v36 }
  0xec   : > { %672 = vmatpush1.bf16.msra.mxu0 %v454_v37 }
  0xed   : > { %v469_v40 = vpop.permute.xlu1 %468  ;;  %v467_v41 = vpop.permute.xlu0 %466  ;;  %673 = vmatprep.subr.bf16.mxu0 %v459_v4 }
  0xee   : > { %v472_v42 = vsel %vm470_vm5, %v465_v34, %v469_v40  ;;  %v474_v43 = vsel %vm470_vm5, %v469_v40, %v465_v34  ;;  %v471_v44 = vsel %vm470_vm5, %v463_v35, %v467_v41  ;;  %v473_v45 = vsel %vm470_vm5, %v467_v41, %v463_v35 }
  0xef   : > { %v490_v46 = vmul.f32 %v481_v38, %v472_v42  ;;  %v491_v47 = vmul.f32 %v485_v39, %v474_v43  ;;  %v488_v48 = vmul.f32 %v481_v38, %v471_v44  ;;  %v489_v49 = vmul.f32 %v485_v39, %v473_v45 }
  0xf0   : > { %674 = vmatpush1.bf16.msra.mxu0 %v458_v5  ;;  %v587_v34 = vrot.slane %v4893_v28, %v5698_v16 }
  0xf1   : > { %v499_v2 = vpop.permute.xlu1 %498  ;;  %v497_v4 = vpop.permute.xlu0 %496  ;;  %v493_v50 = vpack.c.bf16 %v491_v47, %v489_v49  ;;  %v492_v51 = vpack.c.bf16 %v490_v46, %v488_v48  ;;  %v5187_v47 = vld [vmem:[%s8452_s1] ss:$8 sps:$4 sm:$0xff]   ;;  %v5190_v48 = vld [vmem:[%s8452_s1 + $0x14] ss:$8 sps:$4 sm:$0xff]   ;;  %v5192_v49 = vld [vmem:[%s8452_s1 + $0x10] ss:$8 sps:$4 sm:$0xff]  }
  0xf3   : > { %675 = vmatprep.subr.bf16.mxu0 %v493_v50 }
  0xf4   : > { %676 = vmatpush1.bf16.msra.mxu0 %v492_v51 }
  0xf5   : > { %v503_v54 = vpop.permute.xlu1 %502  ;;  %v501_v55 = vpop.permute.xlu0 %500 }
  0xf6   : > { %v506_v1 = vsel %vm504_vm6, %v499_v2, %v503_v54  ;;  %v508_v3 = vsel %vm504_vm6, %v503_v54, %v499_v2  ;;  %v505_v5 = vsel %vm504_vm6, %v497_v4, %v501_v55  ;;  %v507_v56 = vsel %vm504_vm6, %v501_v55, %v497_v4 }
  0xf7   : > { %v524_v57 = vmul.f32 %v515_v52, %v506_v1  ;;  %v525_v58 = vmul.f32 %v519_v53, %v508_v3  ;;  %v522_v59 = vmul.f32 %v515_v52, %v505_v5  ;;  %v523_v60 = vmul.f32 %v519_v53, %v507_v56 }
  0xf9   : > { %v533_v62 = vpop.permute.xlu1 %532  ;;  %v531_v63 = vpop.permute.xlu0 %530  ;;  %v527_v6 = vpack.c.bf16 %v525_v58, %v523_v60  ;;  %v526_v12 = vpack.c.bf16 %v524_v57, %v522_v59 }
  0xfb   : > { %677 = vmatprep.subr.bf16.mxu0 %v527_v6 }
  0xfc   : > { %678 = vmatpush1.bf16.msra.mxu0 %v526_v12 }
  0xfd   : > { %v537_v18 = vpop.permute.xlu1 %536  ;;  %v535_v19 = vpop.permute.xlu0 %534 }
  0xfe   : > { %v540_v20 = vsel %vm538_vm7, %v533_v62, %v537_v18  ;;  %v542_v21 = vsel %vm538_vm7, %v537_v18, %v533_v62  ;;  %v539_v22 = vsel %vm538_vm7, %v531_v63, %v535_v19  ;;  %v541_v23 = vsel %vm538_vm7, %v535_v19, %v531_v63 }
  0xff   : > { %v558_v24 = vmul.f32 %v549_v13, %v540_v20  ;;  %v559_v25 = vmul.f32 %v553_v17, %v542_v21  ;;  %v556_v26 = vmul.f32 %v549_v13, %v539_v22  ;;  %v557_v27 = vmul.f32 %v553_v17, %v541_v23  ;;  %v5195_v22 = vld [vmem:[#allocation8 + $0x4] ss:$12 sps:$4 sm:$0xff]  }
 0x100   : > { %1303 = vmatprep.mubr.bf16.mxu1 %v5195_v22 }
 0x101   : > { %v567_v29 = vpop.permute.xlu1 %566  ;;  %v565_v30 = vpop.permute.xlu0 %564  ;;  %v561_v31 = vpack.c.bf16 %v559_v25, %v557_v27  ;;  %v560_v32 = vpack.c.bf16 %v558_v24, %v556_v26 }
 0x103   : > { %679 = vmatprep.subr.bf16.mxu0 %v561_v31 }
 0x104   : > { %680 = vmatpush1.bf16.msra.mxu0 %v560_v32  ;;  %v774_v32 = vld [vmem:[%s8457_s6] ss:$8 sm:$0x3] }
 0x105   : > { %v571_v35 = vpop.permute.xlu1 %570  ;;  %v569_v36 = vpop.permute.xlu0 %568 }
 0x106   : > { %v574_v37 = vsel %vm572_vm8, %v567_v29, %v571_v35  ;;  %v576_v38 = vsel %vm572_vm8, %v571_v35, %v567_v29  ;;  %v573_v39 = vsel %vm572_vm8, %v565_v30, %v569_v36  ;;  %v575_v40 = vsel %vm572_vm8, %v569_v36, %v565_v30 }
 0x107   : > { %v592_v41 = vmul.f32 %v583_v33, %v574_v37  ;;  %v593_v42 = vmul.f32 %v587_v34, %v576_v38  ;;  %v590_v43 = vmul.f32 %v583_v33, %v573_v39  ;;  %v591_v44 = vmul.f32 %v587_v34, %v575_v40 }
 0x108   : > { %v5390_v33 = vmov 1   ;;  %v783_v36 = vrot.slane %v774_v32, %v5698_v16  ;;  %v779_v37 = vrot.slane %v774_v32, %v5696_v15 }
 0x109   : > { %v595_v45 = vpack.c.bf16 %v593_v42, %v591_v44  ;;  %v594_v46 = vpack.c.bf16 %v592_v41, %v590_v43  ;;  %5173 = vset.pattern.permute.xlu1 %v5390_v33  ;;  %5174 = vset.pattern.permute.xlu0 %v5390_v33 }
 0x10b   : > { %681 = vmatprep.subr.bf16.mxu0 %v595_v45 }
 0x10c   : > { %682 = vmatpush1.bf16.msra.mxu0 %v594_v46 }
 0x10f   : > { %698 = vmatmul.mubr.bf16.vlgmr.msra.gmra.mrb[0].mxu0 %v5187_v47 }
 0x110   : > { %4899 = vmatprep.mubr.msk.bf16.mxu0 %vm658_vm0, %v5190_v48 }
 0x116   : > { %v623_v0 = vpop.permute.xlu0 %622  ;;  %v628_v51 = vpop.permute.xlu1 %627 }
 0x117   : > { %708 = vmatmul.mubr.bf16.gmra.mrb[4].mxu0 %v5192_v49 }
 0x11a   : > { %v633_v62 = vpop.permute.xlu1 %632  ;;  %v638_v6 = vpop.permute.xlu0 %637 }
 0x1e2   : > { %v699_v2 = vpop.f32.mrb[0].mxu0 }
 0x1e3   : > { %v700_v4 = vadd.f32 %v699_v2, %v623_v0  ;;  %v701_v50 = vpop.f32.mrb[1].mxu0 }
 0x1e4   : > { %v703_v52 = vpop.f32.mrb[2].mxu0  ;;  %v702_v58 = vadd.f32 %v701_v50, %v623_v0 }
 0x1e5   : > { %v5828_v53 = vmax.f32 %v700_v4, 0.0  ;;  %v704_v54 = vadd.f32 %v703_v52, %v628_v51  ;;  %v705_v55 = vpop.f32.mrb[3].mxu0 }
 0x1e6   : > { %v706_v59 = vadd.f32 %v705_v55, %v628_v51  ;;  %v5850_v60 = vmax.f32 %v702_v58, 0.0 }
 0x1e7   : > { %v5830_v1 = vmax.f32 %v704_v54, 0.0  ;;  %750 = vrot.lane.b32.xlu1 %v5828_v53, %s5381_s9 }
 0x1e8   : > { %v5854_v61 = vmax.f32 %v706_v59, 0.0 }
 0x1e9   : > { %752 = vrot.lane.b32.xlu0 %v5830_v1, %s5381_s9 }
 0x1ea   : > { %v709_v3 = vpop.f32.mrb[4].mxu0 }
 0x1eb   : > { %v711_v5 = vpop.f32.mrb[5].mxu0  ;;  %802 = vrot.lane.b32.xlu1 %v5828_v53, %s5382_s30  ;;  %v710_v63 = vadd.f32 %v709_v3, %v633_v62 }
 0x1ec   : > { %v713_v56 = vpop.f32.mrb[6].mxu0  ;;  %v712_v18 = vadd.f32 %v711_v5, %v633_v62 }
 0x1ed   : > { %v715_v57 = vpop.f32.mrb[7].mxu0  ;;  %804 = vrot.lane.b32.xlu0 %v5830_v1, %s5382_s30  ;;  %v714_v12 = vadd.f32 %v713_v56, %v638_v6  ;;  %v5870_v13 = vmax.f32 %v710_v63, 0.0 }
 0x1ee   : > { %v716_v19 = vadd.f32 %v715_v57, %v638_v6  ;;  %v5890_v20 = vmax.f32 %v712_v18, 0.0 }
 0x1ef   : > { %854 = vrot.lane.b32.xlu1 %v5828_v53, %s5383_s16  ;;  %v5874_v17 = vmax.f32 %v714_v12, 0.0 }
 0x1f0   : > { %v5894_v21 = vmax.f32 %v716_v19, 0.0 }
 0x1f1   : > { %856 = vrot.lane.b32.xlu0 %v5830_v1, %s5383_s16 }
 0x1f3   : > { %906 = vrot.lane.b32.xlu1 %v5828_v53, %s5384_s14 }
 0x1f5   : > { %908 = vrot.lane.b32.xlu0 %v5830_v1, %s5384_s14 }
 0x1f7   : > { %966 = vrot.lane.b32.xlu1 %v5828_v53, %s5385_s15 }
 0x1f9   : > { %968 = vrot.lane.b32.xlu0 %v5830_v1, %s5385_s15 }
 0x1fb   : > { %758 = vrot.lane.b32.xlu1 %v5850_v60, %s5381_s9 }
 0x1fd   : > { %760 = vrot.lane.b32.xlu0 %v5854_v61, %s5381_s9 }
 0x1ff   : > { %810 = vrot.lane.b32.xlu1 %v5850_v60, %s5382_s30 }
 0x201   : > { %812 = vrot.lane.b32.xlu0 %v5854_v61, %s5382_s30 }
 0x203   : > { %862 = vrot.lane.b32.xlu1 %v5850_v60, %s5383_s16 }
 0x205   : > { %864 = vrot.lane.b32.xlu0 %v5854_v61, %s5383_s16 }
 0x207   : > { %914 = vrot.lane.b32.xlu1 %v5850_v60, %s5384_s14 }
 0x209   : > { %916 = vrot.lane.b32.xlu0 %v5854_v61, %s5384_s14 }
 0x20b   : > { %754 = vrot.lane.b32.xlu1 %v5870_v13, %s5381_s9 }
 0x20d   : > { %756 = vrot.lane.b32.xlu0 %v5874_v17, %s5381_s9 }
 0x20f   : > { %806 = vrot.lane.b32.xlu1 %v5870_v13, %s5382_s30 }
 0x211   : > { %808 = vrot.lane.b32.xlu0 %v5874_v17, %s5382_s30 }
 0x213   : > { %858 = vrot.lane.b32.xlu1 %v5870_v13, %s5383_s16 }
 0x215   : > { %860 = vrot.lane.b32.xlu0 %v5874_v17, %s5383_s16 }
 0x217   : > { %910 = vrot.lane.b32.xlu1 %v5870_v13, %s5384_s14 }
 0x219   : > { %912 = vrot.lane.b32.xlu0 %v5874_v17, %s5384_s14 }
 0x21b   : > { %762 = vrot.lane.b32.xlu1 %v5890_v20, %s5381_s9 }
 0x21d   : > { %764 = vrot.lane.b32.xlu0 %v5894_v21, %s5381_s9 }
 0x21f   : > { %974 = vrot.lane.b32.xlu1 %v5850_v60, %s5385_s15 }
 0x221   : > { %976 = vrot.lane.b32.xlu0 %v5854_v61, %s5385_s15 }
 0x223   : > { %814 = vrot.lane.b32.xlu1 %v5890_v20, %s5382_s30 }
 0x225   : > { %816 = vrot.lane.b32.xlu0 %v5894_v21, %s5382_s30 }
 0x227   : > { %866 = vrot.lane.b32.xlu1 %v5890_v20, %s5383_s16 }
 0x229   : > { %972 = vrot.lane.b32.xlu0 %v5874_v17, %s5385_s15 }
 0x22b   : > { %918 = vrot.lane.b32.xlu1 %v5890_v20, %s5384_s14 }
 0x22d   : > { %868 = vrot.lane.b32.xlu0 %v5894_v21, %s5383_s16 }
 0x22f   : > { %970 = vrot.lane.b32.xlu1 %v5870_v13, %s5385_s15 }
 0x231   : > { %1020 = vrot.lane.b32.xlu0 %v5830_v1, %s8466_s29 }
 0x233   : > { %978 = vrot.lane.b32.xlu1 %v5890_v20, %s5385_s15 }
 0x235   : > { %920 = vrot.lane.b32.xlu0 %v5894_v21, %s5384_s14 }
 0x237   : > { %1018 = vrot.lane.b32.xlu1 %v5828_v53, %s8466_s29 }
 0x239   : > { %1028 = vrot.lane.b32.xlu0 %v5854_v61, %s8466_s29 }
 0x23b   : > { %1026 = vrot.lane.b32.xlu1 %v5850_v60, %s8466_s29 }
 0x23d   : > { %1024 = vrot.lane.b32.xlu0 %v5874_v17, %s8466_s29 }
 0x23f   : > { %1022 = vrot.lane.b32.xlu1 %v5870_v13, %s8466_s29 }
 0x241   : > { %1072 = vrot.lane.b32.xlu0 %v5830_v1, %s8464_s17 }
 0x243   : > { %1030 = vrot.lane.b32.xlu1 %v5890_v20, %s8466_s29 }
 0x245   : > { %980 = vrot.lane.b32.xlu0 %v5894_v21, %s5385_s15 }
 0x247   : > { %1070 = vrot.lane.b32.xlu1 %v5828_v53, %s8464_s17 }
 0x249   : > { %1080 = vrot.lane.b32.xlu0 %v5854_v61, %s8464_s17 }
 0x24b   : > { %1078 = vrot.lane.b32.xlu1 %v5850_v60, %s8464_s17 }
 0x24d   : > { %1032 = vrot.lane.b32.xlu0 %v5894_v21, %s8466_s29 }
 0x24f   : > { %1074 = vrot.lane.b32.xlu1 %v5870_v13, %s8464_s17 }
 0x251   : > { %1076 = vrot.lane.b32.xlu0 %v5874_v17, %s8464_s17 }
 0x253   : > { %1082 = vrot.lane.b32.xlu1 %v5890_v20, %s8464_s17 }
 0x255   : > { %1084 = vrot.lane.b32.xlu0 %v5894_v21, %s8464_s17 }
 0x257   : > { %1122 = vrot.lane.b32.xlu1 %v5828_v53, %s8479_s23 }
 0x259   : > { %1124 = vrot.lane.b32.xlu0 %v5830_v1, %s8479_s23  ;;  %v751_v23 = vpop.permute.xlu1 %750 }
 0x25b   : > { %v753_v24 = vpop.permute.xlu0 %752  ;;  %1130 = vrot.lane.b32.xlu1 %v5850_v60, %s8479_s23 }
 0x25d   : > { %1132 = vrot.lane.b32.xlu0 %v5854_v61, %s8479_s23  ;;  %v5964_v25 = vpop.permute.xlu1 %802 }
 0x25f   : > { %v805_v26 = vpop.permute.xlu0 %804  ;;  %1126 = vrot.lane.b32.xlu1 %v5870_v13, %s8479_s23 }
 0x261   : > { %1128 = vrot.lane.b32.xlu0 %v5874_v17, %s8479_s23  ;;  %v5970_v27 = vpop.permute.xlu1 %854 }
 0x263   : > { %v5972_v28 = vpop.permute.xlu0 %856  ;;  %1134 = vrot.lane.b32.xlu1 %v5890_v20, %s8479_s23 }
 0x265   : > { %1136 = vrot.lane.b32.xlu0 %v5894_v21, %s8479_s23  ;;  %v5978_v29 = vpop.permute.xlu1 %906 }
 0x267   : > { %v5980_v30 = vpop.permute.xlu0 %908  ;;  %1216 = vperm.xlu1 %5173, %v5676_v8  }
 0x269   : > { %v5982_v31 = vpop.permute.xlu1 %966  ;;  %1221 = vperm.xlu0 %5174, %v5671_v7  }
 0x26b   : > { %v5987_v34 = vpop.permute.xlu0 %968  ;;  %1226 = vperm.xlu1 %5173, %v5685_v10  }
 0x26d   : > { %v759_v35 = vpop.permute.xlu1 %758 }
 0x26e   : > { %v770_v38 = vsel %vm331_vm1, %v759_v35, %v751_v23  ;;  %v766_v39 = vsel %vm331_vm1, %v751_v23, %v759_v35 }
 0x26f   : > { %v761_v40 = vpop.permute.xlu0 %760  ;;  %v787_v42 = vmul.f32 %v783_v36, %v766_v39  ;;  %v786_v44 = vmul.f32 %v779_v37, %v770_v38  ;;  %1231 = vperm.xlu1 %5173, %v5690_v11   ;;  %v4900_v11 = vld [vmem:[%s8457_s6 + $0x1] ss:$8 sm:$0x3] }
 0x270   : > { %v771_v41 = vsel %vm331_vm1, %v761_v40, %v753_v24  ;;  %v767_v7 = vsel %vm331_vm1, %v753_v24, %v761_v40  ;;  %v835_v58 = vrot.slane %v4900_v11, %v5698_v16  ;;  %v831_v63 = vrot.slane %v4900_v11, %v5696_v15 }
 0x271   : > { %v811_v8 = vpop.permute.xlu1 %810  ;;  %v789_v43 = vmul.f32 %v783_v36, %v767_v7  ;;  %v788_v45 = vmul.f32 %v779_v37, %v771_v41 }
 0x272   : > { %v818_v6 = vsel %vm364_vm2, %v5964_v25, %v811_v8  ;;  %v822_v39 = vsel %vm364_vm2, %v811_v8, %v5964_v25 }
 0x273   : > { %v813_v46 = vpop.permute.xlu0 %812  ;;  %v795_v47 = vpack.c.bf16 %v789_v43, %v787_v42  ;;  %v794_v48 = vpack.c.bf16 %v788_v45, %v786_v44  ;;  %v839_v40 = vmul.f32 %v835_v58, %v818_v6  ;;  %v838_v44 = vmul.f32 %v831_v63, %v822_v39 }
 0x274   : > { %v819_v56 = vsel %vm364_vm2, %v805_v26, %v813_v46  ;;  %v823_v18 = vsel %vm364_vm2, %v813_v46, %v805_v26  ;;  %v4901_v26 = vld [vmem:[%s8457_s6 + $0x2] ss:$8 sm:$0x3] }
 0x275   : > { %1271 = vmatprep.subr.bf16.mxu1 %v795_v47  ;;  %v863_v49 = vpop.permute.xlu1 %862  ;;  %v841_v19 = vmul.f32 %v835_v58, %v819_v56  ;;  %v840_v41 = vmul.f32 %v831_v63, %v823_v18  ;;  %v887_v25 = vrot.slane %v4901_v26, %v5698_v16  ;;  %v883_v47 = vrot.slane %v4901_v26, %v5696_v15 }
 0x276   : > { %1272 = vmatpush1.bf16.msra.mxu1 %v794_v48  ;;  %v870_v48 = vsel %vm398_vm3, %v5970_v27, %v863_v49 }
 0x277   : > { %v865_v10 = vpop.permute.xlu0 %864  ;;  %v847_v45 = vpack.c.bf16 %v841_v19, %v839_v40  ;;  %v874_v19 = vsel %vm398_vm3, %v863_v49, %v5970_v27 }
 0x278   : > { %v875_v11 = vsel %vm398_vm3, %v865_v10, %v5972_v28 }
 0x279   : > { %v6003_v0 = vpop.permute.xlu1 %914 }
 0x27a   : > { %v922_v39 = vsel %vm432_vm4, %v5978_v29, %v6003_v0 }
 0x27b   : > { %v6005_v2 = vpop.permute.xlu0 %916 }
 0x27c   : > { %v927_v26 = vsel %vm432_vm4, %v6005_v2, %v5980_v30 }
 0x27d   : > { %v755_v4 = vpop.permute.xlu1 %754 }
 0x27f   : > { %v757_v50 = vpop.permute.xlu0 %756 }
 0x281   : > { %v807_v51 = vpop.permute.xlu1 %806 }
 0x283   : > { %v809_v52 = vpop.permute.xlu0 %808 }
 0x285   : > { %v6007_v54 = vpop.permute.xlu1 %858 }
 0x287   : > { %v6009_v55 = vpop.permute.xlu0 %860 }
 0x289   : > { %v6011_v3 = vpop.permute.xlu1 %910 }
 0x28b   : > { %v6016_v5 = vpop.permute.xlu0 %912 }
 0x28d   : > { %v763_v57 = vpop.permute.xlu1 %762 }
 0x28e   : > { %v768_v59 = vsel %vm331_vm1, %v755_v4, %v763_v57  ;;  %v772_v62 = vsel %vm331_vm1, %v763_v57, %v755_v4 }
 0x28f   : > { %v765_v12 = vpop.permute.xlu0 %764  ;;  %v790_v24 = vmul.f32 %v779_v37, %v772_v62  ;;  %v791_v32 = vmul.f32 %v783_v36, %v768_v59 }
 0x290   : > { %v769_v22 = vsel %vm331_vm1, %v757_v50, %v765_v12  ;;  %v773_v23 = vsel %vm331_vm1, %v765_v12, %v757_v50  ;;  %v846_v50 = vpack.c.bf16 %v840_v41, %v838_v44 }
 0x291   : > { %v792_v33 = vmul.f32 %v779_v37, %v773_v23  ;;  %v793_v35 = vmul.f32 %v783_v36, %v769_v22  ;;  %v6035_v38 = vpop.permute.xlu1 %974  ;;  %v871_v36 = vsel %vm398_vm3, %v5972_v28, %v865_v10  ;;  %v891_v22 = vmul.f32 %v887_v25, %v870_v48  ;;  %v4902_v28 = vld [vmem:[%s8457_s6 + $0x3] ss:$8 sm:$0x3] }
 0x292   : > { %v893_v56 = vmul.f32 %v887_v25, %v871_v36  ;;  %v892_v23 = vmul.f32 %v883_v47, %v875_v11  ;;  %v939_v49 = vrot.slane %v4902_v28, %v5698_v16 }
 0x293   : > { %v6043_v7 = vpop.permute.xlu0 %976  ;;  %v797_v42 = vpack.c.bf16 %v793_v35, %v791_v32  ;;  %v796_v43 = vpack.c.bf16 %v792_v33, %v790_v24  ;;  %v890_v32 = vmul.f32 %v883_v47, %v874_v19 }
 0x294   : > { %v899_v27 = vpack.c.bf16 %v893_v56, %v891_v22 }
 0x295   : > { %1273 = vmatprep.subr.bf16.mxu1 %v797_v42  ;;  %v815_v37 = vpop.permute.xlu1 %814  ;;  %v898_v41 = vpack.c.bf16 %v892_v23, %v890_v32 }
 0x296   : > { %v820_v8 = vsel %vm364_vm2, %v807_v51, %v815_v37  ;;  %v824_v46 = vsel %vm364_vm2, %v815_v37, %v807_v51  ;;  %1274 = vmatpush1.bf16.msra.mxu1 %v796_v43 }
 0x297   : > { %v817_v4 = vpop.permute.xlu0 %816  ;;  %1275 = vmatprep.subr.bf16.mxu1 %v847_v45  ;;  %v842_v59 = vmul.f32 %v831_v63, %v824_v46  ;;  %v843_v62 = vmul.f32 %v835_v58, %v820_v8  ;;  %v935_v46 = vrot.slane %v4902_v28, %v5696_v15  ;;  %v4903_v28 = vld [vmem:[%s8457_s6 + $0x5] ss:$8 sm:$0x3] }
 0x298   : > { %v821_v57 = vsel %vm364_vm2, %v809_v52, %v817_v4  ;;  %v825_v51 = vsel %vm364_vm2, %v817_v4, %v809_v52  ;;  %v999_v32 = vrot.slane %v4903_v28, %v5698_v16 }
 0x299   : > { %v844_v6 = vmul.f32 %v831_v63, %v825_v51  ;;  %v845_v12 = vmul.f32 %v835_v58, %v821_v57  ;;  %v867_v18 = vpop.permute.xlu1 %866  ;;  %v923_v58 = vsel %vm432_vm4, %v5980_v30, %v6005_v2  ;;  %v926_v30 = vsel %vm432_vm4, %v6003_v0, %v5978_v29 }
 0x29a   : > { %1276 = vmatpush1.bf16.msra.mxu1 %v846_v50  ;;  %v872_v33 = vsel %vm398_vm3, %v6007_v54, %v867_v18  ;;  %v876_v35 = vsel %vm398_vm3, %v867_v18, %v6007_v54  ;;  %v945_v42 = vmul.f32 %v939_v49, %v923_v58  ;;  %v943_v2 = vmul.f32 %v939_v49, %v922_v39 }
 0x29b   : > { %v6070_v10 = vpop.permute.xlu0 %972  ;;  %v849_v24 = vpack.c.bf16 %v845_v12, %v843_v62  ;;  %v848_v52 = vpack.c.bf16 %v844_v6, %v842_v59  ;;  %v894_v44 = vmul.f32 %v883_v47, %v876_v35  ;;  %v895_v36 = vmul.f32 %v887_v25, %v872_v33 }
 0x29c   : > { %v944_v11 = vmul.f32 %v935_v46, %v927_v26  ;;  %v951_v56 = vpack.c.bf16 %v945_v42, %v943_v2  ;;  %v961_v35 = vpack.c.bf16 %v5894_v21, %v5890_v20  ;;  %v982_v39 = vsel %vm470_vm5, %v5982_v31, %v6035_v38 }
 0x29d   : > { %1277 = vmatprep.subr.bf16.mxu1 %v849_v24  ;;  %v919_v63 = vpop.permute.xlu1 %918  ;;  %v960_v20 = vpack.c.bf16 %v5874_v17, %v5870_v13 }
 0x29e   : > { %1278 = vmatpush1.bf16.msra.mxu1 %v848_v52  ;;  %v928_v57 = vsel %vm432_vm4, %v919_v63, %v6011_v3  ;;  %v959_v52 = vpack.c.bf16 %v5854_v61, %v5850_v60  ;;  %v983_v60 = vsel %vm470_vm5, %v5987_v34, %v6043_v7  ;;  %v958_v61 = vpack.c.bf16 %v5830_v1, %v5828_v53  ;;  %v4904_v1 = vld [vmem:[%s8457_s6 + $0x6] ss:$8 sm:$0x3] }
 0x29f   : > { %v869_v40 = vpop.permute.xlu0 %868  ;;  %1279 = vmatprep.subr.bf16.mxu1 %v899_v27  ;;  %v946_v62 = vmul.f32 %v935_v46, %v928_v57  ;;  %v995_v27 = vrot.slane %v4903_v28, %v5696_v15 }
 0x2a0   : > { %v873_v43 = vsel %vm398_vm3, %v6009_v55, %v869_v40  ;;  %v877_v54 = vsel %vm398_vm3, %v869_v40, %v6009_v55 }
 0x2a1   : > { %v896_v37 = vmul.f32 %v883_v47, %v877_v54  ;;  %v897_v45 = vmul.f32 %v887_v25, %v873_v43  ;;  %v971_v8 = vpop.permute.xlu1 %970  ;;  %v942_v47 = vmul.f32 %v935_v46, %v926_v30  ;;  %v924_v25 = vsel %vm432_vm4, %v6011_v3, %v919_v63 }
 0x2a2   : > { %1280 = vmatpush1.bf16.msra.mxu1 %v898_v41  ;;  %v947_v6 = vmul.f32 %v939_v49, %v924_v25  ;;  %v986_v63 = vsel %vm470_vm5, %v6035_v38, %v5982_v31  ;;  %v1004_v41 = vmul.f32 %v995_v27, %v983_v60  ;;  %v1002_v21 = vmul.f32 %v995_v27, %v982_v39 }
 0x2a3   : > { %v6102_v48 = vpop.permute.xlu0 %1020  ;;  %v901_v4 = vpack.c.bf16 %v897_v45, %v895_v36  ;;  %v900_v50 = vpack.c.bf16 %v896_v37, %v894_v44  ;;  %v950_v59 = vpack.c.bf16 %v944_v11, %v942_v47  ;;  %v1003_v40 = vmul.f32 %v999_v32, %v986_v63 }
 0x2a4   : > { %v1047_v43 = vrot.slane %v4904_v1, %v5696_v15  ;;  %v1051_v54 = vrot.slane %v4904_v1, %v5698_v16  ;;  %v1010_v36 = vpack.c.bf16 %v1004_v41, %v1002_v21 }
 0x2a5   : > { %1281 = vmatprep.subr.bf16.mxu1 %v901_v4  ;;  %v979_v55 = vpop.permute.xlu1 %978 }
 0x2a6   : > { %1282 = vmatpush1.bf16.msra.mxu1 %v900_v50  ;;  %v984_v53 = vsel %vm470_vm5, %v971_v8, %v979_v55  ;;  %v988_v31 = vsel %vm470_vm5, %v979_v55, %v971_v8 }
 0x2a7   : > { %v921_v29 = vpop.permute.xlu0 %920  ;;  %1283 = vmatprep.subr.bf16.mxu1 %v951_v56  ;;  %v1006_v42 = vmul.f32 %v995_v27, %v984_v53  ;;  %v1007_v8 = vmul.f32 %v999_v32, %v988_v31 }
 0x2a8   : > { %v925_v0 = vsel %vm432_vm4, %v6016_v5, %v921_v29  ;;  %v929_v51 = vsel %vm432_vm4, %v921_v29, %v6016_v5  ;;  %v987_v5 = vsel %vm470_vm5, %v6043_v7, %v5987_v34 }
 0x2a9   : > { %v948_v12 = vmul.f32 %v935_v46, %v929_v51  ;;  %v949_v18 = vmul.f32 %v939_v49, %v925_v0  ;;  %v1019_v19 = vpop.permute.xlu1 %1018  ;;  %v1005_v49 = vmul.f32 %v999_v32, %v987_v5 }
 0x2aa   : > { %1284 = vmatpush1.bf16.msra.mxu1 %v950_v59 }
 0x2ab   : > { %v1029_v22 = vpop.permute.xlu0 %1028  ;;  %v953_v3 = vpack.c.bf16 %v949_v18, %v947_v6  ;;  %v952_v23 = vpack.c.bf16 %v948_v12, %v946_v62  ;;  %v1011_v7 = vpack.c.bf16 %v1005_v49, %v1003_v40 }
 0x2ac   : > { %v1039_v13 = vsel %vm504_vm6, %v1029_v22, %v6102_v48  ;;  %v1035_v50 = vsel %vm504_vm6, %v6102_v48, %v1029_v22 }
 0x2ad   : > { %1285 = vmatprep.subr.bf16.mxu1 %v953_v3  ;;  %v1027_v24 = vpop.permute.xlu1 %1026  ;;  %v1057_v11 = vmul.f32 %v1051_v54, %v1039_v13  ;;  %v1056_v29 = vmul.f32 %v1047_v43, %v1035_v50 }
 0x2ae   : > { %1286 = vmatpush1.bf16.msra.mxu1 %v952_v23  ;;  %v1038_v38 = vsel %vm504_vm6, %v1027_v24, %v1019_v19  ;;  %v1034_v17 = vsel %vm504_vm6, %v1019_v19, %v1027_v24 }
 0x2af   : > { %v6126_v58 = vpop.permute.xlu0 %1024  ;;  %1287 = vmatprep.subr.bf16.mxu1 %v959_v52  ;;  %v1055_v46 = vmul.f32 %v1051_v54, %v1038_v38  ;;  %v1054_v55 = vmul.f32 %v1047_v43, %v1034_v17 }
 0x2b1   : > { %v1023_v33 = vpop.permute.xlu1 %1022  ;;  %v1063_v48 = vpack.c.bf16 %v1057_v11, %v1055_v46  ;;  %v1062_v18 = vpack.c.bf16 %v1056_v29, %v1054_v55 }
 0x2b2   : > { %1288 = vmatpush1.bf16.msra.mxu1 %v958_v61 }
 0x2b3   : > { %v1073_v26 = vpop.permute.xlu0 %1072  ;;  %1289 = vmatprep.subr.bf16.mxu1 %v961_v35 }
 0x2b5   : > { %v1031_v34 = vpop.permute.xlu1 %1030 }
 0x2b6   : > { %1290 = vmatpush1.bf16.msra.mxu1 %v960_v20  ;;  %v1036_v57 = vsel %vm504_vm6, %v1023_v33, %v1031_v34  ;;  %v1040_v0 = vsel %vm504_vm6, %v1031_v34, %v1023_v33 }
 0x2b7   : > { %v981_v44 = vpop.permute.xlu0 %980  ;;  %1291 = vmatprep.subr.bf16.mxu1 %v1011_v7  ;;  %v1058_v62 = vmul.f32 %v1047_v43, %v1036_v57  ;;  %v1059_v19 = vmul.f32 %v1051_v54, %v1040_v0 }
 0x2b8   : > { %v985_v37 = vsel %vm470_vm5, %v6070_v10, %v981_v44  ;;  %v989_v45 = vsel %vm470_vm5, %v981_v44, %v6070_v10  ;;  %v4905_v10 = vld [vmem:[%s8457_s6 + $0x7] ss:$8 sm:$0x3] }
 0x2b9   : > { %v1008_v30 = vmul.f32 %v995_v27, %v985_v37  ;;  %v1009_v2 = vmul.f32 %v999_v32, %v989_v45  ;;  %v1071_v4 = vpop.permute.xlu1 %1070  ;;  %v1103_v6 = vrot.slane %v4905_v10, %v5698_v16  ;;  %v1099_v63 = vrot.slane %v4905_v10, %v5696_v15  ;;  %v5193_v45 = vld [vmem:[#allocation8] ss:$12 sps:$4 sm:$0xff]  }
 0x2ba   : > { %1292 = vmatpush1.bf16.msra.mxu1 %v1010_v36 }
 0x2bb   : > { %v1081_v56 = vpop.permute.xlu0 %1080  ;;  %v1013_v47 = vpack.c.bf16 %v1009_v2, %v1007_v8  ;;  %v1012_v25 = vpack.c.bf16 %v1008_v30, %v1006_v42  ;;  %v5196_v30 = vld [vmem:[#allocation8 + $0x1c] ss:$12 sps:$4 sm:$0xff]  }
 0x2bc   : > { %v1091_v22 = vsel %vm538_vm7, %v1081_v56, %v1073_v26  ;;  %v1087_v60 = vsel %vm538_vm7, %v1073_v26, %v1081_v56 }
 0x2bd   : > { %v1079_v51 = vpop.permute.xlu1 %1078  ;;  %1293 = vmatprep.subr.bf16.mxu1 %v1013_v47  ;;  %v1109_v61 = vmul.f32 %v1103_v6, %v1091_v22  ;;  %v1108_v40 = vmul.f32 %v1099_v63, %v1087_v60 }
 0x2be   : > { %v1090_v59 = vsel %vm538_vm7, %v1079_v51, %v1071_v4  ;;  %1294 = vmatpush1.bf16.msra.mxu1 %v1012_v25  ;;  %v1086_v28 = vsel %vm538_vm7, %v1071_v4, %v1079_v51  ;;  %v5198_v51 = vld [vmem:[#allocation8 + $0x18] ss:$12 sps:$4 sm:$0xff]  }
 0x2bf   : > { %v1033_v12 = vpop.permute.xlu0 %1032  ;;  %1295 = vmatprep.subr.bf16.mxu1 %v1063_v48  ;;  %v1107_v24 = vmul.f32 %v1103_v6, %v1090_v59  ;;  %v1106_v35 = vmul.f32 %v1099_v63, %v1086_v28 }
 0x2c0   : > { %v1037_v3 = vsel %vm504_vm6, %v6126_v58, %v1033_v12  ;;  %v1041_v23 = vsel %vm504_vm6, %v1033_v12, %v6126_v58 }
 0x2c1   : > { %v1060_v52 = vmul.f32 %v1047_v43, %v1037_v3  ;;  %v1061_v5 = vmul.f32 %v1051_v54, %v1041_v23  ;;  %v1075_v32 = vpop.permute.xlu1 %1074  ;;  %v1115_v58 = vpack.c.bf16 %v1109_v61, %v1107_v24  ;;  %v1114_v21 = vpack.c.bf16 %v1108_v40, %v1106_v35  ;;  %v4906_v43 = vld [vmem:[%s8457_s6 + $0x10] ss:$8 sm:$0x3]  ;;  %v5199_v24 = vld [vmem:[#allocation8 + $0x8] ss:$12 sps:$4 sm:$0xff]  }
 0x2c2   : > { %1296 = vmatpush1.bf16.msra.mxu1 %v1062_v18  ;;  %v1151_v13 = vrot.slane %v4906_v43, %v5696_v15  ;;  %v1155_v17 = vrot.slane %v4906_v43, %v5698_v16 }
 0x2c3   : > { %v1077_v27 = vpop.permute.xlu0 %1076  ;;  %v1065_v49 = vpack.c.bf16 %v1061_v5, %v1059_v19  ;;  %v1064_v33 = vpack.c.bf16 %v1060_v52, %v1058_v62  ;;  %v5200_v52 = vld [vmem:[#allocation8 + $0x20] ss:$12 sps:$4 sm:$0xff]  }
 0x2c5   : > { %v1083_v39 = vpop.permute.xlu1 %1082  ;;  %1297 = vmatprep.subr.bf16.mxu1 %v1065_v49 }
 0x2c6   : > { %v1088_v41 = vsel %vm538_vm7, %v1075_v32, %v1083_v39  ;;  %v1092_v53 = vsel %vm538_vm7, %v1083_v39, %v1075_v32  ;;  %1298 = vmatpush1.bf16.msra.mxu1 %v1064_v33 }
 0x2c7   : > { %v1085_v1 = vpop.permute.xlu0 %1084  ;;  %1299 = vmatprep.subr.bf16.mxu1 %v1115_v58  ;;  %v1110_v34 = vmul.f32 %v1099_v63, %v1088_v41  ;;  %v1111_v7 = vmul.f32 %v1103_v6, %v1092_v53 }
 0x2c8   : > { %v1089_v26 = vsel %vm538_vm7, %v1077_v27, %v1085_v1  ;;  %v1093_v20 = vsel %vm538_vm7, %v1085_v1, %v1077_v27 }
 0x2c9   : > { %v1112_v31 = vmul.f32 %v1099_v63, %v1089_v26  ;;  %v1113_v38 = vmul.f32 %v1103_v6, %v1093_v20  ;;  %v1123_v42 = vpop.permute.xlu1 %1122 }
 0x2ca   : > { %1300 = vmatpush1.bf16.msra.mxu1 %v1114_v21 }
 0x2cb   : > { %v1125_v54 = vpop.permute.xlu0 %1124  ;;  %v1117_v44 = vpack.c.bf16 %v1113_v38, %v1111_v7  ;;  %v1116_v36 = vpack.c.bf16 %v1112_v31, %v1110_v34 }
 0x2cd   : > { %v1131_v37 = vpop.permute.xlu1 %1130  ;;  %1301 = vmatprep.subr.bf16.mxu1 %v1117_v44 }
 0x2ce   : > { %v1138_v8 = vsel %vm572_vm8, %v1123_v42, %v1131_v37  ;;  %v1142_v46 = vsel %vm572_vm8, %v1131_v37, %v1123_v42  ;;  %1302 = vmatpush1.bf16.msra.mxu1 %v1116_v36  ;;  %v5203_v37 = vld [vmem:[#allocation8 + $0x34] ss:$12 sps:$4 sm:$0xff]  }
 0x2cf   : > { %v1133_v2 = vpop.permute.xlu0 %1132  ;;  %v1158_v11 = vmul.f32 %v1151_v13, %v1138_v8  ;;  %v1159_v55 = vmul.f32 %v1155_v17, %v1142_v46  ;;  %1962 = vmatprep.mubr.bf16.mxu0 %v5203_v37 }
 0x2d0   : > { %v1139_v4 = vsel %vm572_vm8, %v1125_v54, %v1133_v2  ;;  %v1143_v50 = vsel %vm572_vm8, %v1133_v2, %v1125_v54 }
 0x2d1   : > { %v1160_v56 = vmul.f32 %v1151_v13, %v1139_v4  ;;  %v1161_v47 = vmul.f32 %v1155_v17, %v1143_v50  ;;  %v1127_v25 = vpop.permute.xlu1 %1126  ;;  %1304 = vmatmul.mubr.bf16.vlgmr.msra.gmra.mrb[0].mxu1 %v5193_v45 }
 0x2d2   : > { %1313 = vmatprep.mubr.bf16.mxu1 %v5196_v30 }
 0x2d3   : > { %v1166_v57 = vpack.c.bf16 %v1160_v56, %v1158_v11  ;;  %v1129_v10 = vpop.permute.xlu0 %1128  ;;  %v1167_v29 = vpack.c.bf16 %v1161_v47, %v1159_v55  ;;  %v6390_v55 = vld [vmem:[%s8455_s4 + $0x8] sm:$0xff]  ;;  %v6395_v56 = vld [vmem:[%s8455_s4] sm:$0xff]  ;;  %v5391_v47 = vmov 2  }
 0x2d4   : > { %5175 = vset.pattern.permute.xlu0 %v5391_v47  ;;  %5176 = vset.pattern.permute.xlu1 %v5391_v47 }
 0x2d5   : > { %v1135_v0 = vpop.permute.xlu1 %1134  ;;  %1324 = vmatprep.subr.bf16.mxu1 %v1167_v29 }
 0x2d6   : > { %v1140_v48 = vsel %vm572_vm8, %v1127_v25, %v1135_v0  ;;  %v1144_v59 = vsel %vm572_vm8, %v1135_v0, %v1127_v25  ;;  %1325 = vmatpush1.bf16.msra.mxu1 %v1166_v57  ;;  %v6404_v57 = vld [vmem:[%s8455_s4 + $0x10] sm:$0xff]  ;;  %v1434_v0 = vld [vmem:[%s8457_s6] ss:$8 sm:$0x3] }
 0x2d7   : > { %v1137_v62 = vpop.permute.xlu0 %1136  ;;  %v1162_v18 = vmul.f32 %v1151_v13, %v1140_v48  ;;  %v1163_v19 = vmul.f32 %v1155_v17, %v1144_v59  ;;  %v1439_v48 = vrot.slane %v1434_v0, %v5696_v15  ;;  %v1443_v59 = vrot.slane %v1434_v0, %v5698_v16 }
 0x2d8   : > { %v1141_v6 = vsel %vm572_vm8, %v1129_v10, %v1137_v62  ;;  %v1145_v12 = vsel %vm572_vm8, %v1137_v62, %v1129_v10  ;;  %v6409_v10 = vld [vmem:[%s8455_s4 + $0x18] sm:$0xff] }
 0x2d9   : > { %v1164_v22 = vmul.f32 %v1151_v13, %v1141_v6  ;;  %v1165_v3 = vmul.f32 %v1155_v17, %v1145_v12  ;;  %1314 = vmatmul.mubr.bf16.gmra.mrb[4].mxu1 %v5198_v51 }
 0x2da   : > { %1356 = vmatprep.mubr.bf16.mxu1 %v5389_v9 }
 0x2db   : > { %v1168_v23 = vpack.c.bf16 %v1164_v22, %v1162_v18  ;;  %v1169_v28 = vpack.c.bf16 %v1165_v3, %v1163_v19 }
 0x2dd   : > { %1326 = vmatprep.subr.bf16.mxu1 %v1169_v28 }
 0x2de   : > { %1327 = vmatpush1.bf16.msra.mxu1 %v1168_v23 }
 0x2e1   : > { %4913 = vmatmul.mubr.msk.bf16.vlgmr.msra.gmra.mrb[0].mxu1 %vm1264_vm9, %v5199_v24 }
 0x2e2   : > { %1366 = vmatprep.mubr.bf16.mxu1 %v5389_v9 }
 0x2e6   : > { %v1217_v5 = vpop.permute.xlu1 %1216 }
 0x2e8   : > { %v1222_v63 = vpop.permute.xlu0 %1221 }
 0x2e9   : > { %4914 = vmatmul.mubr.msk.bf16.gmra.mrb[4].mxu1 %vm1264_vm9, %v5200_v52 }
 0x2ea   : > { %2015 = vmatprep.mubr.bf16.mxu1 %v5389_v9  ;;  %v1227_v34 = vpop.permute.xlu1 %1226 }
 0x2ee   : > { %v1232_v31 = vpop.permute.xlu1 %1231 }
 0x3b4   : > { %v1358_v32 = vpop.f32.mrb[0].mxu1 }
 0x3b5   : > { %v4999_v60 = vadd.f32 %v1358_v32, %v1217_v5  ;;  %v1360_v61 = vpop.f32.mrb[1].mxu1 }
 0x3b6   : > { %v1362_v27 = vpop.f32.mrb[2].mxu1  ;;  %v5000_v1 = vadd.f32 %v1360_v61, %v1217_v5 }
 0x3b7   : > { %v6229_v49 = vmax.f32 %v4999_v60, 0.0  ;;  %v5001_v33 = vadd.f32 %v1362_v27, %v1222_v63  ;;  %v1364_v35 = vpop.f32.mrb[3].mxu1 }
 0x3b8   : > { %v5002_v26 = vadd.f32 %v1364_v35, %v1222_v63  ;;  %v6255_v20 = vmax.f32 %v5000_v1, 0.0 }
 0x3b9   : > { %v6231_v39 = vmax.f32 %v5001_v33, 0.0  ;;  %1410 = vrot.lane.b32.xlu0 %v6229_v49, %s5381_s9 }
 0x3ba   : > { %v6259_v21 = vmax.f32 %v5002_v26, 0.0 }
 0x3bb   : > { %1412 = vrot.lane.b32.xlu1 %v6231_v39, %s5381_s9 }
 0x3bc   : > { %v1368_v58 = vpop.f32.mrb[4].mxu1 }
 0x3bd   : > { %v1370_v40 = vpop.f32.mrb[5].mxu1  ;;  %1462 = vrot.lane.b32.xlu0 %v6229_v49, %s5382_s30  ;;  %v5003_v7 = vadd.f32 %v1368_v58, %v1227_v34 }
 0x3be   : > { %v1372_v41 = vpop.f32.mrb[6].mxu1  ;;  %v5004_v54 = vadd.f32 %v1370_v40, %v1227_v34 }
 0x3bf   : > { %v1374_v53 = vpop.f32.mrb[7].mxu1  ;;  %1464 = vrot.lane.b32.xlu1 %v6231_v39, %s5382_s30  ;;  %v5005_v38 = vadd.f32 %v1372_v41, %v1232_v31  ;;  %v6279_v42 = vmax.f32 %v5003_v7, 0.0 }
 0x3c0   : > { %v5006_v44 = vadd.f32 %v1374_v53, %v1232_v31  ;;  %v6303_v36 = vmax.f32 %v5004_v54, 0.0  ;;  %v4915_v54 = vld [vmem:[%s8457_s6 + $0x1] ss:$8 sm:$0x3] }
 0x3c1   : > { %1514 = vrot.lane.b32.xlu0 %v6229_v49, %s5383_s16  ;;  %v6283_v43 = vmax.f32 %v5005_v38, 0.0 }
 0x3c2   : > { %v6307_v13 = vmax.f32 %v5006_v44, 0.0 }
 0x3c3   : > { %1516 = vrot.lane.b32.xlu1 %v6231_v39, %s5383_s16 }
 0x3c5   : > { %1566 = vrot.lane.b32.xlu0 %v6229_v49, %s5384_s14 }
 0x3c7   : > { %1568 = vrot.lane.b32.xlu1 %v6231_v39, %s5384_s14 }
 0x3c9   : > { %1626 = vrot.lane.b32.xlu0 %v6229_v49, %s5385_s15 }
 0x3cb   : > { %1628 = vrot.lane.b32.xlu1 %v6231_v39, %s5385_s15 }
 0x3cd   : > { %1678 = vrot.lane.b32.xlu0 %v6229_v49, %s8466_s29 }
 0x3cf   : > { %1680 = vrot.lane.b32.xlu1 %v6231_v39, %s8466_s29 }
 0x3d1   : > { %1418 = vrot.lane.b32.xlu0 %v6255_v20, %s5381_s9 }
 0x3d3   : > { %1420 = vrot.lane.b32.xlu1 %v6259_v21, %s5381_s9 }
 0x3d5   : > { %1470 = vrot.lane.b32.xlu0 %v6255_v20, %s5382_s30 }
 0x3d7   : > { %1472 = vrot.lane.b32.xlu1 %v6259_v21, %s5382_s30 }
 0x3d9   : > { %1522 = vrot.lane.b32.xlu0 %v6255_v20, %s5383_s16 }
 0x3db   : > { %1524 = vrot.lane.b32.xlu1 %v6259_v21, %s5383_s16 }
 0x3dd   : > { %1574 = vrot.lane.b32.xlu0 %v6255_v20, %s5384_s14 }
 0x3df   : > { %1576 = vrot.lane.b32.xlu1 %v6259_v21, %s5384_s14 }
 0x3e1   : > { %1634 = vrot.lane.b32.xlu0 %v6255_v20, %s5385_s15 }
 0x3e3   : > { %1636 = vrot.lane.b32.xlu1 %v6259_v21, %s5385_s15 }
 0x3e5   : > { %1414 = vrot.lane.b32.xlu0 %v6279_v42, %s5381_s9 }
 0x3e7   : > { %1416 = vrot.lane.b32.xlu1 %v6283_v43, %s5381_s9 }
 0x3e9   : > { %1466 = vrot.lane.b32.xlu0 %v6279_v42, %s5382_s30 }
 0x3eb   : > { %1468 = vrot.lane.b32.xlu1 %v6283_v43, %s5382_s30 }
 0x3ed   : > { %1518 = vrot.lane.b32.xlu0 %v6279_v42, %s5383_s16 }
 0x3ef   : > { %1520 = vrot.lane.b32.xlu1 %v6283_v43, %s5383_s16 }
 0x3f1   : > { %1570 = vrot.lane.b32.xlu0 %v6279_v42, %s5384_s14 }
 0x3f3   : > { %1572 = vrot.lane.b32.xlu1 %v6283_v43, %s5384_s14 }
 0x3f5   : > { %1630 = vrot.lane.b32.xlu0 %v6279_v42, %s5385_s15 }
 0x3f7   : > { %1632 = vrot.lane.b32.xlu1 %v6283_v43, %s5385_s15 }
 0x3f9   : > { %1422 = vrot.lane.b32.xlu0 %v6303_v36, %s5381_s9 }
 0x3fb   : > { %1424 = vrot.lane.b32.xlu1 %v6307_v13, %s5381_s9 }
 0x3fd   : > { %1686 = vrot.lane.b32.xlu0 %v6255_v20, %s8466_s29 }
 0x3ff   : > { %1688 = vrot.lane.b32.xlu1 %v6259_v21, %s8466_s29 }
 0x401   : > { %1474 = vrot.lane.b32.xlu0 %v6303_v36, %s5382_s30 }
 0x403   : > { %1476 = vrot.lane.b32.xlu1 %v6307_v13, %s5382_s30 }
 0x405   : > { %1526 = vrot.lane.b32.xlu0 %v6303_v36, %s5383_s16 }
 0x407   : > { %1684 = vrot.lane.b32.xlu1 %v6283_v43, %s8466_s29 }
 0x409   : > { %1578 = vrot.lane.b32.xlu0 %v6303_v36, %s5384_s14 }
 0x40b   : > { %1528 = vrot.lane.b32.xlu1 %v6307_v13, %s5383_s16 }
 0x40d   : > { %1638 = vrot.lane.b32.xlu0 %v6303_v36, %s5385_s15 }
 0x40f   : > { %1732 = vrot.lane.b32.xlu1 %v6231_v39, %s8464_s17 }
 0x411   : > { %1682 = vrot.lane.b32.xlu0 %v6279_v42, %s8466_s29 }
 0x413   : > { %1580 = vrot.lane.b32.xlu1 %v6307_v13, %s5384_s14 }
 0x415   : > { %1690 = vrot.lane.b32.xlu0 %v6303_v36, %s8466_s29 }
 0x417   : > { %1740 = vrot.lane.b32.xlu1 %v6259_v21, %s8464_s17 }
 0x419   : > { %1730 = vrot.lane.b32.xlu0 %v6229_v49, %s8464_s17 }
 0x41b   : > { %1784 = vrot.lane.b32.xlu1 %v6231_v39, %s8479_s23 }
 0x41d   : > { %1738 = vrot.lane.b32.xlu0 %v6255_v20, %s8464_s17 }
 0x41f   : > { %1792 = vrot.lane.b32.xlu1 %v6259_v21, %s8479_s23 }
 0x421   : > { %1782 = vrot.lane.b32.xlu0 %v6229_v49, %s8479_s23 }
 0x423   : > { %1640 = vrot.lane.b32.xlu1 %v6307_v13, %s5385_s15 }
 0x425   : > { %1790 = vrot.lane.b32.xlu0 %v6255_v20, %s8479_s23 }
 0x427   : > { %1736 = vrot.lane.b32.xlu1 %v6283_v43, %s8464_s17 }
 0x429   : > { %1734 = vrot.lane.b32.xlu0 %v6279_v42, %s8464_s17 }
 0x42b   : > { %1692 = vrot.lane.b32.xlu1 %v6307_v13, %s8466_s29  ;;  %v1411_v17 = vpop.permute.xlu0 %1410 }
 0x42d   : > { %v1413_v45 = vpop.permute.xlu1 %1412  ;;  %1742 = vrot.lane.b32.xlu0 %v6303_v36, %s8464_s17 }
 0x42f   : > { %1788 = vrot.lane.b32.xlu1 %v6283_v43, %s8479_s23  ;;  %v6365_v8 = vpop.permute.xlu0 %1462 }
 0x431   : > { %v6367_v46 = vpop.permute.xlu1 %1464  ;;  %1786 = vrot.lane.b32.xlu0 %v6279_v42, %s8479_s23 }
 0x433   : > { %1744 = vrot.lane.b32.xlu1 %v6307_v13, %s8464_s17  ;;  %v6373_v30 = vpop.permute.xlu0 %1514 }
 0x435   : > { %v6375_v2 = vpop.permute.xlu1 %1516  ;;  %1794 = vrot.lane.b32.xlu0 %v6303_v36, %s8479_s23 }
 0x437   : > { %1796 = vrot.lane.b32.xlu1 %v6307_v13, %s8479_s23  ;;  %v6381_v4 = vpop.permute.xlu0 %1566 }
 0x439   : > { %v6383_v50 = vpop.permute.xlu1 %1568  ;;  %1876 = vperm.xlu0 %5175, %v6395_v56  }
 0x43b   : > { %v6385_v11 = vpop.permute.xlu0 %1626  ;;  %1881 = vperm.xlu1 %5176, %v6390_v55  }
 0x43d   : > { %v6397_v25 = vpop.permute.xlu1 %1628  ;;  %1891 = vperm.xlu0 %5175, %v6409_v10  }
 0x43f   : > { %v6411_v29 = vpop.permute.xlu0 %1678  ;;  %1886 = vperm.xlu1 %5176, %v6404_v57  }
 0x441   : > { %v6416_v51 = vpop.permute.xlu1 %1680 }
 0x443   : > { %v1419_v62 = vpop.permute.xlu0 %1418 }
 0x444   : > { %v1426_v6 = vsel %vm331_vm1, %v1411_v17, %v1419_v62  ;;  %v1430_v12 = vsel %vm331_vm1, %v1419_v62, %v1411_v17  ;;  %v1491_v62 = vrot.slane %v4915_v54, %v5696_v15 }
 0x445   : > { %v1421_v18 = vpop.permute.xlu1 %1420  ;;  %v1446_v3 = vmul.f32 %v1439_v48, %v1430_v12  ;;  %v1447_v23 = vmul.f32 %v1443_v59, %v1426_v6 }
 0x446   : > { %v1427_v19 = vsel %vm331_vm1, %v1413_v45, %v1421_v18  ;;  %v1431_v22 = vsel %vm331_vm1, %v1421_v18, %v1413_v45  ;;  %v1495_v45 = vrot.slane %v4915_v54, %v5698_v16 }
 0x447   : > { %v1448_v28 = vmul.f32 %v1439_v48, %v1431_v22  ;;  %v1449_v24 = vmul.f32 %v1443_v59, %v1427_v19  ;;  %v1471_v52 = vpop.permute.xlu0 %1470 }
 0x448   : > { %v1478_v6 = vsel %vm364_vm2, %v6365_v8, %v1471_v52 }
 0x449   : > { %v1454_v5 = vpack.c.bf16 %v1448_v28, %v1446_v3  ;;  %v1473_v32 = vpop.permute.xlu1 %1472  ;;  %v1455_v63 = vpack.c.bf16 %v1449_v24, %v1447_v23  ;;  %v1499_v54 = vmul.f32 %v1495_v45, %v1478_v6 }
 0x44a   : > { %v1479_v17 = vsel %vm364_vm2, %v6367_v46, %v1473_v32  ;;  %v1483_v18 = vsel %vm364_vm2, %v1473_v32, %v6367_v46  ;;  %v4916_v46 = vld [vmem:[%s8457_s6 + $0x2] ss:$8 sm:$0x3] }
 0x44b   : > { %1930 = vmatprep.subr.bf16.mxu0 %v1455_v63  ;;  %v6430_v60 = vpop.permute.xlu0 %1522  ;;  %v1501_v19 = vmul.f32 %v1495_v45, %v1479_v17 }
 0x44c   : > { %1931 = vmatpush1.bf16.msra.mxu0 %v1454_v5 }
 0x44d   : > { %v1525_v61 = vpop.permute.xlu1 %1524 }
 0x44f   : > { %v6432_v27 = vpop.permute.xlu0 %1574 }
 0x451   : > { %v6434_v33 = vpop.permute.xlu1 %1576 }
 0x453   : > { %v6436_v35 = vpop.permute.xlu0 %1634 }
 0x455   : > { %v6438_v58 = vpop.permute.xlu1 %1636 }
 0x457   : > { %v1415_v40 = vpop.permute.xlu0 %1414 }
 0x459   : > { %v1417_v41 = vpop.permute.xlu1 %1416 }
 0x45b   : > { %v1467_v53 = vpop.permute.xlu0 %1466 }
 0x45d   : > { %v1469_v1 = vpop.permute.xlu1 %1468 }
 0x45f   : > { %v6440_v26 = vpop.permute.xlu0 %1518 }
 0x461   : > { %v6442_v34 = vpop.permute.xlu1 %1520 }
 0x463   : > { %v6444_v7 = vpop.permute.xlu0 %1570 }
 0x465   : > { %v6446_v31 = vpop.permute.xlu1 %1572 }
 0x467   : > { %v6448_v38 = vpop.permute.xlu0 %1630 }
 0x469   : > { %v6453_v44 = vpop.permute.xlu1 %1632 }
 0x46b   : > { %v1423_v37 = vpop.permute.xlu0 %1422 }
 0x46c   : > { %v1428_v47 = vsel %vm331_vm1, %v1415_v40, %v1423_v37  ;;  %v1432_v0 = vsel %vm331_vm1, %v1423_v37, %v1415_v40  ;;  %v1482_v40 = vsel %vm364_vm2, %v1471_v52, %v6365_v8  ;;  %v1500_v37 = vmul.f32 %v1491_v62, %v1483_v18 }
 0x46d   : > { %v1425_v12 = vpop.permute.xlu1 %1424  ;;  %v1450_v23 = vmul.f32 %v1439_v48, %v1432_v0  ;;  %v1451_v28 = vmul.f32 %v1443_v59, %v1428_v47  ;;  %v1498_v0 = vmul.f32 %v1491_v62, %v1482_v40  ;;  %v1507_v47 = vpack.c.bf16 %v1501_v19, %v1499_v54 }
 0x46e   : > { %v1429_v22 = vsel %vm331_vm1, %v1417_v41, %v1425_v12  ;;  %v1433_v3 = vsel %vm331_vm1, %v1425_v12, %v1417_v41  ;;  %v1547_v8 = vrot.slane %v4916_v46, %v5698_v16  ;;  %v1543_v18 = vrot.slane %v4916_v46, %v5696_v15 }
 0x46f   : > { %v1452_v24 = vmul.f32 %v1439_v48, %v1433_v3  ;;  %v1453_v5 = vmul.f32 %v1443_v59, %v1429_v22  ;;  %v6474_v63 = vpop.permute.xlu0 %1686  ;;  %v1531_v48 = vsel %vm398_vm3, %v6375_v2, %v1525_v61  ;;  %v1506_v12 = vpack.c.bf16 %v1500_v37, %v1498_v0 }
 0x470   : > { %v1530_v22 = vsel %vm398_vm3, %v6373_v30, %v6430_v60  ;;  %v1535_v19 = vsel %vm398_vm3, %v1525_v61, %v6375_v2  ;;  %v1534_v46 = vsel %vm398_vm3, %v6430_v60, %v6373_v30  ;;  %v4917_v61 = vld [vmem:[%s8457_s6 + $0x3] ss:$8 sm:$0x3] }
 0x471   : > { %v1456_v32 = vpack.c.bf16 %v1452_v24, %v1450_v23  ;;  %v6482_v17 = vpop.permute.xlu1 %1688  ;;  %v1457_v41 = vpack.c.bf16 %v1453_v5, %v1451_v28  ;;  %v1553_v23 = vmul.f32 %v1547_v8, %v1531_v48  ;;  %v1552_v2 = vmul.f32 %v1543_v18, %v1535_v19 }
 0x472   : > { %v1550_v48 = vmul.f32 %v1543_v18, %v1534_v46  ;;  %v1599_v60 = vrot.slane %v4917_v61, %v5698_v16 }
 0x473   : > { %1932 = vmatprep.subr.bf16.mxu0 %v1457_v41  ;;  %v1475_v59 = vpop.permute.xlu0 %1474 }
 0x474   : > { %v1480_v52 = vsel %vm364_vm2, %v1467_v53, %v1475_v59  ;;  %v1484_v6 = vsel %vm364_vm2, %v1475_v59, %v1467_v53  ;;  %1933 = vmatpush1.bf16.msra.mxu0 %v1456_v32  ;;  %v1551_v32 = vmul.f32 %v1547_v8, %v1530_v22  ;;  %v1587_v22 = vsel %vm432_vm4, %v6434_v33, %v6383_v50 }
 0x475   : > { %v1477_v3 = vpop.permute.xlu1 %1476  ;;  %1934 = vmatprep.subr.bf16.mxu0 %v1507_v47  ;;  %v1502_v24 = vmul.f32 %v1491_v62, %v1484_v6  ;;  %v1503_v5 = vmul.f32 %v1495_v45, %v1480_v52  ;;  %v1558_v52 = vpack.c.bf16 %v1552_v2, %v1550_v48  ;;  %v1582_v6 = vsel %vm432_vm4, %v6381_v4, %v6432_v27 }
 0x476   : > { %v1481_v28 = vsel %vm364_vm2, %v1469_v1, %v1477_v3  ;;  %v1485_v53 = vsel %vm364_vm2, %v1477_v3, %v1469_v1  ;;  %v1559_v30 = vpack.c.bf16 %v1553_v23, %v1551_v32 }
 0x477   : > { %v1504_v40 = vmul.f32 %v1491_v62, %v1485_v53  ;;  %v1505_v54 = vmul.f32 %v1495_v45, %v1481_v28  ;;  %v1527_v37 = vpop.permute.xlu0 %1526  ;;  %v1583_v45 = vsel %vm432_vm4, %v6383_v50, %v6434_v33  ;;  %v1586_v50 = vsel %vm432_vm4, %v6432_v27, %v6381_v4 }
 0x478   : > { %1935 = vmatpush1.bf16.msra.mxu0 %v1506_v12  ;;  %v1532_v59 = vsel %vm398_vm3, %v6440_v26, %v1527_v37  ;;  %v1536_v47 = vsel %vm398_vm3, %v1527_v37, %v6440_v26  ;;  %v1605_v3 = vmul.f32 %v1599_v60, %v1583_v45  ;;  %v1603_v33 = vmul.f32 %v1599_v60, %v1582_v6  ;;  %v4918_v6 = vld [vmem:[%s8457_s6 + $0x5] ss:$8 sm:$0x3] }
 0x479   : > { %v1508_v41 = vpack.c.bf16 %v1504_v40, %v1502_v24  ;;  %v6511_v0 = vpop.permute.xlu1 %1684  ;;  %v1509_v1 = vpack.c.bf16 %v1505_v54, %v1503_v5  ;;  %v1554_v23 = vmul.f32 %v1543_v18, %v1536_v47  ;;  %v1555_v28 = vmul.f32 %v1547_v8, %v1532_v59 }
 0x47a   : > { %v1595_v40 = vrot.slane %v4917_v61, %v5696_v15 }
 0x47b   : > { %1936 = vmatprep.subr.bf16.mxu0 %v1509_v1  ;;  %v1579_v62 = vpop.permute.xlu0 %1578 }
 0x47c   : > { %1937 = vmatpush1.bf16.msra.mxu0 %v1508_v41  ;;  %v1584_v2 = vsel %vm432_vm4, %v6444_v7, %v1579_v62  ;;  %v1588_v61 = vsel %vm432_vm4, %v1579_v62, %v6444_v7 }
 0x47d   : > { %v1529_v12 = vpop.permute.xlu1 %1528  ;;  %1938 = vmatprep.subr.bf16.mxu0 %v1559_v30  ;;  %v1606_v48 = vmul.f32 %v1595_v40, %v1588_v61  ;;  %v1607_v45 = vmul.f32 %v1599_v60, %v1584_v2  ;;  %v1695_v2 = vsel %vm504_vm6, %v6416_v51, %v6482_v17  ;;  %v1699_v61 = vsel %vm504_vm6, %v6482_v17, %v6416_v51 }
 0x47e   : > { %v1533_v19 = vsel %vm398_vm3, %v6442_v34, %v1529_v12  ;;  %v1537_v26 = vsel %vm398_vm3, %v1529_v12, %v6442_v34  ;;  %v1604_v34 = vmul.f32 %v1595_v40, %v1587_v22  ;;  %v1659_v22 = vrot.slane %v4918_v6, %v5698_v16 }
 0x47f   : > { %v1556_v53 = vmul.f32 %v1543_v18, %v1537_v26  ;;  %v1557_v24 = vmul.f32 %v1547_v8, %v1533_v19  ;;  %v6538_v5 = vpop.permute.xlu0 %1638  ;;  %v1611_v8 = vpack.c.bf16 %v1605_v3, %v1603_v33  ;;  %v1602_v18 = vmul.f32 %v1595_v40, %v1586_v50  ;;  %v4921_v33 = vld [vmem:[%s8457_s6 + $0x10] ss:$8 sm:$0x3] }
 0x480   : > { %1939 = vmatpush1.bf16.msra.mxu0 %v1558_v52  ;;  %v1643_v3 = vsel %vm470_vm5, %v6397_v25, %v6438_v58  ;;  %v1655_v26 = vrot.slane %v4918_v6, %v5696_v15  ;;  %v1694_v51 = vsel %vm504_vm6, %v6411_v29, %v6474_v63 }
 0x481   : > { %v1560_v54 = vpack.c.bf16 %v1556_v53, %v1554_v23  ;;  %v6545_v37 = vpop.permute.xlu1 %1732  ;;  %v1561_v46 = vpack.c.bf16 %v1557_v24, %v1555_v28  ;;  %v1610_v27 = vpack.c.bf16 %v1604_v34, %v1602_v18  ;;  %v1646_v23 = vsel %vm470_vm5, %v6436_v35, %v6385_v11  ;;  %v4919_v28 = vld [vmem:[%s8457_s6 + $0x6] ss:$8 sm:$0x3] }
 0x482   : > { %v1618_v53 = vpack.c.bf16 %v6231_v39, %v6229_v49  ;;  %v1664_v50 = vmul.f32 %v1655_v26, %v1643_v3  ;;  %v1620_v18 = vpack.c.bf16 %v6283_v43, %v6279_v42 }
 0x483   : > { %1940 = vmatprep.subr.bf16.mxu0 %v1561_v46  ;;  %v6547_v32 = vpop.permute.xlu0 %1682  ;;  %v6603_v46 = vrot.slane %v4919_v28, %v5698_v16 }
 0x484   : > { %1941 = vmatpush1.bf16.msra.mxu0 %v1560_v54  ;;  %v1663_v54 = vmul.f32 %v1659_v22, %v1646_v23 }
 0x485   : > { %v1581_v4 = vpop.permute.xlu1 %1580  ;;  %1942 = vmatprep.subr.bf16.mxu0 %v1611_v8 }
 0x486   : > { %v1585_v41 = vsel %vm432_vm4, %v6446_v31, %v1581_v4  ;;  %v1589_v1 = vsel %vm432_vm4, %v1581_v4, %v6446_v31  ;;  %v1619_v31 = vpack.c.bf16 %v6259_v21, %v6255_v20  ;;  %v6621_v4 = vrot.slane %v4921_v33, %v5696_v15 }
 0x487   : > { %v1608_v30 = vmul.f32 %v1595_v40, %v1589_v1  ;;  %v1609_v59 = vmul.f32 %v1599_v60, %v1585_v41  ;;  %v6561_v47 = vpop.permute.xlu0 %1690  ;;  %v1647_v60 = vsel %vm470_vm5, %v6438_v58, %v6397_v25  ;;  %v1642_v25 = vsel %vm470_vm5, %v6385_v11, %v6436_v35 }
 0x488   : > { %1943 = vmatpush1.bf16.msra.mxu0 %v1610_v27  ;;  %v1665_v58 = vmul.f32 %v1659_v22, %v1647_v60  ;;  %v1621_v40 = vpack.c.bf16 %v6307_v13, %v6303_v36  ;;  %v1662_v8 = vmul.f32 %v1655_v26, %v1642_v25  ;;  %v1707_v11 = vrot.slane %v4919_v28, %v5696_v15 }
 0x489   : > { %v1612_v7 = vpack.c.bf16 %v1608_v30, %v1606_v48  ;;  %v6563_v62 = vpop.permute.xlu1 %1740  ;;  %v1613_v52 = vpack.c.bf16 %v1609_v59, %v1607_v45  ;;  %v1698_v35 = vsel %vm504_vm6, %v6474_v63, %v6411_v29  ;;  %v1644_v48 = vsel %vm470_vm5, %v6448_v38, %v6538_v5 }
 0x48a   : > { %v1671_v41 = vpack.c.bf16 %v1665_v58, %v1663_v54  ;;  %v1670_v1 = vpack.c.bf16 %v1664_v50, %v1662_v8  ;;  %v1648_v45 = vsel %vm470_vm5, %v6538_v5, %v6448_v38  ;;  %v6632_v30 = vrot.slane %v4921_v33, %v5698_v16  ;;  %v4920_v54 = vld [vmem:[%s8457_s6 + $0x7] ss:$8 sm:$0x3] }
 0x48b   : > { %1944 = vmatprep.subr.bf16.mxu0 %v1613_v52  ;;  %v6568_v12 = vpop.permute.xlu0 %1730  ;;  %v1715_v17 = vmul.f32 %v6603_v46, %v1698_v35  ;;  %v1716_v38 = vmul.f32 %v1707_v11, %v1695_v2  ;;  %v1717_v5 = vmul.f32 %v6603_v46, %v1699_v61  ;;  %v1666_v63 = vmul.f32 %v1655_v26, %v1644_v48 }
 0x48c   : > { %1945 = vmatpush1.bf16.msra.mxu0 %v1612_v7  ;;  %v1696_v33 = vsel %vm504_vm6, %v6547_v32, %v6561_v47 }
 0x48d   : > { %v1785_v19 = vpop.permute.xlu1 %1784  ;;  %1946 = vmatprep.subr.bf16.mxu0 %v1619_v31  ;;  %v1667_v31 = vmul.f32 %v1659_v22, %v1648_v45 }
 0x48f   : > { %v6595_v24 = vpop.permute.xlu0 %1738 }
 0x490   : > { %1947 = vmatpush1.bf16.msra.mxu0 %v1618_v53  ;;  %v1750_v61 = vsel %vm538_vm7, %v6595_v24, %v6568_v12 }
 0x491   : > { %v1793_v34 = vpop.permute.xlu1 %1792  ;;  %1948 = vmatprep.subr.bf16.mxu0 %v1621_v40 }
 0x492   : > { %v1799_v59 = vsel %vm572_vm8, %v1785_v19, %v1793_v34  ;;  %v1803_v7 = vsel %vm572_vm8, %v1793_v34, %v1785_v19  ;;  %v1700_v34 = vsel %vm504_vm6, %v6561_v47, %v6547_v32  ;;  %v1751_v47 = vsel %vm538_vm7, %v6563_v62, %v6545_v37 }
 0x493   : > { %v1783_v27 = vpop.permute.xlu0 %1782  ;;  %v1820_v19 = vmul.f32 %v6621_v4, %v1799_v59  ;;  %v1821_v28 = vmul.f32 %v6632_v30, %v1803_v7  ;;  %v1719_v32 = vmul.f32 %v6603_v46, %v1700_v34 }
 0x494   : > { %1949 = vmatpush1.bf16.msra.mxu0 %v1620_v18  ;;  %v1723_v18 = vpack.c.bf16 %v1717_v5, %v1715_v17  ;;  %v1746_v17 = vsel %vm538_vm7, %v6568_v12, %v6595_v24  ;;  %v1759_v5 = vrot.slane %v4920_v54, %v5696_v15 }
 0x495   : > { %v1641_v52 = vpop.permute.xlu1 %1640  ;;  %1950 = vmatprep.subr.bf16.mxu0 %v1671_v41  ;;  %v1718_v41 = vmul.f32 %v1707_v11, %v1696_v33 }
 0x496   : > { %v1645_v6 = vsel %vm470_vm5, %v6453_v44, %v1641_v52  ;;  %v1649_v29 = vsel %vm470_vm5, %v1641_v52, %v6453_v44 }
 0x497   : > { %v1668_v60 = vmul.f32 %v1655_v26, %v1645_v6  ;;  %v1669_v3 = vmul.f32 %v1659_v22, %v1649_v29  ;;  %v1791_v23 = vpop.permute.xlu0 %1790  ;;  %v1714_v22 = vmul.f32 %v1707_v11, %v1694_v51  ;;  %v1747_v6 = vsel %vm538_vm7, %v6545_v37, %v6563_v62 }
 0x498   : > { %v1798_v53 = vsel %vm572_vm8, %v1783_v27, %v1791_v23  ;;  %v1802_v25 = vsel %vm572_vm8, %v1791_v23, %v1783_v27  ;;  %1951 = vmatpush1.bf16.msra.mxu0 %v1670_v1  ;;  %v1763_v1 = vrot.slane %v4920_v54, %v5698_v16  ;;  %v1768_v24 = vmul.f32 %v1759_v5, %v1747_v6 }
 0x499   : > { %v1672_v58 = vpack.c.bf16 %v1668_v60, %v1666_v63  ;;  %v1818_v40 = vmul.f32 %v6621_v4, %v1798_v53  ;;  %v1819_v44 = vmul.f32 %v6632_v30, %v1802_v25  ;;  %v1737_v50 = vpop.permute.xlu1 %1736  ;;  %v1673_v26 = vpack.c.bf16 %v1669_v3, %v1667_v31 }
 0x49a   : > { %v1722_v27 = vpack.c.bf16 %v1716_v38, %v1714_v22  ;;  %v1767_v59 = vmul.f32 %v1763_v1, %v1750_v61  ;;  %v1766_v60 = vmul.f32 %v1759_v5, %v1746_v17  ;;  %v5201_v61 = vld [vmem:[#allocation8 + $0x30] ss:$12 sps:$4 sm:$0xff]  }
 0x49b   : > { %v1826_v8 = vpack.c.bf16 %v1820_v19, %v1818_v40  ;;  %v1735_v35 = vpop.permute.xlu0 %1734  ;;  %1952 = vmatprep.subr.bf16.mxu0 %v1673_v26  ;;  %v1827_v2 = vpack.c.bf16 %v1821_v28, %v1819_v44 }
 0x49c   : > { %1953 = vmatpush1.bf16.msra.mxu0 %v1672_v58  ;;  %v1774_v19 = vpack.c.bf16 %v1768_v24, %v1766_v60 }
 0x49d   : > { %v1693_v48 = vpop.permute.xlu1 %1692  ;;  %1954 = vmatprep.subr.bf16.mxu0 %v1723_v18  ;;  %1983 = vmatprep.subr.bf16.mxu1 %v1827_v2 }
 0x49e   : > { %v1697_v45 = vsel %vm504_vm6, %v6511_v0, %v1693_v48  ;;  %v1701_v51 = vsel %vm504_vm6, %v1693_v48, %v6511_v0  ;;  %1984 = vmatpush1.bf16.msra.mxu1 %v1826_v8  ;;  %v1769_v0 = vmul.f32 %v1763_v1, %v1751_v47  ;;  %v5204_v48 = vld [vmem:[#allocation8 + $0x38] ss:$12 sps:$4 sm:$0xff]  }
 0x49f   : > { %v1720_v7 = vmul.f32 %v1707_v11, %v1697_v45  ;;  %v1721_v52 = vmul.f32 %v6603_v46, %v1701_v51  ;;  %v1743_v38 = vpop.permute.xlu0 %1742 }
 0x4a0   : > { %1955 = vmatpush1.bf16.msra.mxu0 %v1722_v27  ;;  %v1775_v12 = vpack.c.bf16 %v1769_v0, %v1767_v59  ;;  %v1748_v46 = vsel %vm538_vm7, %v1735_v35, %v1743_v38  ;;  %v1752_v11 = vsel %vm538_vm7, %v1743_v38, %v1735_v35  ;;  %v5205_v27 = vld [vmem:[#allocation8 + $0x4c] ss:$12 sps:$4 sm:$0xff]  }
 0x4a1   : > { %v1724_v29 = vpack.c.bf16 %v1720_v7, %v1718_v41  ;;  %v1789_v63 = vpop.permute.xlu1 %1788  ;;  %v1725_v31 = vpack.c.bf16 %v1721_v52, %v1719_v32  ;;  %v1770_v28 = vmul.f32 %v1759_v5, %v1748_v46  ;;  %v1771_v53 = vmul.f32 %v1763_v1, %v1752_v11  ;;  %v5207_v32 = vld [vmem:[#allocation8 + $0x48] ss:$12 sps:$4 sm:$0xff]  }
 0x4a3   : > { %v1787_v3 = vpop.permute.xlu0 %1786  ;;  %1956 = vmatprep.subr.bf16.mxu0 %v1725_v31 }
 0x4a4   : > { %1957 = vmatpush1.bf16.msra.mxu0 %v1724_v29 }
 0x4a5   : > { %v1745_v23 = vpop.permute.xlu1 %1744  ;;  %1958 = vmatprep.subr.bf16.mxu0 %v1775_v12 }
 0x4a6   : > { %v1749_v37 = vsel %vm538_vm7, %v1737_v50, %v1745_v23  ;;  %v1753_v62 = vsel %vm538_vm7, %v1745_v23, %v1737_v50 }
 0x4a7   : > { %v1772_v25 = vmul.f32 %v1759_v5, %v1749_v37  ;;  %v1773_v58 = vmul.f32 %v1763_v1, %v1753_v62  ;;  %v1795_v40 = vpop.permute.xlu0 %1794 }
 0x4a8   : > { %v1800_v44 = vsel %vm572_vm8, %v1787_v3, %v1795_v40  ;;  %v1804_v26 = vsel %vm572_vm8, %v1795_v40, %v1787_v3  ;;  %1959 = vmatpush1.bf16.msra.mxu0 %v1774_v19 }
 0x4a9   : > { %v1776_v22 = vpack.c.bf16 %v1772_v25, %v1770_v28  ;;  %v1797_v33 = vpop.permute.xlu1 %1796  ;;  %v1777_v54 = vpack.c.bf16 %v1773_v58, %v1771_v53  ;;  %v1822_v8 = vmul.f32 %v6621_v4, %v1800_v44  ;;  %v1823_v35 = vmul.f32 %v6632_v30, %v1804_v26 }
 0x4aa   : > { %v1801_v34 = vsel %vm572_vm8, %v1789_v63, %v1797_v33  ;;  %v1805_v50 = vsel %vm572_vm8, %v1797_v33, %v1789_v63 }
 0x4ab   : > { %v1824_v18 = vmul.f32 %v6621_v4, %v1801_v34  ;;  %v1825_v2 = vmul.f32 %v6632_v30, %v1805_v50  ;;  %1960 = vmatprep.subr.bf16.mxu0 %v1777_v54  ;;  %v5208_v4 = vld [vmem:[#allocation8 + $0x50] ss:$12 sps:$4 sm:$0xff]  }
 0x4ac   : > { %1961 = vmatpush1.bf16.msra.mxu0 %v1776_v22 }
 0x4ad   : > { %v1828_v41 = vpack.c.bf16 %v1824_v18, %v1822_v8  ;;  %v1829_v1 = vpack.c.bf16 %v1825_v2, %v1823_v35 }
 0x4af   : > { %1963 = vmatmul.mubr.bf16.vlgmr.msra.gmra.mrb[8].mxu0 %v5201_v61  ;;  %1985 = vmatprep.subr.bf16.mxu1 %v1829_v1  ;;  %v5211_v1 = vld [vmem:[#allocation8 + $0x64] ss:$12 sps:$4 sm:$0xff]  }
 0x4b0   : > { %1986 = vmatpush1.bf16.msra.mxu1 %v1828_v41  ;;  %1972 = vmatprep.mubr.bf16.mxu0 %v5205_v27 }
 0x4b3   : > { %4928 = vmatmul.mubr.msk.bf16.vlgmr.msra.gmra.mrb[8].mxu1 %vm1264_vm9, %v5204_v48 }
 0x4b4   : > { %2025 = vmatprep.mubr.bf16.mxu1 %v5389_v9 }
 0x4b7   : > { %1973 = vmatmul.mubr.bf16.gmra.mrb[12].mxu0 %v5207_v32 }
 0x4b8   : > { %v1877_v30 = vpop.permute.xlu0 %1876 }
 0x4ba   : > { %v1882_v52 = vpop.permute.xlu1 %1881 }
 0x4bb   : > { %4929 = vmatmul.mubr.msk.bf16.gmra.mrb[12].mxu1 %vm1264_vm9, %v5208_v4 }
 0x4bc   : > { %v1892_v53 = vpop.permute.xlu0 %1891  ;;  %2621 = vmatprep.mubr.bf16.mxu1 %v5211_v1 }
 0x4be   : > { %v1887_v19 = vpop.permute.xlu1 %1886 }
 0x582   : > { %v1964_v47 = vpop.f32.mrb[8].mxu0 }
 0x583   : > { %v1965_v45 = vadd.f32 %v1964_v47, %v1877_v30  ;;  %v1966_v51 = vpop.f32.mrb[9].mxu0 }
 0x584   : > { %v1967_v17 = vadd.f32 %v1966_v51, %v1877_v30  ;;  %v1968_v59 = vpop.f32.mrb[10].mxu0 }
 0x585   : > { %v1970_v7 = vpop.f32.mrb[11].mxu0  ;;  %v1969_v5 = vadd.f32 %v1968_v59, %v1882_v52 }
 0x586   : > { %v2017_v38 = vpop.f32.mrb[8].mxu1  ;;  %v1971_v29 = vadd.f32 %v1970_v7, %v1882_v52  ;;  %v2093_v7 = vld [vmem:[%s8457_s6] ss:$8 sm:$0x3]  ;;  %v5392_v52 = vmov 3  }
 0x587   : > { %v2018_v6 = vadd.f32 %v2017_v38, %v1965_v45  ;;  %v2019_v0 = vpop.f32.mrb[9].mxu1  ;;  %5177 = vset.pattern.permute.xlu1 %v5392_v52  ;;  %5178 = vset.pattern.permute.xlu0 %v5392_v52 }
 0x588   : > { %v2020_v63 = vadd.f32 %v2019_v0, %v1967_v17  ;;  %v2021_v31 = vpop.f32.mrb[10].mxu1 }
 0x589   : > { %v6718_v60 = vmax.f32 %v2018_v6, 0.0  ;;  %v2022_v3 = vadd.f32 %v2021_v31, %v1969_v5  ;;  %v2023_v12 = vpop.f32.mrb[11].mxu1  ;;  %v2098_v5 = vrot.slane %v2093_v7, %v5696_v15  ;;  %v2102_v6 = vrot.slane %v2093_v7, %v5698_v16 }
 0x58a   : > { %v2024_v24 = vadd.f32 %v2023_v12, %v1971_v29  ;;  %v1974_v46 = vpop.f32.mrb[12].mxu0  ;;  %v6740_v35 = vmax.f32 %v2020_v63, 0.0 }
 0x58b   : > { %v6720_v11 = vmax.f32 %v2022_v3, 0.0  ;;  %v1976_v23 = vpop.f32.mrb[13].mxu0  ;;  %2069 = vrot.lane.b32.xlu1 %v6718_v60, %s5381_s9  ;;  %v1975_v62 = vadd.f32 %v1974_v46, %v1887_v19 }
 0x58c   : > { %v1978_v37 = vpop.f32.mrb[14].mxu0  ;;  %v1977_v25 = vadd.f32 %v1976_v23, %v1887_v19  ;;  %v6744_v18 = vmax.f32 %v2024_v24, 0.0 }
 0x58d   : > { %v1980_v28 = vpop.f32.mrb[15].mxu0  ;;  %2071 = vrot.lane.b32.xlu0 %v6720_v11, %s5381_s9  ;;  %v1979_v40 = vadd.f32 %v1978_v37, %v1892_v53 }
 0x58e   : > { %v2027_v58 = vpop.f32.mrb[12].mxu1  ;;  %v1981_v22 = vadd.f32 %v1980_v28, %v1892_v53 }
 0x58f   : > { %v2028_v44 = vadd.f32 %v2027_v58, %v1975_v62  ;;  %v2029_v26 = vpop.f32.mrb[13].mxu1  ;;  %2121 = vrot.lane.b32.xlu1 %v6718_v60, %s5382_s30 }
 0x590   : > { %v2030_v33 = vadd.f32 %v2029_v26, %v1977_v25  ;;  %v2031_v54 = vpop.f32.mrb[14].mxu1 }
 0x591   : > { %v2032_v34 = vadd.f32 %v2031_v54, %v1979_v40  ;;  %v2033_v50 = vpop.f32.mrb[15].mxu1  ;;  %2123 = vrot.lane.b32.xlu0 %v6720_v11, %s5382_s30  ;;  %v6760_v2 = vmax.f32 %v2028_v44, 0.0 }
 0x592   : > { %v2034_v8 = vadd.f32 %v2033_v50, %v1981_v22  ;;  %v6780_v27 = vmax.f32 %v2030_v33, 0.0 }
 0x593   : > { %2173 = vrot.lane.b32.xlu1 %v6718_v60, %s5383_s16  ;;  %v6764_v61 = vmax.f32 %v2032_v34, 0.0 }
 0x594   : > { %v6784_v41 = vmax.f32 %v2034_v8, 0.0 }
 0x595   : > { %2175 = vrot.lane.b32.xlu0 %v6720_v11, %s5383_s16 }
 0x597   : > { %2225 = vrot.lane.b32.xlu1 %v6718_v60, %s5384_s14 }
 0x599   : > { %2227 = vrot.lane.b32.xlu0 %v6720_v11, %s5384_s14 }
 0x59b   : > { %2285 = vrot.lane.b32.xlu1 %v6718_v60, %s5385_s15 }
 0x59d   : > { %2287 = vrot.lane.b32.xlu0 %v6720_v11, %s5385_s15 }
 0x59f   : > { %2077 = vrot.lane.b32.xlu1 %v6740_v35, %s5381_s9 }
 0x5a1   : > { %2079 = vrot.lane.b32.xlu0 %v6744_v18, %s5381_s9 }
 0x5a3   : > { %2129 = vrot.lane.b32.xlu1 %v6740_v35, %s5382_s30 }
 0x5a5   : > { %2131 = vrot.lane.b32.xlu0 %v6744_v18, %s5382_s30 }
 0x5a7   : > { %2181 = vrot.lane.b32.xlu1 %v6740_v35, %s5383_s16 }
 0x5a9   : > { %2183 = vrot.lane.b32.xlu0 %v6744_v18, %s5383_s16 }
 0x5ab   : > { %2233 = vrot.lane.b32.xlu1 %v6740_v35, %s5384_s14 }
 0x5ad   : > { %2235 = vrot.lane.b32.xlu0 %v6744_v18, %s5384_s14 }
 0x5af   : > { %2073 = vrot.lane.b32.xlu1 %v6760_v2, %s5381_s9 }
 0x5b1   : > { %2075 = vrot.lane.b32.xlu0 %v6764_v61, %s5381_s9 }
 0x5b3   : > { %2125 = vrot.lane.b32.xlu1 %v6760_v2, %s5382_s30 }
 0x5b5   : > { %2127 = vrot.lane.b32.xlu0 %v6764_v61, %s5382_s30 }
 0x5b7   : > { %2177 = vrot.lane.b32.xlu1 %v6760_v2, %s5383_s16 }
 0x5b9   : > { %2179 = vrot.lane.b32.xlu0 %v6764_v61, %s5383_s16 }
 0x5bb   : > { %2229 = vrot.lane.b32.xlu1 %v6760_v2, %s5384_s14 }
 0x5bd   : > { %2231 = vrot.lane.b32.xlu0 %v6764_v61, %s5384_s14 }
 0x5bf   : > { %2081 = vrot.lane.b32.xlu1 %v6780_v27, %s5381_s9 }
 0x5c1   : > { %2083 = vrot.lane.b32.xlu0 %v6784_v41, %s5381_s9 }
 0x5c3   : > { %2293 = vrot.lane.b32.xlu1 %v6740_v35, %s5385_s15 }
 0x5c5   : > { %2295 = vrot.lane.b32.xlu0 %v6744_v18, %s5385_s15 }
 0x5c7   : > { %2133 = vrot.lane.b32.xlu1 %v6780_v27, %s5382_s30 }
 0x5c9   : > { %2135 = vrot.lane.b32.xlu0 %v6784_v41, %s5382_s30 }
 0x5cb   : > { %2185 = vrot.lane.b32.xlu1 %v6780_v27, %s5383_s16 }
 0x5cd   : > { %2291 = vrot.lane.b32.xlu0 %v6764_v61, %s5385_s15 }
 0x5cf   : > { %2237 = vrot.lane.b32.xlu1 %v6780_v27, %s5384_s14 }
 0x5d1   : > { %2187 = vrot.lane.b32.xlu0 %v6784_v41, %s5383_s16 }
 0x5d3   : > { %2289 = vrot.lane.b32.xlu1 %v6760_v2, %s5385_s15 }
 0x5d5   : > { %2339 = vrot.lane.b32.xlu0 %v6720_v11, %s8466_s29 }
 0x5d7   : > { %2297 = vrot.lane.b32.xlu1 %v6780_v27, %s5385_s15 }
 0x5d9   : > { %2239 = vrot.lane.b32.xlu0 %v6784_v41, %s5384_s14 }
 0x5db   : > { %2337 = vrot.lane.b32.xlu1 %v6718_v60, %s8466_s29 }
 0x5dd   : > { %2347 = vrot.lane.b32.xlu0 %v6744_v18, %s8466_s29 }
 0x5df   : > { %2345 = vrot.lane.b32.xlu1 %v6740_v35, %s8466_s29 }
 0x5e1   : > { %2343 = vrot.lane.b32.xlu0 %v6764_v61, %s8466_s29 }
 0x5e3   : > { %2341 = vrot.lane.b32.xlu1 %v6760_v2, %s8466_s29 }
 0x5e5   : > { %2391 = vrot.lane.b32.xlu0 %v6720_v11, %s8480_s22 }
 0x5e7   : > { %2349 = vrot.lane.b32.xlu1 %v6780_v27, %s8466_s29 }
 0x5e9   : > { %2299 = vrot.lane.b32.xlu0 %v6784_v41, %s5385_s15 }
 0x5eb   : > { %2389 = vrot.lane.b32.xlu1 %v6718_v60, %s8480_s22 }
 0x5ed   : > { %2399 = vrot.lane.b32.xlu0 %v6744_v18, %s8480_s22 }
 0x5ef   : > { %2397 = vrot.lane.b32.xlu1 %v6740_v35, %s8480_s22 }
 0x5f1   : > { %2351 = vrot.lane.b32.xlu0 %v6784_v41, %s8466_s29 }
 0x5f3   : > { %2393 = vrot.lane.b32.xlu1 %v6760_v2, %s8480_s22 }
 0x5f5   : > { %2395 = vrot.lane.b32.xlu0 %v6764_v61, %s8480_s22 }
 0x5f7   : > { %2401 = vrot.lane.b32.xlu1 %v6780_v27, %s8480_s22 }
 0x5f9   : > { %2403 = vrot.lane.b32.xlu0 %v6784_v41, %s8480_s22 }
 0x5fb   : > { %2441 = vrot.lane.b32.xlu1 %v6718_v60, %s8479_s23 }
 0x5fd   : > { %2443 = vrot.lane.b32.xlu0 %v6720_v11, %s8479_s23  ;;  %v2070_v48 = vpop.permute.xlu1 %2069 }
 0x5ff   : > { %v2072_v32 = vpop.permute.xlu0 %2071  ;;  %2449 = vrot.lane.b32.xlu1 %v6740_v35, %s8479_s23 }
 0x601   : > { %2451 = vrot.lane.b32.xlu0 %v6744_v18, %s8479_s23  ;;  %v6854_v4 = vpop.permute.xlu1 %2121 }
 0x603   : > { %v2124_v30 = vpop.permute.xlu0 %2123  ;;  %2445 = vrot.lane.b32.xlu1 %v6760_v2, %s8479_s23 }
 0x605   : > { %2447 = vrot.lane.b32.xlu0 %v6764_v61, %s8479_s23  ;;  %v6860_v47 = vpop.permute.xlu1 %2173 }
 0x607   : > { %v6862_v45 = vpop.permute.xlu0 %2175  ;;  %2453 = vrot.lane.b32.xlu1 %v6780_v27, %s8479_s23 }
 0x609   : > { %2455 = vrot.lane.b32.xlu0 %v6784_v41, %s8479_s23  ;;  %v6868_v51 = vpop.permute.xlu1 %2225 }
 0x60b   : > { %v6870_v17 = vpop.permute.xlu0 %2227  ;;  %2535 = vperm.xlu1 %5177, %v6395_v56  }
 0x60d   : > { %v6872_v59 = vpop.permute.xlu1 %2285  ;;  %2540 = vperm.xlu0 %5178, %v6390_v55  }
 0x60f   : > { %v6877_v38 = vpop.permute.xlu0 %2287  ;;  %2545 = vperm.xlu1 %5177, %v6404_v57  }
 0x611   : > { %v2078_v0 = vpop.permute.xlu1 %2077 }
 0x612   : > { %v2085_v29 = vsel %vm331_vm1, %v2070_v48, %v2078_v0  ;;  %v2089_v63 = vsel %vm331_vm1, %v2078_v0, %v2070_v48 }
 0x613   : > { %v2080_v31 = vpop.permute.xlu0 %2079  ;;  %v2105_v56 = vmul.f32 %v2098_v5, %v2089_v63  ;;  %v2106_v12 = vmul.f32 %v2102_v6, %v2085_v29  ;;  %2550 = vperm.xlu1 %5177, %v6409_v10   ;;  %v4930_v10 = vld [vmem:[%s8457_s6 + $0x1] ss:$8 sm:$0x3] }
 0x614   : > { %v2086_v3 = vsel %vm331_vm1, %v2072_v32, %v2080_v31  ;;  %v2090_v55 = vsel %vm331_vm1, %v2080_v31, %v2072_v32  ;;  %v2154_v1 = vrot.slane %v4930_v10, %v5698_v16  ;;  %v2150_v7 = vrot.slane %v4930_v10, %v5696_v15 }
 0x615   : > { %v2107_v24 = vmul.f32 %v2098_v5, %v2090_v55  ;;  %v2108_v46 = vmul.f32 %v2102_v6, %v2086_v3  ;;  %v2130_v23 = vpop.permute.xlu1 %2129 }
 0x616   : > { %v2137_v52 = vsel %vm364_vm2, %v6854_v4, %v2130_v23 }
 0x617   : > { %v2113_v19 = vpack.c.bf16 %v2107_v24, %v2105_v56  ;;  %v2132_v37 = vpop.permute.xlu0 %2131  ;;  %v2114_v62 = vpack.c.bf16 %v2108_v46, %v2106_v12 }
 0x618   : > { %v2138_v50 = vsel %vm364_vm2, %v2124_v30, %v2132_v37  ;;  %v2142_v29 = vsel %vm364_vm2, %v2132_v37, %v2124_v30  ;;  %v4931_v30 = vld [vmem:[%s8457_s6 + $0x2] ss:$8 sm:$0x3] }
 0x619   : > { %2589 = vmatprep.subr.bf16.mxu1 %v2114_v62  ;;  %v2182_v28 = vpop.permute.xlu1 %2181  ;;  %v2160_v63 = vmul.f32 %v2154_v1, %v2138_v50  ;;  %v2158_v62 = vmul.f32 %v2154_v1, %v2137_v52  ;;  %v2202_v52 = vrot.slane %v4931_v30, %v5696_v15 }
 0x61a   : > { %2590 = vmatpush1.bf16.msra.mxu1 %v2113_v19  ;;  %v2141_v19 = vsel %vm364_vm2, %v2130_v23, %v6854_v4  ;;  %v2206_v4 = vrot.slane %v4931_v30, %v5698_v16 }
 0x61b   : > { %v2184_v57 = vpop.permute.xlu0 %2183  ;;  %v2157_v50 = vmul.f32 %v2150_v7, %v2141_v19 }
 0x61d   : > { %v6893_v53 = vpop.permute.xlu1 %2233 }
 0x61f   : > { %v6895_v25 = vpop.permute.xlu0 %2235 }
 0x621   : > { %v2074_v58 = vpop.permute.xlu1 %2073 }
 0x623   : > { %v2076_v40 = vpop.permute.xlu0 %2075 }
 0x625   : > { %v2126_v44 = vpop.permute.xlu1 %2125 }
 0x627   : > { %v2128_v26 = vpop.permute.xlu0 %2127 }
 0x629   : > { %v6897_v22 = vpop.permute.xlu1 %2177 }
 0x62b   : > { %v6899_v33 = vpop.permute.xlu0 %2179 }
 0x62d   : > { %v6901_v54 = vpop.permute.xlu1 %2229 }
 0x62f   : > { %v6906_v34 = vpop.permute.xlu0 %2231 }
 0x631   : > { %v2082_v8 = vpop.permute.xlu1 %2081 }
 0x632   : > { %v2087_v48 = vsel %vm331_vm1, %v2074_v58, %v2082_v8  ;;  %v2091_v32 = vsel %vm331_vm1, %v2082_v8, %v2074_v58  ;;  %v2159_v58 = vmul.f32 %v2150_v7, %v2142_v29  ;;  %v2166_v8 = vpack.c.bf16 %v2160_v63, %v2158_v62 }
 0x633   : > { %v2084_v0 = vpop.permute.xlu0 %2083  ;;  %v2109_v55 = vmul.f32 %v2098_v5, %v2091_v32  ;;  %v2110_v56 = vmul.f32 %v2102_v6, %v2087_v48  ;;  %v2194_v63 = vsel %vm398_vm3, %v2184_v57, %v6862_v45  ;;  %v2193_v62 = vsel %vm398_vm3, %v2182_v28, %v6860_v47 }
 0x634   : > { %v2088_v31 = vsel %vm331_vm1, %v2076_v40, %v2084_v0  ;;  %v2092_v3 = vsel %vm331_vm1, %v2084_v0, %v2076_v40  ;;  %v2165_v32 = vpack.c.bf16 %v2159_v58, %v2157_v50  ;;  %v2189_v0 = vsel %vm398_vm3, %v6860_v47, %v2182_v28 }
 0x635   : > { %v2111_v12 = vmul.f32 %v2098_v5, %v2092_v3  ;;  %v2112_v24 = vmul.f32 %v2102_v6, %v2088_v31  ;;  %v6925_v46 = vpop.permute.xlu1 %2293  ;;  %v2190_v5 = vsel %vm398_vm3, %v6862_v45, %v2184_v57  ;;  %v2210_v58 = vmul.f32 %v2206_v4, %v2189_v0  ;;  %v4932_v45 = vld [vmem:[%s8457_s6 + $0x3] ss:$8 sm:$0x3] }
 0x636   : > { %v2212_v31 = vmul.f32 %v2206_v4, %v2190_v5  ;;  %v2211_v30 = vmul.f32 %v2202_v52, %v2194_v63  ;;  %v2258_v28 = vrot.slane %v4932_v45, %v5698_v16 }
 0x637   : > { %v2115_v37 = vpack.c.bf16 %v2111_v12, %v2109_v55  ;;  %v6933_v10 = vpop.permute.xlu0 %2295  ;;  %v2116_v40 = vpack.c.bf16 %v2112_v24, %v2110_v56 }
 0x638   : > { %v2218_v47 = vpack.c.bf16 %v2212_v31, %v2210_v58 }
 0x639   : > { %2591 = vmatprep.subr.bf16.mxu1 %v2116_v40  ;;  %v2134_v6 = vpop.permute.xlu1 %2133  ;;  %v2209_v40 = vmul.f32 %v2202_v52, %v2193_v62 }
 0x63a   : > { %v2139_v23 = vsel %vm364_vm2, %v2126_v44, %v2134_v6  ;;  %v2143_v48 = vsel %vm364_vm2, %v2134_v6, %v2126_v44  ;;  %2592 = vmatpush1.bf16.msra.mxu1 %v2115_v37 }
 0x63b   : > { %v2136_v29 = vpop.permute.xlu0 %2135  ;;  %2593 = vmatprep.subr.bf16.mxu1 %v2166_v8  ;;  %v2161_v55 = vmul.f32 %v2150_v7, %v2143_v48  ;;  %v2162_v56 = vmul.f32 %v2154_v1, %v2139_v23  ;;  %v2217_v6 = vpack.c.bf16 %v2211_v30, %v2209_v40  ;;  %v2241_v8 = vsel %vm432_vm4, %v6868_v51, %v6893_v53 }
 0x63c   : > { %v2140_v3 = vsel %vm364_vm2, %v2128_v26, %v2136_v29  ;;  %v2144_v44 = vsel %vm364_vm2, %v2136_v29, %v2128_v26  ;;  %v2246_v48 = vsel %vm432_vm4, %v6895_v25, %v6870_v17 }
 0x63d   : > { %v2163_v12 = vmul.f32 %v2150_v7, %v2144_v44  ;;  %v2164_v24 = vmul.f32 %v2154_v1, %v2140_v3  ;;  %v2186_v19 = vpop.permute.xlu1 %2185  ;;  %v2242_v1 = vsel %vm432_vm4, %v6870_v17, %v6895_v25  ;;  %v2245_v17 = vsel %vm432_vm4, %v6893_v53, %v6868_v51 }
 0x63e   : > { %2594 = vmatpush1.bf16.msra.mxu1 %v2165_v32  ;;  %v2191_v50 = vsel %vm398_vm3, %v6897_v22, %v2186_v19  ;;  %v2195_v5 = vsel %vm398_vm3, %v2186_v19, %v6897_v22  ;;  %v2264_v32 = vmul.f32 %v2258_v28, %v2242_v1  ;;  %v2262_v25 = vmul.f32 %v2258_v28, %v2241_v8 }
 0x63f   : > { %v2167_v57 = vpack.c.bf16 %v2163_v12, %v2161_v55  ;;  %v6960_v37 = vpop.permute.xlu0 %2291  ;;  %v2168_v26 = vpack.c.bf16 %v2164_v24, %v2162_v56  ;;  %v2213_v29 = vmul.f32 %v2202_v52, %v2195_v5  ;;  %v2214_v63 = vmul.f32 %v2206_v4, %v2191_v50  ;;  %v4933_v5 = vld [vmem:[%s8457_s6 + $0x5] ss:$8 sm:$0x3] }
 0x640   : > { %v2254_v55 = vrot.slane %v4932_v45, %v5696_v15  ;;  %v2270_v62 = vpack.c.bf16 %v2264_v32, %v2262_v25  ;;  %v2278_v8 = vpack.c.bf16 %v6744_v18, %v6740_v35  ;;  %v2302_v35 = vsel %vm470_vm5, %v6877_v38, %v6933_v10 }
 0x641   : > { %2595 = vmatprep.subr.bf16.mxu1 %v2168_v26  ;;  %v2238_v7 = vpop.permute.xlu1 %2237  ;;  %v2277_v18 = vpack.c.bf16 %v6720_v11, %v6718_v60  ;;  %v2314_v32 = vrot.slane %v4933_v5, %v5696_v15  ;;  %v4934_v11 = vld [vmem:[%s8457_s6 + $0x6] ss:$8 sm:$0x3] }
 0x642   : > { %2596 = vmatpush1.bf16.msra.mxu1 %v2167_v57  ;;  %v2263_v19 = vmul.f32 %v2254_v55, %v2246_v48  ;;  %v2247_v58 = vsel %vm432_vm4, %v2238_v7, %v6901_v54  ;;  %v2305_v48 = vsel %vm470_vm5, %v6925_v46, %v6872_v59 }
 0x643   : > { %v2188_v23 = vpop.permute.xlu0 %2187  ;;  %2597 = vmatprep.subr.bf16.mxu1 %v2218_v47  ;;  %v2265_v57 = vmul.f32 %v2254_v55, %v2247_v58 }
 0x644   : > { %v2192_v0 = vsel %vm398_vm3, %v6899_v33, %v2188_v23  ;;  %v2196_v22 = vsel %vm398_vm3, %v2188_v23, %v6899_v33 }
 0x645   : > { %v2215_v31 = vmul.f32 %v2202_v52, %v2196_v22  ;;  %v2216_v3 = vmul.f32 %v2206_v4, %v2192_v0  ;;  %v2290_v44 = vpop.permute.xlu1 %2289  ;;  %v2261_v52 = vmul.f32 %v2254_v55, %v2245_v17  ;;  %v2243_v4 = vsel %vm432_vm4, %v6901_v54, %v2238_v7 }
 0x646   : > { %2598 = vmatpush1.bf16.msra.mxu1 %v2217_v6  ;;  %v2266_v26 = vmul.f32 %v2258_v28, %v2243_v4 }
 0x647   : > { %v2219_v56 = vpack.c.bf16 %v2215_v31, %v2213_v29  ;;  %v6992_v12 = vpop.permute.xlu0 %2339  ;;  %v2220_v24 = vpack.c.bf16 %v2216_v3, %v2214_v63  ;;  %v2269_v53 = vpack.c.bf16 %v2263_v19, %v2261_v52  ;;  %v2280_v29 = vpack.c.bf16 %v6784_v41, %v6780_v27 }
 0x648   : > { %v2301_v63 = vsel %vm470_vm5, %v6872_v59, %v6925_v46  ;;  %v2323_v3 = vmul.f32 %v2314_v32, %v2302_v35  ;;  %v2279_v27 = vpack.c.bf16 %v6764_v61, %v6760_v2 }
 0x649   : > { %2599 = vmatprep.subr.bf16.mxu1 %v2220_v24  ;;  %v2298_v33 = vpop.permute.xlu1 %2297  ;;  %v2321_v41 = vmul.f32 %v2314_v32, %v2301_v63  ;;  %v2370_v24 = vrot.slane %v4934_v11, %v5698_v16 }
 0x64a   : > { %2600 = vmatpush1.bf16.msra.mxu1 %v2219_v56  ;;  %v2303_v60 = vsel %vm470_vm5, %v2290_v44, %v2298_v33  ;;  %v2307_v59 = vsel %vm470_vm5, %v2298_v33, %v2290_v44  ;;  %v2366_v56 = vrot.slane %v4934_v11, %v5696_v15 }
 0x64b   : > { %v2240_v51 = vpop.permute.xlu0 %2239  ;;  %2601 = vmatprep.subr.bf16.mxu1 %v2270_v62  ;;  %v2329_v17 = vpack.c.bf16 %v2323_v3, %v2321_v41  ;;  %v2325_v25 = vmul.f32 %v2314_v32, %v2303_v60 }
 0x64c   : > { %v2244_v30 = vsel %vm432_vm4, %v6906_v34, %v2240_v51  ;;  %v2248_v45 = vsel %vm432_vm4, %v2240_v51, %v6906_v34  ;;  %v2306_v34 = vsel %vm470_vm5, %v6933_v10, %v6877_v38 }
 0x64d   : > { %v2267_v40 = vmul.f32 %v2254_v55, %v2248_v45  ;;  %v2268_v1 = vmul.f32 %v2258_v28, %v2244_v30  ;;  %v2338_v47 = vpop.permute.xlu1 %2337  ;;  %v2318_v28 = vrot.slane %v4933_v5, %v5698_v16 }
 0x64e   : > { %2602 = vmatpush1.bf16.msra.mxu1 %v2269_v53 }
 0x64f   : > { %v2271_v50 = vpack.c.bf16 %v2267_v40, %v2265_v57  ;;  %v2348_v54 = vpop.permute.xlu0 %2347  ;;  %v2272_v7 = vpack.c.bf16 %v2268_v1, %v2266_v26  ;;  %v2324_v0 = vmul.f32 %v2318_v28, %v2306_v34  ;;  %v2322_v31 = vmul.f32 %v2318_v28, %v2305_v48 }
 0x650   : > { %v2358_v2 = vsel %vm504_vm6, %v2348_v54, %v6992_v12  ;;  %v2326_v62 = vmul.f32 %v2318_v28, %v2307_v59  ;;  %v2354_v53 = vsel %vm504_vm6, %v6992_v12, %v2348_v54 }
 0x651   : > { %2603 = vmatprep.subr.bf16.mxu1 %v2272_v7  ;;  %v2346_v6 = vpop.permute.xlu1 %2345  ;;  %v2330_v10 = vpack.c.bf16 %v2324_v0, %v2322_v31  ;;  %v2376_v30 = vmul.f32 %v2370_v24, %v2358_v2 }
 0x652   : > { %2604 = vmatpush1.bf16.msra.mxu1 %v2271_v50  ;;  %v2357_v46 = vsel %vm504_vm6, %v2346_v6, %v2338_v47  ;;  %v2353_v61 = vsel %vm504_vm6, %v2338_v47, %v2346_v6  ;;  %v2375_v47 = vmul.f32 %v2366_v56, %v2354_v53 }
 0x653   : > { %v7016_v23 = vpop.permute.xlu0 %2343  ;;  %2605 = vmatprep.subr.bf16.mxu1 %v2278_v8  ;;  %v2374_v52 = vmul.f32 %v2370_v24, %v2357_v46  ;;  %v2373_v45 = vmul.f32 %v2366_v56, %v2353_v61 }
 0x655   : > { %v2342_v22 = vpop.permute.xlu1 %2341  ;;  %v2382_v12 = vpack.c.bf16 %v2376_v30, %v2374_v52  ;;  %v2381_v5 = vpack.c.bf16 %v2375_v47, %v2373_v45  ;;  %v5209_v45 = vld [vmem:[#allocation8 + $0x60] ss:$12 sps:$4 sm:$0xff]  }
 0x656   : > { %2606 = vmatpush1.bf16.msra.mxu1 %v2277_v18 }
 0x657   : > { %v2392_v55 = vpop.permute.xlu0 %2391  ;;  %2607 = vmatprep.subr.bf16.mxu1 %v2280_v29 }
 0x659   : > { %v2350_v38 = vpop.permute.xlu1 %2349 }
 0x65a   : > { %2608 = vmatpush1.bf16.msra.mxu1 %v2279_v27  ;;  %v2355_v1 = vsel %vm504_vm6, %v2342_v22, %v2350_v38  ;;  %v2359_v50 = vsel %vm504_vm6, %v2350_v38, %v2342_v22 }
 0x65b   : > { %v2300_v19 = vpop.permute.xlu0 %2299  ;;  %2609 = vmatprep.subr.bf16.mxu1 %v2330_v10  ;;  %v2377_v6 = vmul.f32 %v2366_v56, %v2355_v1 }
 0x65c   : > { %v2304_v44 = vsel %vm470_vm5, %v6960_v37, %v2300_v19  ;;  %v2308_v33 = vsel %vm470_vm5, %v2300_v19, %v6960_v37  ;;  %v4935_v37 = vld [vmem:[%s8457_s6 + $0x7] ss:$8 sm:$0x3] }
 0x65d   : > { %v2327_v4 = vmul.f32 %v2314_v32, %v2304_v44  ;;  %v2328_v58 = vmul.f32 %v2318_v28, %v2308_v33  ;;  %v2390_v51 = vpop.permute.xlu1 %2389  ;;  %v2422_v8 = vrot.slane %v4935_v37, %v5698_v16  ;;  %v2378_v28 = vmul.f32 %v2370_v24, %v2359_v50 }
 0x65e   : > { %2610 = vmatpush1.bf16.msra.mxu1 %v2329_v17  ;;  %v2418_v31 = vrot.slane %v4935_v37, %v5696_v15 }
 0x65f   : > { %v2331_v57 = vpack.c.bf16 %v2327_v4, %v2325_v25  ;;  %v2400_v26 = vpop.permute.xlu0 %2399  ;;  %v2332_v40 = vpack.c.bf16 %v2328_v58, %v2326_v62  ;;  %v4936_v62 = vld [vmem:[%s8457_s6 + $0x10] ss:$8 sm:$0x3] }
 0x660   : > { %v2410_v48 = vsel %vm538_vm7, %v2400_v26, %v2392_v55  ;;  %v2406_v3 = vsel %vm538_vm7, %v2392_v55, %v2400_v26  ;;  %v2474_v53 = vrot.slane %v4936_v62, %v5698_v16 }
 0x661   : > { %v2398_v7 = vpop.permute.xlu1 %2397  ;;  %2611 = vmatprep.subr.bf16.mxu1 %v2332_v40  ;;  %v2428_v60 = vmul.f32 %v2422_v8, %v2410_v48  ;;  %v2427_v59 = vmul.f32 %v2418_v31, %v2406_v3  ;;  %v5212_v40 = vld [vmem:[#allocation8 + $0x7c] ss:$12 sps:$4 sm:$0xff]   ;;  %v5214_v48 = vld [vmem:[#allocation8 + $0x78] ss:$12 sps:$4 sm:$0xff]  }
 0x662   : > { %v2409_v54 = vsel %vm538_vm7, %v2398_v7, %v2390_v51  ;;  %2612 = vmatpush1.bf16.msra.mxu1 %v2331_v57  ;;  %v2405_v32 = vsel %vm538_vm7, %v2390_v51, %v2398_v7  ;;  %v2470_v51 = vrot.slane %v4936_v62, %v5696_v15 }
 0x663   : > { %v2352_v34 = vpop.permute.xlu0 %2351  ;;  %2613 = vmatprep.subr.bf16.mxu1 %v2382_v12  ;;  %v2426_v0 = vmul.f32 %v2422_v8, %v2409_v54  ;;  %v2425_v38 = vmul.f32 %v2418_v31, %v2405_v32 }
 0x664   : > { %v2356_v35 = vsel %vm504_vm6, %v7016_v23, %v2352_v34  ;;  %v2360_v18 = vsel %vm504_vm6, %v2352_v34, %v7016_v23 }
 0x665   : > { %v2379_v22 = vmul.f32 %v2366_v56, %v2356_v35  ;;  %v2380_v29 = vmul.f32 %v2370_v24, %v2360_v18  ;;  %v2394_v63 = vpop.permute.xlu1 %2393  ;;  %v2434_v23 = vpack.c.bf16 %v2428_v60, %v2426_v0  ;;  %v2433_v56 = vpack.c.bf16 %v2427_v59, %v2425_v38 }
 0x666   : > { %2614 = vmatpush1.bf16.msra.mxu1 %v2381_v5 }
 0x667   : > { %v2383_v11 = vpack.c.bf16 %v2379_v22, %v2377_v6  ;;  %v2396_v27 = vpop.permute.xlu0 %2395  ;;  %v2384_v41 = vpack.c.bf16 %v2380_v29, %v2378_v28 }
 0x669   : > { %v2402_v10 = vpop.permute.xlu1 %2401  ;;  %2615 = vmatprep.subr.bf16.mxu1 %v2384_v41  ;;  %v5216_v41 = vld [vmem:[#allocation8 + $0x80] ss:$12 sps:$4 sm:$0xff]  }
 0x66a   : > { %v2407_v46 = vsel %vm538_vm7, %v2394_v63, %v2402_v10  ;;  %v2411_v17 = vsel %vm538_vm7, %v2402_v10, %v2394_v63  ;;  %2616 = vmatpush1.bf16.msra.mxu1 %v2383_v11 }
 0x66b   : > { %v2404_v25 = vpop.permute.xlu0 %2403  ;;  %2617 = vmatprep.subr.bf16.mxu1 %v2434_v23  ;;  %v2429_v19 = vmul.f32 %v2418_v31, %v2407_v46  ;;  %v2430_v2 = vmul.f32 %v2422_v8, %v2411_v17 }
 0x66c   : > { %v2408_v55 = vsel %vm538_vm7, %v2396_v27, %v2404_v25  ;;  %v2412_v24 = vsel %vm538_vm7, %v2404_v25, %v2396_v27  ;;  %v5215_v27 = vld [vmem:[#allocation8 + $0x68] ss:$12 sps:$4 sm:$0xff]  }
 0x66d   : > { %v2431_v61 = vmul.f32 %v2418_v31, %v2408_v55  ;;  %v2432_v44 = vmul.f32 %v2422_v8, %v2412_v24  ;;  %v2442_v33 = vpop.permute.xlu1 %2441 }
 0x66e   : > { %2618 = vmatpush1.bf16.msra.mxu1 %v2433_v56 }
 0x66f   : > { %v2435_v52 = vpack.c.bf16 %v2431_v61, %v2429_v19  ;;  %v2444_v4 = vpop.permute.xlu0 %2443  ;;  %v2436_v58 = vpack.c.bf16 %v2432_v44, %v2430_v2 }
 0x671   : > { %v2450_v30 = vpop.permute.xlu1 %2449  ;;  %2619 = vmatprep.subr.bf16.mxu1 %v2436_v58 }
 0x672   : > { %v2457_v57 = vsel %vm572_vm8, %v2442_v33, %v2450_v30  ;;  %v2461_v26 = vsel %vm572_vm8, %v2450_v30, %v2442_v33  ;;  %2620 = vmatpush1.bf16.msra.mxu1 %v2435_v52 }
 0x673   : > { %v2452_v1 = vpop.permute.xlu0 %2451  ;;  %v2477_v50 = vmul.f32 %v2470_v51, %v2457_v57  ;;  %v2478_v7 = vmul.f32 %v2474_v53, %v2461_v26 }
 0x674   : > { %v2458_v37 = vsel %vm572_vm8, %v2444_v4, %v2452_v1  ;;  %v2462_v47 = vsel %vm572_vm8, %v2452_v1, %v2444_v4 }
 0x675   : > { %v2479_v12 = vmul.f32 %v2470_v51, %v2458_v37  ;;  %v2480_v54 = vmul.f32 %v2474_v53, %v2462_v47  ;;  %v2446_v5 = vpop.permute.xlu1 %2445  ;;  %2622 = vmatmul.mubr.bf16.vlgmr.msra.gmra.mrb[16].mxu1 %v5209_v45 }
 0x676   : > { %2631 = vmatprep.mubr.bf16.mxu1 %v5212_v40 }
 0x677   : > { %v2485_v6 = vpack.c.bf16 %v2479_v12, %v2477_v50  ;;  %v2448_v8 = vpop.permute.xlu0 %2447  ;;  %v2486_v34 = vpack.c.bf16 %v2480_v54, %v2478_v7 }
 0x679   : > { %v2454_v28 = vpop.permute.xlu1 %2453  ;;  %2642 = vmatprep.subr.bf16.mxu1 %v2486_v34 }
 0x67a   : > { %v2459_v35 = vsel %vm572_vm8, %v2446_v5, %v2454_v28  ;;  %v2463_v18 = vsel %vm572_vm8, %v2454_v28, %v2446_v5  ;;  %2643 = vmatpush1.bf16.msra.mxu1 %v2485_v6 }
 0x67b   : > { %v2456_v32 = vpop.permute.xlu0 %2455  ;;  %v2481_v29 = vmul.f32 %v2470_v51, %v2459_v35  ;;  %v2482_v63 = vmul.f32 %v2474_v53, %v2463_v18  ;;  %v7292_v35 = vld [vmem:[%s8455_s4] sm:$0xff] }
 0x67c   : > { %v2460_v0 = vsel %vm572_vm8, %v2448_v8, %v2456_v32  ;;  %v2464_v22 = vsel %vm572_vm8, %v2456_v32, %v2448_v8  ;;  %v2768_v18 = vld [vmem:[%s8457_s6] ss:$8 sm:$0x3]  ;;  %v5393_v32 = vmov 4  }
 0x67d   : > { %v2483_v31 = vmul.f32 %v2470_v51, %v2460_v0  ;;  %v2484_v3 = vmul.f32 %v2474_v53, %v2464_v22  ;;  %2632 = vmatmul.mubr.bf16.gmra.mrb[20].mxu1 %v5214_v48  ;;  %v7287_v48 = vld [vmem:[%s8455_s4 + $0x8] sm:$0xff]  ;;  %5179 = vset.pattern.permute.xlu0 %v5393_v32  ;;  %v7304_v22 = vld [vmem:[%s8455_s4 + $0x10] sm:$0xff] }
 0x67e   : > { %2674 = vmatprep.mubr.bf16.mxu1 %v5389_v9  ;;  %5180 = vset.pattern.permute.xlu1 %v5393_v32 }
 0x67f   : > { %v2487_v60 = vpack.c.bf16 %v2483_v31, %v2481_v29  ;;  %v2488_v11 = vpack.c.bf16 %v2484_v3, %v2482_v63  ;;  %v7309_v29 = vld [vmem:[%s8455_s4 + $0x18] sm:$0xff]  ;;  %v2773_v63 = vrot.slane %v2768_v18, %v5696_v15  ;;  %v2777_v31 = vrot.slane %v2768_v18, %v5698_v16 }
 0x681   : > { %2644 = vmatprep.subr.bf16.mxu1 %v2488_v11 }
 0x682   : > { %2645 = vmatpush1.bf16.msra.mxu1 %v2487_v60 }
 0x685   : > { %4943 = vmatmul.mubr.msk.bf16.vlgmr.msra.gmra.mrb[16].mxu1 %vm1264_vm9, %v5215_v27 }
 0x686   : > { %2684 = vmatprep.mubr.bf16.mxu1 %v5389_v9 }
 0x68a   : > { %v2536_v38 = vpop.permute.xlu1 %2535 }
 0x68c   : > { %v2541_v23 = vpop.permute.xlu0 %2540 }
 0x68d   : > { %4944 = vmatmul.mubr.msk.bf16.gmra.mrb[20].mxu1 %vm1264_vm9, %v5216_v41 }
 0x68e   : > { %v2546_v53 = vpop.permute.xlu1 %2545 }
 0x758   : > { %v2676_v10 = vpop.f32.mrb[16].mxu1 }
 0x759   : > { %v5023_v59 = vadd.f32 %v2676_v10, %v2536_v38  ;;  %v2678_v46 = vpop.f32.mrb[17].mxu1 }
 0x75a   : > { %v2680_v17 = vpop.f32.mrb[18].mxu1 }
 0x75b   : > { %v2695_v25 = vmax.f32 %v5023_v59, 0.0  ;;  %v5025_v56 = vadd.f32 %v2680_v17, %v2541_v23  ;;  %v2682_v55 = vpop.f32.mrb[19].mxu1 }
 0x75d   : > { %v7119_v24 = vadd.f32 %v2695_v25, %v6229_v49  ;;  %v2697_v19 = vmax.f32 %v5025_v56, 0.0  ;;  %v5024_v49 = vadd.f32 %v2678_v46, %v2536_v38 }
 0x75f   : > { %v7122_v2 = vadd.f32 %v2697_v19, %v6231_v39  ;;  %2744 = vrot.lane.b32.xlu0 %v7119_v24, %s5381_s9  ;;  %v5026_v39 = vadd.f32 %v2682_v55, %v2541_v23  ;;  %v2696_v52 = vmax.f32 %v5024_v49, 0.0 }
 0x760   : > { %v2686_v61 = vpop.f32.mrb[20].mxu1 }
 0x761   : > { %v2688_v44 = vpop.f32.mrb[21].mxu1  ;;  %2746 = vrot.lane.b32.xlu1 %v7122_v2, %s5381_s9  ;;  %v2698_v4 = vmax.f32 %v5026_v39, 0.0  ;;  %v7143_v58 = vadd.f32 %v2696_v52, %v6255_v20  ;;  %v5027_v30 = vadd.f32 %v2686_v61, %v2546_v53  ;;  %v2551_v20 = vpop.permute.xlu1 %2550 }
 0x762   : > { %v2690_v33 = vpop.f32.mrb[22].mxu1  ;;  %v5028_v1 = vadd.f32 %v2688_v44, %v2546_v53 }
 0x763   : > { %v2692_v62 = vpop.f32.mrb[23].mxu1  ;;  %2796 = vrot.lane.b32.xlu0 %v7119_v24, %s5382_s30  ;;  %v7148_v51 = vadd.f32 %v2698_v4, %v6259_v21  ;;  %v5029_v45 = vadd.f32 %v2690_v33, %v2551_v20  ;;  %v2699_v21 = vmax.f32 %v5027_v30, 0.0 }
 0x764   : > { %v2700_v37 = vmax.f32 %v5028_v1, 0.0 }
 0x765   : > { %2798 = vrot.lane.b32.xlu1 %v7122_v2, %s5382_s30  ;;  %v2701_v57 = vmax.f32 %v5029_v45, 0.0  ;;  %v7165_v26 = vadd.f32 %v2699_v21, %v6279_v42  ;;  %v5030_v42 = vadd.f32 %v2692_v62, %v2551_v20  ;;  %v4945_v20 = vld [vmem:[%s8457_s6 + $0x1] ss:$8 sm:$0x3] }
 0x766   : > { %v7187_v47 = vadd.f32 %v2700_v37, %v6303_v36  ;;  %v5219_v36 = vld [vmem:[#allocation8 + $0x94] ss:$12 sps:$4 sm:$0xff]   ;;  %v2829_v1 = vrot.slane %v4945_v20, %v5698_v16 }
 0x767   : > { %2848 = vrot.lane.b32.xlu0 %v7119_v24, %s5383_s16  ;;  %v7170_v40 = vadd.f32 %v2701_v57, %v6283_v43  ;;  %v2702_v43 = vmax.f32 %v5030_v42, 0.0  ;;  %3296 = vmatprep.mubr.bf16.mxu0 %v5219_v36 }
 0x769   : > { %2850 = vrot.lane.b32.xlu1 %v7122_v2, %s5383_s16  ;;  %v7192_v50 = vadd.f32 %v2702_v43, %v6307_v13  ;;  %v2825_v43 = vrot.slane %v4945_v20, %v5696_v15 }
 0x76b   : > { %2900 = vrot.lane.b32.xlu0 %v7119_v24, %s5384_s14 }
 0x76d   : > { %2902 = vrot.lane.b32.xlu1 %v7122_v2, %s5384_s14 }
 0x76f   : > { %2960 = vrot.lane.b32.xlu0 %v7119_v24, %s5385_s15 }
 0x771   : > { %2962 = vrot.lane.b32.xlu1 %v7122_v2, %s5385_s15 }
 0x773   : > { %2752 = vrot.lane.b32.xlu0 %v7143_v58, %s5381_s9 }
 0x775   : > { %2754 = vrot.lane.b32.xlu1 %v7148_v51, %s5381_s9 }
 0x777   : > { %2804 = vrot.lane.b32.xlu0 %v7143_v58, %s5382_s30 }
 0x779   : > { %2806 = vrot.lane.b32.xlu1 %v7148_v51, %s5382_s30 }
 0x77b   : > { %2856 = vrot.lane.b32.xlu0 %v7143_v58, %s5383_s16 }
 0x77d   : > { %2858 = vrot.lane.b32.xlu1 %v7148_v51, %s5383_s16 }
 0x77f   : > { %2908 = vrot.lane.b32.xlu0 %v7143_v58, %s5384_s14 }
 0x781   : > { %2910 = vrot.lane.b32.xlu1 %v7148_v51, %s5384_s14 }
 0x783   : > { %2748 = vrot.lane.b32.xlu0 %v7165_v26, %s5381_s9 }
 0x785   : > { %2750 = vrot.lane.b32.xlu1 %v7170_v40, %s5381_s9 }
 0x787   : > { %2800 = vrot.lane.b32.xlu0 %v7165_v26, %s5382_s30 }
 0x789   : > { %2802 = vrot.lane.b32.xlu1 %v7170_v40, %s5382_s30 }
 0x78b   : > { %2852 = vrot.lane.b32.xlu0 %v7165_v26, %s5383_s16 }
 0x78d   : > { %2854 = vrot.lane.b32.xlu1 %v7170_v40, %s5383_s16 }
 0x78f   : > { %2904 = vrot.lane.b32.xlu0 %v7165_v26, %s5384_s14 }
 0x791   : > { %2906 = vrot.lane.b32.xlu1 %v7170_v40, %s5384_s14 }
 0x793   : > { %2756 = vrot.lane.b32.xlu0 %v7187_v47, %s5381_s9 }
 0x795   : > { %2758 = vrot.lane.b32.xlu1 %v7192_v50, %s5381_s9 }
 0x797   : > { %2968 = vrot.lane.b32.xlu0 %v7143_v58, %s5385_s15 }
 0x799   : > { %2970 = vrot.lane.b32.xlu1 %v7148_v51, %s5385_s15 }
 0x79b   : > { %2808 = vrot.lane.b32.xlu0 %v7187_v47, %s5382_s30 }
 0x79d   : > { %2810 = vrot.lane.b32.xlu1 %v7192_v50, %s5382_s30 }
 0x79f   : > { %2860 = vrot.lane.b32.xlu0 %v7187_v47, %s5383_s16 }
 0x7a1   : > { %2966 = vrot.lane.b32.xlu1 %v7170_v40, %s5385_s15 }
 0x7a3   : > { %2912 = vrot.lane.b32.xlu0 %v7187_v47, %s5384_s14 }
 0x7a5   : > { %2862 = vrot.lane.b32.xlu1 %v7192_v50, %s5383_s16 }
 0x7a7   : > { %2964 = vrot.lane.b32.xlu0 %v7165_v26, %s5385_s15 }
 0x7a9   : > { %3014 = vrot.lane.b32.xlu1 %v7122_v2, %s8466_s29 }
 0x7ab   : > { %2972 = vrot.lane.b32.xlu0 %v7187_v47, %s5385_s15 }
 0x7ad   : > { %2914 = vrot.lane.b32.xlu1 %v7192_v50, %s5384_s14 }
 0x7af   : > { %3012 = vrot.lane.b32.xlu0 %v7119_v24, %s8466_s29 }
 0x7b1   : > { %3022 = vrot.lane.b32.xlu1 %v7148_v51, %s8466_s29 }
 0x7b3   : > { %3020 = vrot.lane.b32.xlu0 %v7143_v58, %s8466_s29 }
 0x7b5   : > { %3018 = vrot.lane.b32.xlu1 %v7170_v40, %s8466_s29 }
 0x7b7   : > { %3016 = vrot.lane.b32.xlu0 %v7165_v26, %s8466_s29 }
 0x7b9   : > { %3066 = vrot.lane.b32.xlu1 %v7122_v2, %s8480_s22 }
 0x7bb   : > { %3024 = vrot.lane.b32.xlu0 %v7187_v47, %s8466_s29 }
 0x7bd   : > { %2974 = vrot.lane.b32.xlu1 %v7192_v50, %s5385_s15 }
 0x7bf   : > { %3064 = vrot.lane.b32.xlu0 %v7119_v24, %s8480_s22 }
 0x7c1   : > { %3074 = vrot.lane.b32.xlu1 %v7148_v51, %s8480_s22 }
 0x7c3   : > { %3072 = vrot.lane.b32.xlu0 %v7143_v58, %s8480_s22 }
 0x7c5   : > { %3026 = vrot.lane.b32.xlu1 %v7192_v50, %s8466_s29 }
 0x7c7   : > { %3068 = vrot.lane.b32.xlu0 %v7165_v26, %s8480_s22 }
 0x7c9   : > { %3070 = vrot.lane.b32.xlu1 %v7170_v40, %s8480_s22 }
 0x7cb   : > { %3076 = vrot.lane.b32.xlu0 %v7187_v47, %s8480_s22 }
 0x7cd   : > { %3078 = vrot.lane.b32.xlu1 %v7192_v50, %s8480_s22 }
 0x7cf   : > { %3116 = vrot.lane.b32.xlu0 %v7119_v24, %s8479_s23 }
 0x7d1   : > { %3118 = vrot.lane.b32.xlu1 %v7122_v2, %s8479_s23  ;;  %v2745_v13 = vpop.permute.xlu0 %2744 }
 0x7d3   : > { %v2747_v7 = vpop.permute.xlu1 %2746  ;;  %3124 = vrot.lane.b32.xlu0 %v7143_v58, %s8479_s23 }
 0x7d5   : > { %3126 = vrot.lane.b32.xlu1 %v7148_v51, %s8479_s23  ;;  %v7262_v12 = vpop.permute.xlu0 %2796 }
 0x7d7   : > { %v7264_v54 = vpop.permute.xlu1 %2798  ;;  %3120 = vrot.lane.b32.xlu0 %v7165_v26, %s8479_s23 }
 0x7d9   : > { %3122 = vrot.lane.b32.xlu1 %v7170_v40, %s8479_s23  ;;  %v7270_v5 = vpop.permute.xlu0 %2848 }
 0x7db   : > { %v7272_v6 = vpop.permute.xlu1 %2850  ;;  %3128 = vrot.lane.b32.xlu0 %v7187_v47, %s8479_s23 }
 0x7dd   : > { %3130 = vrot.lane.b32.xlu1 %v7192_v50, %s8479_s23  ;;  %v7278_v8 = vpop.permute.xlu0 %2900 }
 0x7df   : > { %v7280_v34 = vpop.permute.xlu1 %2902  ;;  %3210 = vperm.xlu0 %5179, %v7292_v35  }
 0x7e1   : > { %v7282_v28 = vpop.permute.xlu0 %2960  ;;  %3215 = vperm.xlu1 %5180, %v7287_v48  }
 0x7e3   : > { %v7297_v0 = vpop.permute.xlu1 %2962  ;;  %3225 = vperm.xlu0 %5179, %v7309_v29  }
 0x7e5   : > { %v2753_v3 = vpop.permute.xlu0 %2752  ;;  %3220 = vperm.xlu1 %5180, %v7304_v22  }
 0x7e6   : > { %v2760_v60 = vsel %vm331_vm1, %v2745_v13, %v2753_v3  ;;  %v2764_v11 = vsel %vm331_vm1, %v2753_v3, %v2745_v13 }
 0x7e7   : > { %v2755_v27 = vpop.permute.xlu1 %2754  ;;  %v2780_v10 = vmul.f32 %v2773_v63, %v2764_v11  ;;  %v2781_v23 = vmul.f32 %v2777_v31, %v2760_v60 }
 0x7e8   : > { %v2761_v41 = vsel %vm331_vm1, %v2747_v7, %v2755_v27  ;;  %v2765_v38 = vsel %vm331_vm1, %v2755_v27, %v2747_v7 }
 0x7e9   : > { %v2782_v59 = vmul.f32 %v2773_v63, %v2765_v38  ;;  %v2783_v46 = vmul.f32 %v2777_v31, %v2761_v41  ;;  %v2805_v17 = vpop.permute.xlu0 %2804 }
 0x7ea   : > { %v2812_v36 = vsel %vm364_vm2, %v7262_v12, %v2805_v17 }
 0x7eb   : > { %v2788_v25 = vpack.c.bf16 %v2782_v59, %v2780_v10  ;;  %v2807_v56 = vpop.permute.xlu1 %2806  ;;  %v2789_v55 = vpack.c.bf16 %v2783_v46, %v2781_v23  ;;  %v2816_v10 = vsel %vm364_vm2, %v2805_v17, %v7262_v12  ;;  %v2833_v23 = vmul.f32 %v2829_v1, %v2812_v36 }
 0x7ec   : > { %v2813_v21 = vsel %vm364_vm2, %v7264_v54, %v2807_v56  ;;  %v2817_v7 = vsel %vm364_vm2, %v2807_v56, %v7264_v54  ;;  %v4946_v54 = vld [vmem:[%s8457_s6 + $0x2] ss:$8 sm:$0x3] }
 0x7ed   : > { %3264 = vmatprep.subr.bf16.mxu0 %v2789_v55  ;;  %v2857_v19 = vpop.permute.xlu0 %2856  ;;  %v2835_v18 = vmul.f32 %v2829_v1, %v2813_v21  ;;  %v2834_v59 = vmul.f32 %v2825_v43, %v2817_v7  ;;  %v2832_v55 = vmul.f32 %v2825_v43, %v2816_v10  ;;  %v2881_v12 = vrot.slane %v4946_v54, %v5698_v16 }
 0x7ee   : > { %3265 = vmatpush1.bf16.msra.mxu0 %v2788_v25  ;;  %v2877_v21 = vrot.slane %v4946_v54, %v5696_v15 }
 0x7ef   : > { %v2859_v61 = vpop.permute.xlu1 %2858  ;;  %v2840_v20 = vpack.c.bf16 %v2834_v59, %v2832_v55 }
 0x7f1   : > { %v7323_v44 = vpop.permute.xlu0 %2908 }
 0x7f3   : > { %v7325_v33 = vpop.permute.xlu1 %2910 }
 0x7f5   : > { %v2749_v62 = vpop.permute.xlu0 %2748 }
 0x7f7   : > { %v2751_v49 = vpop.permute.xlu1 %2750 }
 0x7f9   : > { %v2801_v39 = vpop.permute.xlu0 %2800 }
 0x7fb   : > { %v2803_v52 = vpop.permute.xlu1 %2802 }
 0x7fd   : > { %v7327_v4 = vpop.permute.xlu0 %2852 }
 0x7ff   : > { %v7329_v53 = vpop.permute.xlu1 %2854 }
 0x801   : > { %v7331_v30 = vpop.permute.xlu0 %2904 }
 0x803   : > { %v7336_v45 = vpop.permute.xlu1 %2906 }
 0x805   : > { %v2757_v57 = vpop.permute.xlu0 %2756 }
 0x806   : > { %v2762_v42 = vsel %vm331_vm1, %v2749_v62, %v2757_v57  ;;  %v2766_v37 = vsel %vm331_vm1, %v2757_v57, %v2749_v62  ;;  %v2841_v62 = vpack.c.bf16 %v2835_v18, %v2833_v23  ;;  %v2864_v57 = vsel %vm398_vm3, %v7270_v5, %v2857_v19 }
 0x807   : > { %v2759_v13 = vpop.permute.xlu1 %2758  ;;  %v2784_v60 = vmul.f32 %v2773_v63, %v2766_v37  ;;  %v2785_v11 = vmul.f32 %v2777_v31, %v2762_v42  ;;  %v2869_v37 = vsel %vm398_vm3, %v2859_v61, %v7272_v6 }
 0x808   : > { %v2763_v32 = vsel %vm331_vm1, %v2751_v49, %v2759_v13  ;;  %v2767_v3 = vsel %vm331_vm1, %v2759_v13, %v2751_v49 }
 0x809   : > { %v2786_v27 = vmul.f32 %v2773_v63, %v2767_v3  ;;  %v2787_v41 = vmul.f32 %v2777_v31, %v2763_v32  ;;  %v7357_v38 = vpop.permute.xlu0 %2968  ;;  %v2865_v63 = vsel %vm398_vm3, %v7272_v6, %v2859_v61  ;;  %v4947_v6 = vld [vmem:[%s8457_s6 + $0x3] ss:$8 sm:$0x3] }
 0x80a   : > { %v2887_v36 = vmul.f32 %v2881_v12, %v2865_v63  ;;  %v2921_v63 = vsel %vm432_vm4, %v7325_v33, %v7280_v34 }
 0x80b   : > { %v2790_v46 = vpack.c.bf16 %v2786_v27, %v2784_v60  ;;  %v7365_v25 = vpop.permute.xlu1 %2970  ;;  %v2791_v56 = vpack.c.bf16 %v2787_v41, %v2785_v11  ;;  %v2868_v11 = vsel %vm398_vm3, %v2857_v19, %v7270_v5  ;;  %v2885_v27 = vmul.f32 %v2881_v12, %v2864_v57 }
 0x80c   : > { %v2886_v41 = vmul.f32 %v2877_v21, %v2869_v37  ;;  %v2884_v23 = vmul.f32 %v2877_v21, %v2868_v11  ;;  %v2933_v19 = vrot.slane %v4947_v6, %v5698_v16  ;;  %v2929_v37 = vrot.slane %v4947_v6, %v5696_v15 }
 0x80d   : > { %3266 = vmatprep.subr.bf16.mxu0 %v2791_v56  ;;  %v2809_v31 = vpop.permute.xlu0 %2808  ;;  %v2893_v5 = vpack.c.bf16 %v2887_v36, %v2885_v27  ;;  %v2916_v56 = vsel %vm432_vm4, %v7278_v8, %v7323_v44 }
 0x80e   : > { %v2814_v17 = vsel %vm364_vm2, %v2801_v39, %v2809_v31  ;;  %v2818_v49 = vsel %vm364_vm2, %v2809_v31, %v2801_v39  ;;  %3267 = vmatpush1.bf16.msra.mxu0 %v2790_v46  ;;  %v2892_v46 = vpack.c.bf16 %v2886_v41, %v2884_v23 }
 0x80f   : > { %v2811_v42 = vpop.permute.xlu1 %2810  ;;  %3268 = vmatprep.subr.bf16.mxu0 %v2841_v62  ;;  %v2836_v7 = vmul.f32 %v2825_v43, %v2818_v49  ;;  %v2837_v18 = vmul.f32 %v2829_v1, %v2814_v17 }
 0x810   : > { %v2815_v13 = vsel %vm364_vm2, %v2803_v52, %v2811_v42  ;;  %v2819_v39 = vsel %vm364_vm2, %v2811_v42, %v2803_v52 }
 0x811   : > { %v2838_v32 = vmul.f32 %v2825_v43, %v2819_v39  ;;  %v2839_v3 = vmul.f32 %v2829_v1, %v2815_v13  ;;  %v2861_v60 = vpop.permute.xlu0 %2860  ;;  %v2917_v1 = vsel %vm432_vm4, %v7280_v34, %v7325_v33  ;;  %v2920_v34 = vsel %vm432_vm4, %v7323_v44, %v7278_v8 }
 0x812   : > { %3269 = vmatpush1.bf16.msra.mxu0 %v2840_v20  ;;  %v2866_v59 = vsel %vm398_vm3, %v7327_v4, %v2861_v60  ;;  %v2870_v54 = vsel %vm398_vm3, %v2861_v60, %v7327_v4  ;;  %v2939_v31 = vmul.f32 %v2933_v19, %v2917_v1  ;;  %v2937_v33 = vmul.f32 %v2933_v19, %v2916_v56  ;;  %v4948_v1 = vld [vmem:[%s8457_s6 + $0x5] ss:$8 sm:$0x3] }
 0x813   : > { %v2842_v61 = vpack.c.bf16 %v2838_v32, %v2836_v7  ;;  %v7392_v10 = vpop.permute.xlu1 %2966  ;;  %v2843_v52 = vpack.c.bf16 %v2839_v3, %v2837_v18  ;;  %v2888_v17 = vmul.f32 %v2877_v21, %v2870_v54  ;;  %v2889_v49 = vmul.f32 %v2881_v12, %v2866_v59 }
 0x814   : > { %v2938_v7 = vmul.f32 %v2929_v37, %v2921_v63  ;;  %v2945_v18 = vpack.c.bf16 %v2939_v31, %v2937_v33  ;;  %v2980_v54 = vsel %vm470_vm5, %v7357_v38, %v7282_v28  ;;  %v2955_v63 = vpack.c.bf16 %v7192_v50, %v7187_v47 }
 0x815   : > { %3270 = vmatprep.subr.bf16.mxu0 %v2843_v52  ;;  %v2913_v43 = vpop.permute.xlu0 %2912  ;;  %v2976_v31 = vsel %vm470_vm5, %v7282_v28, %v7357_v38  ;;  %v2954_v47 = vpack.c.bf16 %v7170_v40, %v7165_v26 }
 0x816   : > { %3271 = vmatpush1.bf16.msra.mxu0 %v2842_v61  ;;  %v2922_v32 = vsel %vm432_vm4, %v2913_v43, %v7331_v30 }
 0x817   : > { %v2863_v55 = vpop.permute.xlu1 %2862  ;;  %3272 = vmatprep.subr.bf16.mxu0 %v2893_v5  ;;  %v2940_v11 = vmul.f32 %v2929_v37, %v2922_v32  ;;  %v2953_v5 = vpack.c.bf16 %v7148_v51, %v7143_v58  ;;  %v2977_v58 = vsel %vm470_vm5, %v7297_v0, %v7365_v25  ;;  %v2952_v51 = vpack.c.bf16 %v7122_v2, %v7119_v24  ;;  %v4949_v2 = vld [vmem:[%s8457_s6 + $0x6] ss:$8 sm:$0x3] }
 0x818   : > { %v2867_v62 = vsel %vm398_vm3, %v7329_v53, %v2863_v55  ;;  %v2871_v4 = vsel %vm398_vm3, %v2863_v55, %v7329_v53 }
 0x819   : > { %v2890_v20 = vmul.f32 %v2877_v21, %v2871_v4  ;;  %v2891_v57 = vmul.f32 %v2881_v12, %v2867_v62  ;;  %v2965_v42 = vpop.permute.xlu0 %2964  ;;  %v2936_v21 = vmul.f32 %v2929_v37, %v2920_v34  ;;  %v2918_v12 = vsel %vm432_vm4, %v7331_v30, %v2913_v43 }
 0x81a   : > { %3273 = vmatpush1.bf16.msra.mxu0 %v2892_v46  ;;  %v2941_v27 = vmul.f32 %v2933_v19, %v2918_v12  ;;  %v2989_v46 = vrot.slane %v4948_v1, %v5696_v15 }
 0x81b   : > { %v2894_v36 = vpack.c.bf16 %v2890_v20, %v2888_v17  ;;  %v7424_v13 = vpop.permute.xlu1 %3014  ;;  %v2895_v39 = vpack.c.bf16 %v2891_v57, %v2889_v49  ;;  %v2944_v44 = vpack.c.bf16 %v2938_v7, %v2936_v21  ;;  %v3041_v57 = vrot.slane %v4949_v2, %v5696_v15 }
 0x81c   : > { %v2998_v4 = vmul.f32 %v2989_v46, %v2977_v58  ;;  %v2996_v50 = vmul.f32 %v2989_v46, %v2976_v31 }
 0x81d   : > { %3274 = vmatprep.subr.bf16.mxu0 %v2895_v39  ;;  %v2973_v53 = vpop.permute.xlu0 %2972 }
 0x81e   : > { %3275 = vmatpush1.bf16.msra.mxu0 %v2894_v36  ;;  %v2978_v24 = vsel %vm470_vm5, %v2965_v42, %v2973_v53  ;;  %v2982_v28 = vsel %vm470_vm5, %v2973_v53, %v2965_v42  ;;  %v3004_v49 = vpack.c.bf16 %v2998_v4, %v2996_v50 }
 0x81f   : > { %v2915_v8 = vpop.permute.xlu1 %2914  ;;  %3276 = vmatprep.subr.bf16.mxu0 %v2945_v18  ;;  %v3000_v20 = vmul.f32 %v2989_v46, %v2978_v24 }
 0x820   : > { %v2919_v3 = vsel %vm432_vm4, %v7336_v45, %v2915_v8  ;;  %v2923_v60 = vsel %vm432_vm4, %v2915_v8, %v7336_v45  ;;  %v2981_v45 = vsel %vm470_vm5, %v7365_v25, %v7297_v0 }
 0x821   : > { %v2942_v41 = vmul.f32 %v2929_v37, %v2923_v60  ;;  %v2943_v6 = vmul.f32 %v2933_v19, %v2919_v3  ;;  %v3013_v61 = vpop.permute.xlu0 %3012  ;;  %v2993_v19 = vrot.slane %v4948_v1, %v5698_v16  ;;  %v3045_v37 = vrot.slane %v4949_v2, %v5698_v16 }
 0x822   : > { %3277 = vmatpush1.bf16.msra.mxu0 %v2944_v44 }
 0x823   : > { %v2946_v52 = vpack.c.bf16 %v2942_v41, %v2940_v11  ;;  %v3023_v30 = vpop.permute.xlu1 %3022  ;;  %v2947_v23 = vpack.c.bf16 %v2943_v6, %v2941_v27  ;;  %v2999_v56 = vmul.f32 %v2993_v19, %v2981_v45  ;;  %v2997_v62 = vmul.f32 %v2993_v19, %v2980_v54 }
 0x824   : > { %v3033_v26 = vsel %vm504_vm6, %v3023_v30, %v7424_v13  ;;  %v3001_v36 = vmul.f32 %v2993_v19, %v2982_v28  ;;  %v3029_v21 = vsel %vm504_vm6, %v7424_v13, %v3023_v30 }
 0x825   : > { %3278 = vmatprep.subr.bf16.mxu0 %v2947_v23  ;;  %v3021_v43 = vpop.permute.xlu0 %3020  ;;  %v3005_v25 = vpack.c.bf16 %v2999_v56, %v2997_v62  ;;  %v3051_v12 = vmul.f32 %v3045_v37, %v3033_v26  ;;  %v3050_v11 = vmul.f32 %v3041_v57, %v3029_v21  ;;  %v4951_v26 = vld [vmem:[%s8457_s6 + $0x10] ss:$8 sm:$0x3] }
 0x826   : > { %3279 = vmatpush1.bf16.msra.mxu0 %v2946_v52  ;;  %v3032_v38 = vsel %vm504_vm6, %v3021_v43, %v3013_v61  ;;  %v3028_v40 = vsel %vm504_vm6, %v3013_v61, %v3021_v43 }
 0x827   : > { %v7448_v59 = vpop.permute.xlu1 %3018  ;;  %3280 = vmatprep.subr.bf16.mxu0 %v2953_v5  ;;  %v3049_v39 = vmul.f32 %v3045_v37, %v3032_v38  ;;  %v3048_v32 = vmul.f32 %v3041_v57, %v3028_v40 }
 0x829   : > { %v3017_v55 = vpop.permute.xlu0 %3016  ;;  %v3057_v13 = vpack.c.bf16 %v3051_v12, %v3049_v39  ;;  %v3056_v61 = vpack.c.bf16 %v3050_v11, %v3048_v32  ;;  %v3149_v39 = vrot.slane %v4951_v26, %v5698_v16  ;;  %v5220_v12 = vld [vmem:[#allocation8 + $0xac] ss:$12 sps:$4 sm:$0xff]  }
 0x82a   : > { %3281 = vmatpush1.bf16.msra.mxu0 %v2952_v51 }
 0x82b   : > { %v3067_v17 = vpop.permute.xlu1 %3066  ;;  %3282 = vmatprep.subr.bf16.mxu0 %v2955_v63 }
 0x82d   : > { %v3025_v0 = vpop.permute.xlu0 %3024 }
 0x82e   : > { %3283 = vmatpush1.bf16.msra.mxu0 %v2954_v47  ;;  %v3030_v60 = vsel %vm504_vm6, %v3017_v55, %v3025_v0  ;;  %v3034_v27 = vsel %vm504_vm6, %v3025_v0, %v3017_v55 }
 0x82f   : > { %v2975_v34 = vpop.permute.xlu1 %2974  ;;  %3284 = vmatprep.subr.bf16.mxu0 %v3005_v25  ;;  %v3052_v52 = vmul.f32 %v3041_v57, %v3030_v60  ;;  %v3053_v1 = vmul.f32 %v3045_v37, %v3034_v27 }
 0x830   : > { %v2979_v42 = vsel %vm470_vm5, %v7392_v10, %v2975_v34  ;;  %v2983_v33 = vsel %vm470_vm5, %v2975_v34, %v7392_v10  ;;  %v4950_v10 = vld [vmem:[%s8457_s6 + $0x7] ss:$8 sm:$0x3] }
 0x831   : > { %v3002_v7 = vmul.f32 %v2989_v46, %v2979_v42  ;;  %v3003_v53 = vmul.f32 %v2993_v19, %v2983_v33  ;;  %v3065_v18 = vpop.permute.xlu0 %3064  ;;  %v3097_v30 = vrot.slane %v4950_v10, %v5698_v16  ;;  %v3093_v56 = vrot.slane %v4950_v10, %v5696_v15 }
 0x832   : > { %3285 = vmatpush1.bf16.msra.mxu0 %v3004_v49 }
 0x833   : > { %v3006_v8 = vpack.c.bf16 %v3002_v7, %v3000_v20  ;;  %v3075_v44 = vpop.permute.xlu1 %3074  ;;  %v3007_v3 = vpack.c.bf16 %v3003_v53, %v3001_v36  ;;  %v3145_v36 = vrot.slane %v4951_v26, %v5696_v15  ;;  %v5217_v53 = vld [vmem:[#allocation8 + $0x90] ss:$12 sps:$4 sm:$0xff]  }
 0x834   : > { %v3085_v43 = vsel %vm538_vm7, %v3075_v44, %v3067_v17  ;;  %v3081_v55 = vsel %vm538_vm7, %v3067_v17, %v3075_v44 }
 0x835   : > { %v3073_v41 = vpop.permute.xlu0 %3072  ;;  %3286 = vmatprep.subr.bf16.mxu0 %v3007_v3  ;;  %v3103_v63 = vmul.f32 %v3097_v30, %v3085_v43  ;;  %v3102_v47 = vmul.f32 %v3093_v56, %v3081_v55  ;;  %v5224_v55 = vld [vmem:[#allocation8 + $0xb0] ss:$12 sps:$4 sm:$0xff]  }
 0x836   : > { %v3084_v6 = vsel %vm538_vm7, %v3073_v41, %v3065_v18  ;;  %3287 = vmatpush1.bf16.msra.mxu0 %v3006_v8  ;;  %v3080_v19 = vsel %vm538_vm7, %v3065_v18, %v3073_v41 }
 0x837   : > { %v3027_v23 = vpop.permute.xlu1 %3026  ;;  %3288 = vmatprep.subr.bf16.mxu0 %v3057_v13  ;;  %v3101_v54 = vmul.f32 %v3097_v30, %v3084_v6  ;;  %v3100_v24 = vmul.f32 %v3093_v56, %v3080_v19 }
 0x838   : > { %v3031_v5 = vsel %vm504_vm6, %v7448_v59, %v3027_v23  ;;  %v3035_v45 = vsel %vm504_vm6, %v3027_v23, %v7448_v59 }
 0x839   : > { %v3054_v58 = vmul.f32 %v3041_v57, %v3031_v5  ;;  %v3055_v51 = vmul.f32 %v3045_v37, %v3035_v45  ;;  %v3069_v46 = vpop.permute.xlu0 %3068  ;;  %v3109_v59 = vpack.c.bf16 %v3103_v63, %v3101_v54  ;;  %v3108_v28 = vpack.c.bf16 %v3102_v47, %v3100_v24 }
 0x83a   : > { %3289 = vmatpush1.bf16.msra.mxu0 %v3056_v61 }
 0x83b   : > { %v3058_v31 = vpack.c.bf16 %v3054_v58, %v3052_v52  ;;  %v3071_v62 = vpop.permute.xlu1 %3070  ;;  %v3059_v4 = vpack.c.bf16 %v3055_v51, %v3053_v1  ;;  %v5222_v52 = vld [vmem:[#allocation8 + $0xa8] ss:$12 sps:$4 sm:$0xff]  }
 0x83d   : > { %v3077_v2 = vpop.permute.xlu0 %3076  ;;  %3290 = vmatprep.subr.bf16.mxu0 %v3059_v4 }
 0x83e   : > { %v3082_v50 = vsel %vm538_vm7, %v3069_v46, %v3077_v2  ;;  %v3086_v0 = vsel %vm538_vm7, %v3077_v2, %v3069_v46  ;;  %3291 = vmatpush1.bf16.msra.mxu0 %v3058_v31 }
 0x83f   : > { %v3079_v25 = vpop.permute.xlu1 %3078  ;;  %3292 = vmatprep.subr.bf16.mxu0 %v3109_v59  ;;  %v3104_v49 = vmul.f32 %v3093_v56, %v3082_v50  ;;  %v3105_v20 = vmul.f32 %v3097_v30, %v3086_v0 }
 0x840   : > { %v3083_v17 = vsel %vm538_vm7, %v3071_v62, %v3079_v25  ;;  %v3087_v38 = vsel %vm538_vm7, %v3079_v25, %v3071_v62 }
 0x841   : > { %v3106_v57 = vmul.f32 %v3093_v56, %v3083_v17  ;;  %v3107_v37 = vmul.f32 %v3097_v30, %v3087_v38  ;;  %v3117_v34 = vpop.permute.xlu0 %3116  ;;  %v5223_v56 = vld [vmem:[#allocation8 + $0x98] ss:$12 sps:$4 sm:$0xff]  }
 0x842   : > { %3293 = vmatpush1.bf16.msra.mxu0 %v3108_v28 }
 0x843   : > { %v3110_v40 = vpack.c.bf16 %v3106_v57, %v3104_v49  ;;  %v3119_v42 = vpop.permute.xlu1 %3118  ;;  %v3111_v33 = vpack.c.bf16 %v3107_v37, %v3105_v20 }
 0x845   : > { %v3125_v7 = vpop.permute.xlu0 %3124  ;;  %3294 = vmatprep.subr.bf16.mxu0 %v3111_v33 }
 0x846   : > { %v3132_v18 = vsel %vm572_vm8, %v3117_v34, %v3125_v7  ;;  %v3136_v21 = vsel %vm572_vm8, %v3125_v7, %v3117_v34  ;;  %3295 = vmatpush1.bf16.msra.mxu0 %v3110_v40 }
 0x847   : > { %v3127_v32 = vpop.permute.xlu1 %3126  ;;  %v3152_v3 = vmul.f32 %v3145_v36, %v3132_v18  ;;  %v3153_v60 = vmul.f32 %v3149_v39, %v3136_v21  ;;  %v5227_v21 = vld [vmem:[#allocation8 + $0xc4] ss:$12 sps:$4 sm:$0xff]  }
 0x848   : > { %v3133_v8 = vsel %vm572_vm8, %v3119_v42, %v3127_v32  ;;  %v3137_v44 = vsel %vm572_vm8, %v3127_v32, %v3119_v42  ;;  %3955 = vmatprep.mubr.bf16.mxu1 %v5227_v21 }
 0x849   : > { %v3154_v10 = vmul.f32 %v3145_v36, %v3133_v8  ;;  %v3155_v11 = vmul.f32 %v3149_v39, %v3137_v44  ;;  %v3121_v27 = vpop.permute.xlu0 %3120  ;;  %3297 = vmatmul.mubr.bf16.vlgmr.msra.gmra.mrb[16].mxu0 %v5217_v53 }
 0x84a   : > { %3306 = vmatprep.mubr.bf16.mxu0 %v5220_v12 }
 0x84b   : > { %v3160_v41 = vpack.c.bf16 %v3154_v10, %v3152_v3  ;;  %v3123_v13 = vpop.permute.xlu1 %3122  ;;  %v3161_v6 = vpack.c.bf16 %v3155_v11, %v3153_v60 }
 0x84d   : > { %v3129_v61 = vpop.permute.xlu0 %3128  ;;  %3317 = vmatprep.subr.bf16.mxu0 %v3161_v6 }
 0x84e   : > { %v3134_v30 = vsel %vm572_vm8, %v3121_v27, %v3129_v61  ;;  %v3138_v23 = vsel %vm572_vm8, %v3129_v61, %v3121_v27  ;;  %3318 = vmatpush1.bf16.msra.mxu0 %v3160_v41  ;;  %v3427_v41 = vld [vmem:[%s8457_s6] ss:$8 sm:$0x3] }
 0x84f   : > { %v3131_v1 = vpop.permute.xlu1 %3130  ;;  %v3156_v45 = vmul.f32 %v3145_v36, %v3134_v30  ;;  %v3157_v19 = vmul.f32 %v3149_v39, %v3138_v23  ;;  %v3432_v61 = vrot.slane %v3427_v41, %v5696_v15 }
 0x850   : > { %v3135_v43 = vsel %vm572_vm8, %v3123_v13, %v3131_v1  ;;  %v3139_v5 = vsel %vm572_vm8, %v3131_v1, %v3123_v13  ;;  %v5394_v13 = vmov 5  }
 0x851   : > { %v3158_v54 = vmul.f32 %v3145_v36, %v3135_v43  ;;  %v3159_v58 = vmul.f32 %v3149_v39, %v3139_v5  ;;  %3307 = vmatmul.mubr.bf16.gmra.mrb[20].mxu0 %v5222_v52  ;;  %5181 = vset.pattern.permute.xlu1 %v5394_v13  ;;  %v3436_v52 = vrot.slane %v3427_v41, %v5698_v16 }
 0x852   : > { %3349 = vmatprep.mubr.bf16.mxu0 %v5389_v9  ;;  %5182 = vset.pattern.permute.xlu0 %v5394_v13 }
 0x853   : > { %v3162_v51 = vpack.c.bf16 %v3158_v54, %v3156_v45  ;;  %v3163_v46 = vpack.c.bf16 %v3159_v58, %v3157_v19 }
 0x855   : > { %3319 = vmatprep.subr.bf16.mxu0 %v3163_v46 }
 0x856   : > { %3320 = vmatpush1.bf16.msra.mxu0 %v3162_v51 }
 0x859   : > { %4958 = vmatmul.mubr.msk.bf16.vlgmr.msra.gmra.mrb[16].mxu0 %vm1264_vm9, %v5223_v56 }
 0x85a   : > { %3359 = vmatprep.mubr.bf16.mxu0 %v5389_v9 }
 0x85e   : > { %v3211_v63 = vpop.permute.xlu0 %3210 }
 0x860   : > { %v3216_v24 = vpop.permute.xlu1 %3215 }
 0x861   : > { %4959 = vmatmul.mubr.msk.bf16.gmra.mrb[20].mxu0 %vm1264_vm9, %v5224_v55 }
 0x862   : > { %v3226_v40 = vpop.permute.xlu0 %3225 }
 0x864   : > { %v3221_v34 = vpop.permute.xlu1 %3220 }
 0x92c   : > { %v3351_v31 = vpop.f32.mrb[16].mxu0 }
 0x92d   : > { %v5031_v62 = vadd.f32 %v3351_v31, %v3211_v63  ;;  %v3353_v4 = vpop.f32.mrb[17].mxu0 }
 0x92e   : > { %v3355_v2 = vpop.f32.mrb[18].mxu0  ;;  %v5032_v49 = vadd.f32 %v3353_v4, %v3211_v63 }
 0x92f   : > { %v7550_v59 = vmax.f32 %v5031_v62, 0.0  ;;  %v5033_v47 = vadd.f32 %v3355_v2, %v3216_v24  ;;  %v3357_v50 = vpop.f32.mrb[19].mxu0 }
 0x930   : > { %v5034_v20 = vadd.f32 %v3357_v50, %v3216_v24  ;;  %v7572_v57 = vmax.f32 %v5032_v49, 0.0 }
 0x931   : > { %v7552_v0 = vmax.f32 %v5033_v47, 0.0  ;;  %3403 = vrot.lane.b32.xlu1 %v7550_v59, %s5381_s9 }
 0x932   : > { %v7576_v37 = vmax.f32 %v5034_v20, 0.0 }
 0x933   : > { %3405 = vrot.lane.b32.xlu0 %v7552_v0, %s5381_s9 }
 0x934   : > { %v3361_v25 = vpop.f32.mrb[20].mxu0 }
 0x935   : > { %v3363_v28 = vpop.f32.mrb[21].mxu0  ;;  %3455 = vrot.lane.b32.xlu1 %v7550_v59, %s5382_s30  ;;  %v5035_v26 = vadd.f32 %v3361_v25, %v3221_v34 }
 0x936   : > { %v3365_v17 = vpop.f32.mrb[22].mxu0  ;;  %v5036_v39 = vadd.f32 %v3363_v28, %v3221_v34 }
 0x937   : > { %v3367_v38 = vpop.f32.mrb[23].mxu0  ;;  %3457 = vrot.lane.b32.xlu0 %v7552_v0, %s5382_s30  ;;  %v5037_v42 = vadd.f32 %v3365_v17, %v3226_v40  ;;  %v7592_v33 = vmax.f32 %v5035_v26, 0.0 }
 0x938   : > { %v5038_v7 = vadd.f32 %v3367_v38, %v3226_v40  ;;  %v7612_v53 = vmax.f32 %v5036_v39, 0.0 }
 0x939   : > { %3507 = vrot.lane.b32.xlu1 %v7550_v59, %s5383_s16  ;;  %v7596_v36 = vmax.f32 %v5037_v42, 0.0 }
 0x93a   : > { %v7616_v18 = vmax.f32 %v5038_v7, 0.0 }
 0x93b   : > { %3509 = vrot.lane.b32.xlu0 %v7552_v0, %s5383_s16 }
 0x93d   : > { %3559 = vrot.lane.b32.xlu1 %v7550_v59, %s5384_s14 }
 0x93f   : > { %3561 = vrot.lane.b32.xlu0 %v7552_v0, %s5384_s14 }
 0x941   : > { %3619 = vrot.lane.b32.xlu1 %v7550_v59, %s5385_s15 }
 0x943   : > { %3621 = vrot.lane.b32.xlu0 %v7552_v0, %s5385_s15 }
 0x945   : > { %3411 = vrot.lane.b32.xlu1 %v7572_v57, %s5381_s9 }
 0x947   : > { %3413 = vrot.lane.b32.xlu0 %v7576_v37, %s5381_s9 }
 0x949   : > { %3463 = vrot.lane.b32.xlu1 %v7572_v57, %s5382_s30 }
 0x94b   : > { %3465 = vrot.lane.b32.xlu0 %v7576_v37, %s5382_s30 }
 0x94d   : > { %3515 = vrot.lane.b32.xlu1 %v7572_v57, %s5383_s16 }
 0x94f   : > { %3517 = vrot.lane.b32.xlu0 %v7576_v37, %s5383_s16 }
 0x951   : > { %3567 = vrot.lane.b32.xlu1 %v7572_v57, %s5384_s14 }
 0x953   : > { %3569 = vrot.lane.b32.xlu0 %v7576_v37, %s5384_s14 }
 0x955   : > { %3407 = vrot.lane.b32.xlu1 %v7592_v33, %s5381_s9 }
 0x957   : > { %3409 = vrot.lane.b32.xlu0 %v7596_v36, %s5381_s9 }
 0x959   : > { %3459 = vrot.lane.b32.xlu1 %v7592_v33, %s5382_s30 }
 0x95b   : > { %3461 = vrot.lane.b32.xlu0 %v7596_v36, %s5382_s30 }
 0x95d   : > { %3511 = vrot.lane.b32.xlu1 %v7592_v33, %s5383_s16 }
 0x95f   : > { %3513 = vrot.lane.b32.xlu0 %v7596_v36, %s5383_s16 }
 0x961   : > { %3563 = vrot.lane.b32.xlu1 %v7592_v33, %s5384_s14 }
 0x963   : > { %3565 = vrot.lane.b32.xlu0 %v7596_v36, %s5384_s14 }
 0x965   : > { %3415 = vrot.lane.b32.xlu1 %v7612_v53, %s5381_s9 }
 0x967   : > { %3417 = vrot.lane.b32.xlu0 %v7616_v18, %s5381_s9 }
 0x969   : > { %3627 = vrot.lane.b32.xlu1 %v7572_v57, %s5385_s15 }
 0x96b   : > { %3629 = vrot.lane.b32.xlu0 %v7576_v37, %s5385_s15 }
 0x96d   : > { %3467 = vrot.lane.b32.xlu1 %v7612_v53, %s5382_s30 }
 0x96f   : > { %3469 = vrot.lane.b32.xlu0 %v7616_v18, %s5382_s30 }
 0x971   : > { %3519 = vrot.lane.b32.xlu1 %v7612_v53, %s5383_s16 }
 0x973   : > { %3625 = vrot.lane.b32.xlu0 %v7596_v36, %s5385_s15 }
 0x975   : > { %3571 = vrot.lane.b32.xlu1 %v7612_v53, %s5384_s14 }
 0x977   : > { %3521 = vrot.lane.b32.xlu0 %v7616_v18, %s5383_s16 }
 0x979   : > { %3623 = vrot.lane.b32.xlu1 %v7592_v33, %s5385_s15 }
 0x97b   : > { %3673 = vrot.lane.b32.xlu0 %v7552_v0, %s8481_s21 }
 0x97d   : > { %3631 = vrot.lane.b32.xlu1 %v7612_v53, %s5385_s15 }
 0x97f   : > { %3573 = vrot.lane.b32.xlu0 %v7616_v18, %s5384_s14 }
 0x981   : > { %3671 = vrot.lane.b32.xlu1 %v7550_v59, %s8481_s21 }
 0x983   : > { %3681 = vrot.lane.b32.xlu0 %v7576_v37, %s8481_s21 }
 0x985   : > { %3679 = vrot.lane.b32.xlu1 %v7572_v57, %s8481_s21 }
 0x987   : > { %3677 = vrot.lane.b32.xlu0 %v7596_v36, %s8481_s21 }
 0x989   : > { %3675 = vrot.lane.b32.xlu1 %v7592_v33, %s8481_s21 }
 0x98b   : > { %3725 = vrot.lane.b32.xlu0 %v7552_v0, %s8480_s22 }
 0x98d   : > { %3683 = vrot.lane.b32.xlu1 %v7612_v53, %s8481_s21 }
 0x98f   : > { %3633 = vrot.lane.b32.xlu0 %v7616_v18, %s5385_s15 }
 0x991   : > { %3723 = vrot.lane.b32.xlu1 %v7550_v59, %s8480_s22 }
 0x993   : > { %3733 = vrot.lane.b32.xlu0 %v7576_v37, %s8480_s22 }
 0x995   : > { %3731 = vrot.lane.b32.xlu1 %v7572_v57, %s8480_s22 }
 0x997   : > { %3685 = vrot.lane.b32.xlu0 %v7616_v18, %s8481_s21 }
 0x999   : > { %3727 = vrot.lane.b32.xlu1 %v7592_v33, %s8480_s22 }
 0x99b   : > { %3729 = vrot.lane.b32.xlu0 %v7596_v36, %s8480_s22 }
 0x99d   : > { %3735 = vrot.lane.b32.xlu1 %v7612_v53, %s8480_s22 }
 0x99f   : > { %3737 = vrot.lane.b32.xlu0 %v7616_v18, %s8480_s22 }
 0x9a1   : > { %3775 = vrot.lane.b32.xlu1 %v7550_v59, %s8479_s23 }
 0x9a3   : > { %3777 = vrot.lane.b32.xlu0 %v7552_v0, %s8479_s23  ;;  %v3404_v12 = vpop.permute.xlu1 %3403 }
 0x9a5   : > { %v3406_v32 = vpop.permute.xlu0 %3405  ;;  %3783 = vrot.lane.b32.xlu1 %v7572_v57, %s8479_s23 }
 0x9a7   : > { %3785 = vrot.lane.b32.xlu0 %v7576_v37, %s8479_s23  ;;  %v7686_v8 = vpop.permute.xlu1 %3455 }
 0x9a9   : > { %v3458_v44 = vpop.permute.xlu0 %3457  ;;  %3779 = vrot.lane.b32.xlu1 %v7592_v33, %s8479_s23 }
 0x9ab   : > { %3781 = vrot.lane.b32.xlu0 %v7596_v36, %s8479_s23  ;;  %v7692_v3 = vpop.permute.xlu1 %3507 }
 0x9ad   : > { %v7694_v60 = vpop.permute.xlu0 %3509  ;;  %3787 = vrot.lane.b32.xlu1 %v7612_v53, %s8479_s23 }
 0x9af   : > { %3789 = vrot.lane.b32.xlu0 %v7616_v18, %s8479_s23  ;;  %v7700_v10 = vpop.permute.xlu1 %3559 }
 0x9b1   : > { %v7702_v11 = vpop.permute.xlu0 %3561  ;;  %3869 = vperm.xlu1 %5181, %v7292_v35  }
 0x9b3   : > { %v7704_v27 = vpop.permute.xlu1 %3619  ;;  %3874 = vperm.xlu0 %5182, %v7287_v48  }
 0x9b5   : > { %v7709_v6 = vpop.permute.xlu0 %3621  ;;  %3879 = vperm.xlu1 %5181, %v7304_v22  }
 0x9b7   : > { %v3412_v30 = vpop.permute.xlu1 %3411 }
 0x9b8   : > { %v3419_v23 = vsel %vm331_vm1, %v3404_v12, %v3412_v30  ;;  %v3423_v1 = vsel %vm331_vm1, %v3412_v30, %v3404_v12 }
 0x9b9   : > { %v3414_v43 = vpop.permute.xlu0 %3413  ;;  %v3439_v35 = vmul.f32 %v3432_v61, %v3423_v1  ;;  %v3440_v45 = vmul.f32 %v3436_v52, %v3419_v23  ;;  %3884 = vperm.xlu1 %5181, %v7309_v29   ;;  %v4960_v29 = vld [vmem:[%s8457_s6 + $0x1] ss:$8 sm:$0x3] }
 0x9ba   : > { %v3420_v5 = vsel %vm331_vm1, %v3406_v32, %v3414_v43  ;;  %v3424_v48 = vsel %vm331_vm1, %v3414_v43, %v3406_v32  ;;  %v3488_v49 = vrot.slane %v4960_v29, %v5698_v16  ;;  %v3484_v26 = vrot.slane %v4960_v29, %v5696_v15 }
 0x9bb   : > { %v3441_v19 = vmul.f32 %v3432_v61, %v3424_v48  ;;  %v3442_v54 = vmul.f32 %v3436_v52, %v3420_v5  ;;  %v3464_v58 = vpop.permute.xlu1 %3463 }
 0x9bc   : > { %v3471_v40 = vsel %vm364_vm2, %v7686_v8, %v3464_v58  ;;  %v3475_v1 = vsel %vm364_vm2, %v3464_v58, %v7686_v8 }
 0x9bd   : > { %v3447_v51 = vpack.c.bf16 %v3441_v19, %v3439_v35  ;;  %v3466_v46 = vpop.permute.xlu0 %3465  ;;  %v3448_v56 = vpack.c.bf16 %v3442_v54, %v3440_v45  ;;  %v3492_v43 = vmul.f32 %v3488_v49, %v3471_v40  ;;  %v3491_v19 = vmul.f32 %v3484_v26, %v3475_v1 }
 0x9be   : > { %v3472_v17 = vsel %vm364_vm2, %v3458_v44, %v3466_v46  ;;  %v3476_v39 = vsel %vm364_vm2, %v3466_v46, %v3458_v44  ;;  %v4961_v44 = vld [vmem:[%s8457_s6 + $0x2] ss:$8 sm:$0x3] }
 0x9bf   : > { %3923 = vmatprep.subr.bf16.mxu1 %v3448_v56  ;;  %v3516_v55 = vpop.permute.xlu1 %3515  ;;  %v3494_v7 = vmul.f32 %v3488_v49, %v3472_v17  ;;  %v3493_v5 = vmul.f32 %v3484_v26, %v3476_v39  ;;  %v3540_v8 = vrot.slane %v4961_v44, %v5698_v16  ;;  %v3536_v56 = vrot.slane %v4961_v44, %v5696_v15 }
 0x9c0   : > { %3924 = vmatpush1.bf16.msra.mxu1 %v3447_v51 }
 0x9c1   : > { %v3518_v22 = vpop.permute.xlu0 %3517  ;;  %v3500_v54 = vpack.c.bf16 %v3494_v7, %v3492_v43  ;;  %v3499_v46 = vpack.c.bf16 %v3493_v5, %v3491_v19  ;;  %v3527_v7 = vsel %vm398_vm3, %v3516_v55, %v7692_v3 }
 0x9c2   : > { %v3528_v29 = vsel %vm398_vm3, %v3518_v22, %v7694_v60 }
 0x9c3   : > { %v7725_v63 = vpop.permute.xlu1 %3567 }
 0x9c4   : > { %v3575_v43 = vsel %vm432_vm4, %v7700_v10, %v7725_v63 }
 0x9c5   : > { %v7727_v31 = vpop.permute.xlu0 %3569 }
 0x9c6   : > { %v3580_v44 = vsel %vm432_vm4, %v7727_v31, %v7702_v11 }
 0x9c7   : > { %v3408_v62 = vpop.permute.xlu1 %3407 }
 0x9c9   : > { %v3410_v4 = vpop.permute.xlu0 %3409 }
 0x9cb   : > { %v3460_v24 = vpop.permute.xlu1 %3459 }
 0x9cd   : > { %v3462_v2 = vpop.permute.xlu0 %3461 }
 0x9cf   : > { %v7729_v47 = vpop.permute.xlu1 %3511 }
 0x9d1   : > { %v7731_v50 = vpop.permute.xlu0 %3513 }
 0x9d3   : > { %v7733_v25 = vpop.permute.xlu1 %3563 }
 0x9d5   : > { %v7738_v28 = vpop.permute.xlu0 %3565 }
 0x9d7   : > { %v3416_v38 = vpop.permute.xlu1 %3415 }
 0x9d8   : > { %v3421_v20 = vsel %vm331_vm1, %v3408_v62, %v3416_v38  ;;  %v3425_v34 = vsel %vm331_vm1, %v3416_v38, %v3408_v62  ;;  %v3523_v62 = vsel %vm398_vm3, %v7692_v3, %v3516_v55 }
 0x9d9   : > { %v3418_v42 = vpop.permute.xlu0 %3417  ;;  %v3443_v32 = vmul.f32 %v3432_v61, %v3425_v34  ;;  %v3444_v41 = vmul.f32 %v3436_v52, %v3421_v20 }
 0x9da   : > { %v3422_v21 = vsel %vm331_vm1, %v3410_v4, %v3418_v42  ;;  %v3426_v12 = vsel %vm331_vm1, %v3418_v42, %v3410_v4 }
 0x9db   : > { %v3445_v13 = vmul.f32 %v3432_v61, %v3426_v12  ;;  %v3446_v30 = vmul.f32 %v3436_v52, %v3422_v21  ;;  %v7757_v23 = vpop.permute.xlu1 %3627  ;;  %v3524_v61 = vsel %vm398_vm3, %v7694_v60, %v3518_v22  ;;  %v3544_v21 = vmul.f32 %v3540_v8, %v3523_v62  ;;  %v4962_v60 = vld [vmem:[%s8457_s6 + $0x3] ss:$8 sm:$0x3] }
 0x9dc   : > { %v3546_v17 = vmul.f32 %v3540_v8, %v3524_v61  ;;  %v3545_v12 = vmul.f32 %v3536_v56, %v3528_v29  ;;  %v3592_v55 = vrot.slane %v4962_v60, %v5698_v16 }
 0x9dd   : > { %v3449_v48 = vpack.c.bf16 %v3445_v13, %v3443_v32  ;;  %v7765_v35 = vpop.permute.xlu0 %3629  ;;  %v3450_v45 = vpack.c.bf16 %v3446_v30, %v3444_v41  ;;  %v3543_v41 = vmul.f32 %v3536_v56, %v3527_v7 }
 0x9de   : > { %v3552_v3 = vpack.c.bf16 %v3546_v17, %v3544_v21 }
 0x9df   : > { %3925 = vmatprep.subr.bf16.mxu1 %v3450_v45  ;;  %v3468_v52 = vpop.permute.xlu1 %3467  ;;  %v3551_v1 = vpack.c.bf16 %v3545_v12, %v3543_v41 }
 0x9e0   : > { %v3473_v58 = vsel %vm364_vm2, %v3460_v24, %v3468_v52  ;;  %v3477_v51 = vsel %vm364_vm2, %v3468_v52, %v3460_v24  ;;  %3926 = vmatpush1.bf16.msra.mxu1 %v3449_v48 }
 0x9e1   : > { %v3470_v4 = vpop.permute.xlu0 %3469  ;;  %3927 = vmatprep.subr.bf16.mxu1 %v3500_v54  ;;  %v3495_v20 = vmul.f32 %v3484_v26, %v3477_v51  ;;  %v3496_v34 = vmul.f32 %v3488_v49, %v3473_v58  ;;  %v3588_v51 = vrot.slane %v4962_v60, %v5696_v15  ;;  %v4963_v60 = vld [vmem:[%s8457_s6 + $0x5] ss:$8 sm:$0x3] }
 0x9e2   : > { %v3474_v38 = vsel %vm364_vm2, %v3462_v2, %v3470_v4  ;;  %v3478_v24 = vsel %vm364_vm2, %v3470_v4, %v3462_v2  ;;  %v3652_v41 = vrot.slane %v4963_v60, %v5698_v16 }
 0x9e3   : > { %v3497_v40 = vmul.f32 %v3484_v26, %v3478_v24  ;;  %v3498_v42 = vmul.f32 %v3488_v49, %v3474_v38  ;;  %v3520_v39 = vpop.permute.xlu1 %3519  ;;  %v3576_v49 = vsel %vm432_vm4, %v7702_v11, %v7727_v31  ;;  %v3579_v11 = vsel %vm432_vm4, %v7725_v63, %v7700_v10 }
 0x9e4   : > { %3928 = vmatpush1.bf16.msra.mxu1 %v3499_v46  ;;  %v3525_v13 = vsel %vm398_vm3, %v7729_v47, %v3520_v39  ;;  %v3529_v30 = vsel %vm398_vm3, %v3520_v39, %v7729_v47  ;;  %v3598_v48 = vmul.f32 %v3592_v55, %v3576_v49  ;;  %v3596_v31 = vmul.f32 %v3592_v55, %v3575_v43 }
 0x9e5   : > { %v3501_v22 = vpack.c.bf16 %v3497_v40, %v3495_v20  ;;  %v7792_v32 = vpop.permute.xlu0 %3625  ;;  %v3502_v2 = vpack.c.bf16 %v3498_v42, %v3496_v34  ;;  %v3547_v19 = vmul.f32 %v3536_v56, %v3529_v30  ;;  %v3548_v61 = vmul.f32 %v3540_v8, %v3525_v13 }
 0x9e6   : > { %v3597_v29 = vmul.f32 %v3588_v51, %v3580_v44  ;;  %v3604_v17 = vpack.c.bf16 %v3598_v48, %v3596_v31  ;;  %v3648_v13 = vrot.slane %v4963_v60, %v5696_v15  ;;  %v3614_v43 = vpack.c.bf16 %v7616_v18, %v7612_v53 }
 0x9e7   : > { %3929 = vmatprep.subr.bf16.mxu1 %v3502_v2  ;;  %v3572_v26 = vpop.permute.xlu1 %3571  ;;  %v3612_v2 = vpack.c.bf16 %v7576_v37, %v7572_v57 }
 0x9e8   : > { %3930 = vmatpush1.bf16.msra.mxu1 %v3501_v22  ;;  %v3581_v38 = vsel %vm432_vm4, %v3572_v26, %v7733_v25 }
 0x9e9   : > { %v3522_v5 = vpop.permute.xlu0 %3521  ;;  %3931 = vmatprep.subr.bf16.mxu1 %v3552_v3  ;;  %v3599_v34 = vmul.f32 %v3588_v51, %v3581_v38  ;;  %v3636_v3 = vsel %vm470_vm5, %v7709_v6, %v7765_v35 }
 0x9ea   : > { %v3526_v45 = vsel %vm398_vm3, %v7731_v50, %v3522_v5  ;;  %v3530_v47 = vsel %vm398_vm3, %v3522_v5, %v7731_v50  ;;  %v3635_v5 = vsel %vm470_vm5, %v7704_v27, %v7757_v23  ;;  %v3657_v48 = vmul.f32 %v3648_v13, %v3636_v3 }
 0x9eb   : > { %v3549_v52 = vmul.f32 %v3536_v56, %v3530_v47  ;;  %v3550_v54 = vmul.f32 %v3540_v8, %v3526_v45  ;;  %v3624_v58 = vpop.permute.xlu1 %3623  ;;  %v3595_v56 = vmul.f32 %v3588_v51, %v3579_v11  ;;  %v3577_v8 = vsel %vm432_vm4, %v7733_v25, %v3572_v26 }
 0x9ec   : > { %3932 = vmatpush1.bf16.msra.mxu1 %v3551_v1  ;;  %v3600_v40 = vmul.f32 %v3592_v55, %v3577_v8  ;;  %v3639_v26 = vsel %vm470_vm5, %v7757_v23, %v7704_v27  ;;  %v3613_v47 = vpack.c.bf16 %v7596_v36, %v7592_v33 }
 0x9ed   : > { %v3553_v46 = vpack.c.bf16 %v3549_v52, %v3547_v19  ;;  %v7824_v62 = vpop.permute.xlu0 %3673  ;;  %v3554_v4 = vpack.c.bf16 %v3550_v54, %v3548_v61  ;;  %v3603_v63 = vpack.c.bf16 %v3597_v29, %v3595_v56  ;;  %v3656_v44 = vmul.f32 %v3652_v41, %v3639_v26 }
 0x9ee   : > { %v3655_v19 = vmul.f32 %v3648_v13, %v3635_v5 }
 0x9ef   : > { %3933 = vmatprep.subr.bf16.mxu1 %v3554_v4  ;;  %v3632_v50 = vpop.permute.xlu1 %3631 }
 0x9f0   : > { %3934 = vmatpush1.bf16.msra.mxu1 %v3553_v46  ;;  %v3641_v27 = vsel %vm470_vm5, %v3632_v50, %v3624_v58  ;;  %v3663_v54 = vpack.c.bf16 %v3657_v48, %v3655_v19 }
 0x9f1   : > { %v3574_v10 = vpop.permute.xlu0 %3573  ;;  %3935 = vmatprep.subr.bf16.mxu1 %v3604_v17  ;;  %v3660_v17 = vmul.f32 %v3652_v41, %v3641_v27 }
 0x9f2   : > { %v3578_v24 = vsel %vm432_vm4, %v7738_v28, %v3574_v10  ;;  %v3582_v20 = vsel %vm432_vm4, %v3574_v10, %v7738_v28  ;;  %v3640_v28 = vsel %vm470_vm5, %v7765_v35, %v7709_v6  ;;  %v3637_v6 = vsel %vm470_vm5, %v3624_v58, %v3632_v50  ;;  %v4964_v35 = vld [vmem:[%s8457_s6 + $0x6] ss:$8 sm:$0x3] }
 0x9f3   : > { %v3601_v42 = vmul.f32 %v3588_v51, %v3582_v20  ;;  %v3602_v39 = vmul.f32 %v3592_v55, %v3578_v24  ;;  %v3672_v7 = vpop.permute.xlu1 %3671  ;;  %v3611_v55 = vpack.c.bf16 %v7552_v0, %v7550_v59  ;;  %v3658_v30 = vmul.f32 %v3652_v41, %v3640_v28 }
 0x9f4   : > { %3936 = vmatpush1.bf16.msra.mxu1 %v3603_v63  ;;  %v3659_v51 = vmul.f32 %v3648_v13, %v3637_v6  ;;  %v3700_v11 = vrot.slane %v4964_v35, %v5696_v15  ;;  %v3704_v31 = vrot.slane %v4964_v35, %v5698_v16 }
 0x9f5   : > { %v3605_v21 = vpack.c.bf16 %v3601_v42, %v3599_v34  ;;  %v3682_v25 = vpop.permute.xlu0 %3681  ;;  %v3606_v12 = vpack.c.bf16 %v3602_v39, %v3600_v40  ;;  %v3664_v52 = vpack.c.bf16 %v3658_v30, %v3656_v44 }
 0x9f6   : > { %v3692_v4 = vsel %vm504_vm6, %v3682_v25, %v7824_v62  ;;  %v3688_v63 = vsel %vm504_vm6, %v7824_v62, %v3682_v25 }
 0x9f7   : > { %3937 = vmatprep.subr.bf16.mxu1 %v3606_v12  ;;  %v3680_v22 = vpop.permute.xlu1 %3679  ;;  %v3710_v24 = vmul.f32 %v3704_v31, %v3692_v4 }
 0x9f8   : > { %3938 = vmatpush1.bf16.msra.mxu1 %v3605_v21  ;;  %v3691_v23 = vsel %vm504_vm6, %v3680_v22, %v3672_v7  ;;  %v3687_v29 = vsel %vm504_vm6, %v3672_v7, %v3680_v22  ;;  %v3709_v7 = vmul.f32 %v3700_v11, %v3688_v63 }
 0x9f9   : > { %v7848_v49 = vpop.permute.xlu0 %3677  ;;  %3939 = vmatprep.subr.bf16.mxu1 %v3612_v2  ;;  %v3708_v56 = vmul.f32 %v3704_v31, %v3691_v23  ;;  %v3707_v20 = vmul.f32 %v3700_v11, %v3687_v29 }
 0x9fb   : > { %v3676_v1 = vpop.permute.xlu1 %3675  ;;  %v3716_v62 = vpack.c.bf16 %v3710_v24, %v3708_v56  ;;  %v3715_v60 = vpack.c.bf16 %v3709_v7, %v3707_v20  ;;  %v5225_v20 = vld [vmem:[#allocation8 + $0xc0] ss:$12 sps:$4 sm:$0xff]  }
 0x9fc   : > { %3940 = vmatpush1.bf16.msra.mxu1 %v3611_v55 }
 0x9fd   : > { %v3726_v45 = vpop.permute.xlu0 %3725  ;;  %3941 = vmatprep.subr.bf16.mxu1 %v3614_v43 }
 0x9ff   : > { %v3684_v61 = vpop.permute.xlu1 %3683 }
 0xa00   : > { %3942 = vmatpush1.bf16.msra.mxu1 %v3613_v47  ;;  %v3689_v39 = vsel %vm504_vm6, %v3676_v1, %v3684_v61  ;;  %v3693_v21 = vsel %vm504_vm6, %v3684_v61, %v3676_v1 }
 0xa01   : > { %v3634_v46 = vpop.permute.xlu0 %3633  ;;  %3943 = vmatprep.subr.bf16.mxu1 %v3664_v52  ;;  %v3711_v22 = vmul.f32 %v3700_v11, %v3689_v39 }
 0xa02   : > { %v3638_v58 = vsel %vm470_vm5, %v7792_v32, %v3634_v46  ;;  %v3642_v50 = vsel %vm470_vm5, %v3634_v46, %v7792_v32  ;;  %v4965_v32 = vld [vmem:[%s8457_s6 + $0x7] ss:$8 sm:$0x3] }
 0xa03   : > { %v3661_v8 = vmul.f32 %v3648_v13, %v3638_v58  ;;  %v3662_v38 = vmul.f32 %v3652_v41, %v3642_v50  ;;  %v3724_v10 = vpop.permute.xlu1 %3723  ;;  %v3756_v2 = vrot.slane %v4965_v32, %v5698_v16  ;;  %v3712_v41 = vmul.f32 %v3704_v31, %v3693_v21 }
 0xa04   : > { %3944 = vmatpush1.bf16.msra.mxu1 %v3663_v54  ;;  %v3752_v44 = vrot.slane %v4965_v32, %v5696_v15 }
 0xa05   : > { %v3665_v34 = vpack.c.bf16 %v3661_v8, %v3659_v51  ;;  %v3734_v40 = vpop.permute.xlu0 %3733  ;;  %v3666_v42 = vpack.c.bf16 %v3662_v38, %v3660_v17  ;;  %v4966_v17 = vld [vmem:[%s8457_s6 + $0x10] ss:$8 sm:$0x3] }
 0xa06   : > { %v3744_v26 = vsel %vm538_vm7, %v3734_v40, %v3726_v45  ;;  %v3740_v48 = vsel %vm538_vm7, %v3726_v45, %v3734_v40  ;;  %v3808_v63 = vrot.slane %v4966_v17, %v5698_v16 }
 0xa07   : > { %v3732_v12 = vpop.permute.xlu1 %3731  ;;  %3945 = vmatprep.subr.bf16.mxu1 %v3666_v42  ;;  %v3762_v6 = vmul.f32 %v3756_v2, %v3744_v26  ;;  %v3761_v27 = vmul.f32 %v3752_v44, %v3740_v48  ;;  %v5228_v42 = vld [vmem:[#allocation8 + $0xdc] ss:$12 sps:$4 sm:$0xff]   ;;  %v5230_v26 = vld [vmem:[#allocation8 + $0xd8] ss:$12 sps:$4 sm:$0xff]  }
 0xa08   : > { %v3743_v25 = vsel %vm538_vm7, %v3732_v12, %v3724_v10  ;;  %3946 = vmatpush1.bf16.msra.mxu1 %v3665_v34  ;;  %v3739_v13 = vsel %vm538_vm7, %v3724_v10, %v3732_v12  ;;  %v3804_v10 = vrot.slane %v4966_v17, %v5696_v15 }
 0xa09   : > { %v3686_v28 = vpop.permute.xlu0 %3685  ;;  %3947 = vmatprep.subr.bf16.mxu1 %v3716_v62  ;;  %v3760_v30 = vmul.f32 %v3756_v2, %v3743_v25  ;;  %v3759_v61 = vmul.f32 %v3752_v44, %v3739_v13 }
 0xa0a   : > { %v3690_v3 = vsel %vm504_vm6, %v7848_v49, %v3686_v28  ;;  %v3694_v55 = vsel %vm504_vm6, %v3686_v28, %v7848_v49 }
 0xa0b   : > { %v3713_v1 = vmul.f32 %v3700_v11, %v3690_v3  ;;  %v3714_v43 = vmul.f32 %v3704_v31, %v3694_v55  ;;  %v3728_v5 = vpop.permute.xlu1 %3727  ;;  %v3768_v49 = vpack.c.bf16 %v3762_v6, %v3760_v30  ;;  %v3767_v11 = vpack.c.bf16 %v3761_v27, %v3759_v61 }
 0xa0c   : > { %3948 = vmatpush1.bf16.msra.mxu1 %v3715_v60 }
 0xa0d   : > { %v3717_v35 = vpack.c.bf16 %v3713_v1, %v3711_v22  ;;  %v3730_v47 = vpop.permute.xlu0 %3729  ;;  %v3718_v19 = vpack.c.bf16 %v3714_v43, %v3712_v41 }
 0xa0f   : > { %v3736_v52 = vpop.permute.xlu1 %3735  ;;  %3949 = vmatprep.subr.bf16.mxu1 %v3718_v19  ;;  %v5232_v19 = vld [vmem:[#allocation8 + $0xe0] ss:$12 sps:$4 sm:$0xff]  }
 0xa10   : > { %v3741_v23 = vsel %vm538_vm7, %v3728_v5, %v3736_v52  ;;  %v3745_v54 = vsel %vm538_vm7, %v3736_v52, %v3728_v5  ;;  %3950 = vmatpush1.bf16.msra.mxu1 %v3717_v35 }
 0xa11   : > { %v3738_v51 = vpop.permute.xlu0 %3737  ;;  %3951 = vmatprep.subr.bf16.mxu1 %v3768_v49  ;;  %v3763_v46 = vmul.f32 %v3752_v44, %v3741_v23  ;;  %v3764_v4 = vmul.f32 %v3756_v2, %v3745_v54 }
 0xa12   : > { %v3742_v45 = vsel %vm538_vm7, %v3730_v47, %v3738_v51  ;;  %v3746_v31 = vsel %vm538_vm7, %v3738_v51, %v3730_v47  ;;  %v5231_v47 = vld [vmem:[#allocation8 + $0xc8] ss:$12 sps:$4 sm:$0xff]  }
 0xa13   : > { %v3765_v29 = vmul.f32 %v3752_v44, %v3742_v45  ;;  %v3766_v58 = vmul.f32 %v3756_v2, %v3746_v31  ;;  %v3776_v50 = vpop.permute.xlu1 %3775 }
 0xa14   : > { %3952 = vmatpush1.bf16.msra.mxu1 %v3767_v11 }
 0xa15   : > { %v3769_v56 = vpack.c.bf16 %v3765_v29, %v3763_v46  ;;  %v3778_v8 = vpop.permute.xlu0 %3777  ;;  %v3770_v38 = vpack.c.bf16 %v3766_v58, %v3764_v4 }
 0xa17   : > { %v3784_v24 = vpop.permute.xlu1 %3783  ;;  %3953 = vmatprep.subr.bf16.mxu1 %v3770_v38 }
 0xa18   : > { %v3791_v34 = vsel %vm572_vm8, %v3776_v50, %v3784_v24  ;;  %v3795_v40 = vsel %vm572_vm8, %v3784_v24, %v3776_v50  ;;  %3954 = vmatpush1.bf16.msra.mxu1 %v3769_v56 }
 0xa19   : > { %v3786_v39 = vpop.permute.xlu0 %3785  ;;  %v3811_v21 = vmul.f32 %v3804_v10, %v3791_v34  ;;  %v3812_v12 = vmul.f32 %v3808_v63, %v3795_v40 }
 0xa1a   : > { %v3792_v32 = vsel %vm572_vm8, %v3778_v8, %v3786_v39  ;;  %v3796_v7 = vsel %vm572_vm8, %v3786_v39, %v3778_v8 }
 0xa1b   : > { %v3813_v62 = vmul.f32 %v3804_v10, %v3792_v32  ;;  %v3814_v25 = vmul.f32 %v3808_v63, %v3796_v7  ;;  %v3780_v60 = vpop.permute.xlu1 %3779  ;;  %3956 = vmatmul.mubr.bf16.vlgmr.msra.gmra.mrb[24].mxu1 %v5225_v20  ;;  %v5235_v7 = vld [vmem:[#allocation8 + $0xf4] ss:$12 sps:$4 sm:$0xff]  }
 0xa1c   : > { %3965 = vmatprep.mubr.bf16.mxu1 %v5228_v42  ;;  %4614 = vmatprep.mubr.bf16.mxu0 %v5235_v7  ;;  %v4975_v7 = vld [vmem:[%s8457_s6 + $0x1] ss:$8 sm:$0x3] }
 0xa1d   : > { %v3819_v22 = vpack.c.bf16 %v3813_v62, %v3811_v21  ;;  %v3782_v2 = vpop.permute.xlu0 %3781  ;;  %v3820_v28 = vpack.c.bf16 %v3814_v25, %v3812_v12 }
 0xa1f   : > { %v3788_v41 = vpop.permute.xlu1 %3787  ;;  %3976 = vmatprep.subr.bf16.mxu1 %v3820_v28 }
 0xa20   : > { %v3793_v3 = vsel %vm572_vm8, %v3780_v60, %v3788_v41  ;;  %v3797_v55 = vsel %vm572_vm8, %v3788_v41, %v3780_v60  ;;  %3977 = vmatpush1.bf16.msra.mxu1 %v3819_v22 }
 0xa21   : > { %v3790_v13 = vpop.permute.xlu0 %3789  ;;  %v3815_v43 = vmul.f32 %v3804_v10, %v3793_v3  ;;  %v3816_v5 = vmul.f32 %v3808_v63, %v3797_v55  ;;  %v4522_v3 = vld [vmem:[%s8455_s4] sm:$0xff] }
 0xa22   : > { %v3794_v30 = vsel %vm572_vm8, %v3782_v2, %v3790_v13  ;;  %v3798_v1 = vsel %vm572_vm8, %v3790_v13, %v3782_v2  ;;  %v4086_v55 = vld [vmem:[%s8457_s6] ss:$8 sm:$0x3]  ;;  %v5395_v13 = vmov 6  }
 0xa23   : > { %v3817_v44 = vmul.f32 %v3804_v10, %v3794_v30  ;;  %v3818_v48 = vmul.f32 %v3808_v63, %v3798_v1  ;;  %3966 = vmatmul.mubr.bf16.gmra.mrb[28].mxu1 %v5230_v26  ;;  %v4523_v26 = vld [vmem:[%s8455_s4 + $0x8] sm:$0xff]  ;;  %5183 = vset.pattern.permute.xlu0 %v5395_v13  ;;  %v4524_v1 = vld [vmem:[%s8455_s4 + $0x10] sm:$0xff] }
 0xa24   : > { %4008 = vmatprep.mubr.bf16.mxu1 %v5389_v9  ;;  %5184 = vset.pattern.permute.xlu1 %v5395_v13  ;;  %v4147_v13 = vrot.slane %v4975_v7, %v5698_v16 }
 0xa25   : > { %v3821_v6 = vpack.c.bf16 %v3817_v44, %v3815_v43  ;;  %v3822_v35 = vpack.c.bf16 %v3818_v48, %v3816_v5  ;;  %v4525_v43 = vld [vmem:[%s8455_s4 + $0x18] sm:$0xff]  ;;  %v4091_v5 = vrot.slane %v4086_v55, %v5696_v15  ;;  %v4095_v44 = vrot.slane %v4086_v55, %v5698_v16 }
 0xa26   : > { %v4143_v55 = vrot.slane %v4975_v7, %v5696_v15 }
 0xa27   : > { %3978 = vmatprep.subr.bf16.mxu1 %v3822_v35 }
 0xa28   : > { %3979 = vmatpush1.bf16.msra.mxu1 %v3821_v6 }
 0xa2b   : > { %4973 = vmatmul.mubr.msk.bf16.vlgmr.msra.gmra.mrb[24].mxu1 %vm1264_vm9, %v5231_v47 }
 0xa2c   : > { %4018 = vmatprep.mubr.bf16.mxu1 %v5389_v9 }
 0xa30   : > { %v3870_v61 = vpop.permute.xlu1 %3869 }
 0xa32   : > { %v3875_v49 = vpop.permute.xlu0 %3874 }
 0xa33   : > { %4974 = vmatmul.mubr.msk.bf16.gmra.mrb[28].mxu1 %vm1264_vm9, %v5232_v19 }
 0xa34   : > { %4758 = vmatprep.mubr.bf16.mxu1 %v5389_v9  ;;  %v3880_v38 = vpop.permute.xlu1 %3879 }
 0xa38   : > { %v3885_v63 = vpop.permute.xlu1 %3884 }
 0xafe   : > { %v4010_v52 = vpop.f32.mrb[24].mxu1 }
 0xaff   : > { %v5039_v27 = vadd.f32 %v4010_v52, %v3870_v61  ;;  %v4012_v23 = vpop.f32.mrb[25].mxu1 }
 0xb00   : > { %v4014_v54 = vpop.f32.mrb[26].mxu1  ;;  %v5040_v50 = vadd.f32 %v4012_v23, %v3870_v61 }
 0xb01   : > { %v7951_v51 = vmax.f32 %v5039_v27, 0.0  ;;  %v5041_v11 = vadd.f32 %v4014_v54, %v3875_v49  ;;  %v4016_v45 = vpop.f32.mrb[27].mxu1 }
 0xb02   : > { %v5042_v17 = vadd.f32 %v4016_v45, %v3875_v49  ;;  %v7973_v56 = vmax.f32 %v5040_v50, 0.0 }
 0xb03   : > { %v7953_v31 = vmax.f32 %v5041_v11, 0.0  ;;  %4062 = vrot.lane.b32.xlu0 %v7951_v51, %s5381_s9 }
 0xb04   : > { %v7977_v8 = vmax.f32 %v5042_v17, 0.0 }
 0xb05   : > { %4064 = vrot.lane.b32.xlu1 %v7953_v31, %s5381_s9 }
 0xb06   : > { %v4020_v46 = vpop.f32.mrb[28].mxu1 }
 0xb07   : > { %v4022_v4 = vpop.f32.mrb[29].mxu1  ;;  %4114 = vrot.lane.b32.xlu0 %v7951_v51, %s5382_s30  ;;  %v5043_v10 = vadd.f32 %v4020_v46, %v3880_v38 }
 0xb08   : > { %v4024_v29 = vpop.f32.mrb[30].mxu1  ;;  %v5044_v40 = vadd.f32 %v4022_v4, %v3880_v38 }
 0xb09   : > { %v4026_v58 = vpop.f32.mrb[31].mxu1  ;;  %4116 = vrot.lane.b32.xlu1 %v7953_v31, %s5382_s30  ;;  %v5045_v24 = vadd.f32 %v4024_v29, %v3885_v63  ;;  %v7993_v20 = vmax.f32 %v5043_v10, 0.0 }
 0xb0a   : > { %v5046_v42 = vadd.f32 %v4026_v58, %v3885_v63  ;;  %v8013_v39 = vmax.f32 %v5044_v40, 0.0 }
 0xb0b   : > { %4166 = vrot.lane.b32.xlu0 %v7951_v51, %s5383_s16  ;;  %v7997_v34 = vmax.f32 %v5045_v24, 0.0 }
 0xb0c   : > { %v8017_v32 = vmax.f32 %v5046_v42, 0.0 }
 0xb0d   : > { %4168 = vrot.lane.b32.xlu1 %v7953_v31, %s5383_s16 }
 0xb0f   : > { %4218 = vrot.lane.b32.xlu0 %v7951_v51, %s5384_s14 }
 0xb11   : > { %4220 = vrot.lane.b32.xlu1 %v7953_v31, %s5384_s14 }
 0xb13   : > { %4278 = vrot.lane.b32.xlu0 %v7951_v51, %s5385_s15 }
 0xb15   : > { %4280 = vrot.lane.b32.xlu1 %v7953_v31, %s5385_s15 }
 0xb17   : > { %4070 = vrot.lane.b32.xlu0 %v7973_v56, %s5381_s9 }
 0xb19   : > { %4072 = vrot.lane.b32.xlu1 %v7977_v8, %s5381_s9 }
 0xb1b   : > { %4122 = vrot.lane.b32.xlu0 %v7973_v56, %s5382_s30 }
 0xb1d   : > { %4124 = vrot.lane.b32.xlu1 %v7977_v8, %s5382_s30 }
 0xb1f   : > { %4174 = vrot.lane.b32.xlu0 %v7973_v56, %s5383_s16 }
 0xb21   : > { %4176 = vrot.lane.b32.xlu1 %v7977_v8, %s5383_s16 }
 0xb23   : > { %4226 = vrot.lane.b32.xlu0 %v7973_v56, %s5384_s14 }
 0xb25   : > { %4228 = vrot.lane.b32.xlu1 %v7977_v8, %s5384_s14 }
 0xb27   : > { %4066 = vrot.lane.b32.xlu0 %v7993_v20, %s5381_s9 }
 0xb29   : > { %4068 = vrot.lane.b32.xlu1 %v7997_v34, %s5381_s9 }
 0xb2b   : > { %4118 = vrot.lane.b32.xlu0 %v7993_v20, %s5382_s30 }
 0xb2d   : > { %4120 = vrot.lane.b32.xlu1 %v7997_v34, %s5382_s30 }
 0xb2f   : > { %4170 = vrot.lane.b32.xlu0 %v7993_v20, %s5383_s16 }
 0xb31   : > { %4172 = vrot.lane.b32.xlu1 %v7997_v34, %s5383_s16 }
 0xb33   : > { %4222 = vrot.lane.b32.xlu0 %v7993_v20, %s5384_s14 }
 0xb35   : > { %4224 = vrot.lane.b32.xlu1 %v7997_v34, %s5384_s14 }
 0xb37   : > { %4074 = vrot.lane.b32.xlu0 %v8013_v39, %s5381_s9 }
 0xb39   : > { %4076 = vrot.lane.b32.xlu1 %v8017_v32, %s5381_s9 }
 0xb3b   : > { %4286 = vrot.lane.b32.xlu0 %v7973_v56, %s5385_s15 }
 0xb3d   : > { %4288 = vrot.lane.b32.xlu1 %v7977_v8, %s5385_s15 }
 0xb3f   : > { %4126 = vrot.lane.b32.xlu0 %v8013_v39, %s5382_s30 }
 0xb41   : > { %4128 = vrot.lane.b32.xlu1 %v8017_v32, %s5382_s30 }
 0xb43   : > { %4178 = vrot.lane.b32.xlu0 %v8013_v39, %s5383_s16 }
 0xb45   : > { %4284 = vrot.lane.b32.xlu1 %v7997_v34, %s5385_s15 }
 0xb47   : > { %4230 = vrot.lane.b32.xlu0 %v8013_v39, %s5384_s14 }
 0xb49   : > { %4180 = vrot.lane.b32.xlu1 %v8017_v32, %s5383_s16  ;;  %s4886_s16 = sshll.u32 %s5576_s12, 2 }
 0xb4b   : > { %4282 = vrot.lane.b32.xlu0 %v7993_v20, %s5385_s15 }
 0xb4d   : > { %4332 = vrot.lane.b32.xlu1 %v7953_v31, %s8481_s21 }
 0xb4f   : > { %4290 = vrot.lane.b32.xlu0 %v8013_v39, %s5385_s15 }
 0xb51   : > { %4232 = vrot.lane.b32.xlu1 %v8017_v32, %s5384_s14  ;;  %s4998_s14 = sshll.u32 %s5458_s28, 6  ;;  %s5396_s28 = smov [#allocation10]  }
 0xb52   : > { %s8407_s17 = scalar_lea.hbm %s8458_s7, %s4998_s14  ;;  %s5307_s11 = sshll.u32 %s5396_s28, 4  ;;  %s5308_s11 = int_to_ptr.vmem [resolvable:$false] %s5307_s11 }
 0xb53   : > { %4330 = vrot.lane.b32.xlu0 %v7951_v51, %s8481_s21  ;;  %s5309_s10 = scalar_lea.vmem %s5308_s11, 128 }
 0xb55   : > { %4340 = vrot.lane.b32.xlu1 %v7977_v8, %s8481_s21 }
 0xb57   : > { %4338 = vrot.lane.b32.xlu0 %v7973_v56, %s8481_s21 }
 0xb59   : > { %4336 = vrot.lane.b32.xlu1 %v7997_v34, %s8481_s21 }
 0xb5b   : > { %4334 = vrot.lane.b32.xlu0 %v7993_v20, %s8481_s21 }
 0xb5d   : > { %4384 = vrot.lane.b32.xlu1 %v7953_v31, %s8480_s22 }
 0xb5f   : > { %4342 = vrot.lane.b32.xlu0 %v8013_v39, %s8481_s21 }
 0xb61   : > { %4292 = vrot.lane.b32.xlu1 %v8017_v32, %s5385_s15  ;;  %s311_s15 = scalar_lea.vmem [#allocation10], %s4886_s16 }
 0xb63   : > { %4382 = vrot.lane.b32.xlu0 %v7951_v51, %s8480_s22 }
 0xb65   : > { %4392 = vrot.lane.b32.xlu1 %v7977_v8, %s8480_s22 }
 0xb67   : > { %4390 = vrot.lane.b32.xlu0 %v7973_v56, %s8480_s22 }
 0xb69   : > { %4344 = vrot.lane.b32.xlu1 %v8017_v32, %s8481_s21 }
 0xb6b   : > { %4386 = vrot.lane.b32.xlu0 %v7993_v20, %s8480_s22 }
 0xb6d   : > { %4388 = vrot.lane.b32.xlu1 %v7997_v34, %s8480_s22 }
 0xb6f   : > { %4394 = vrot.lane.b32.xlu0 %v8013_v39, %s8480_s22 }
 0xb71   : > { %4396 = vrot.lane.b32.xlu1 %v8017_v32, %s8480_s22  ;;  %s4796_s22 = sshll.u32 %s311_s15, 4  ;;  %s8409_s22 = int_to_ptr.vmem [resolvable:$true] %s4796_s22 }
 0xb72   : > { %s5303_s29 = scalar_lea.vmem %s8409_s22, 64  ;;  %p5310_p10 = scmp.lt.s32.totalorder %s8409_s22, %s5308_s11 }
 0xb73   : > { %4434 = vrot.lane.b32.xlu0 %v7951_v51, %s8479_s23  ;;  %p5304_p4 = scmp.ne.s32.totalorder %s8409_s22, %s5303_s29  ;;  %p5311_p13 = scmp.lt.s32.totalorder %s5309_s10, %s5303_s29 }
 0xb75   : > { %4436 = vrot.lane.b32.xlu1 %v7953_v31, %s8479_s23  ;;  %v4063_v21 = vpop.permute.xlu0 %4062  ;;  %p5305_p6 = pnand %p5304_p4, %p5528_p12  ;;  %p5312_p3 = por %p5311_p13, %p5310_p10 }
 0xb77   : > { %v4065_v12 = vpop.permute.xlu1 %4064  ;;  %4442 = vrot.lane.b32.xlu0 %v7973_v56, %s8479_s23  ;;  %p5306_p8 = pneg %p5305_p6 }
 0xb79   : > { %4444 = vrot.lane.b32.xlu1 %v7977_v8, %s8479_s23  ;;  %v8087_v62 = vpop.permute.xlu0 %4114  ;;  %p5313_p7 = pnand %p5312_p3, %p5306_p8 }
 0xb7b   : > { %v8089_v25 = vpop.permute.xlu1 %4116  ;;  %4438 = vrot.lane.b32.xlu0 %v7993_v20, %s8479_s23 }
 0xb7d   : > { %4440 = vrot.lane.b32.xlu1 %v7997_v34, %s8479_s23  ;;  %v8095_v60 = vpop.permute.xlu0 %4166 }
 0xb7f   : > { %v8097_v22 = vpop.permute.xlu1 %4168  ;;  %4446 = vrot.lane.b32.xlu0 %v8013_v39, %s8479_s23 }
 0xb81   : > { %4448 = vrot.lane.b32.xlu1 %v8017_v32, %s8479_s23  ;;  %v8103_v2 = vpop.permute.xlu0 %4218 }
 0xb83   : > { %v8105_v28 = vpop.permute.xlu1 %4220  ;;  %4528 = vperm.xlu0 %5183, %v4522_v3  }
 0xb85   : > { %v8107_v41 = vpop.permute.xlu0 %4278  ;;  %4533 = vperm.xlu1 %5184, %v4523_v26  }
 0xb87   : > { %v8118_v30 = vpop.permute.xlu1 %4280  ;;  %4543 = vperm.xlu0 %5183, %v4525_v43  }
 0xb89   : > { %v4071_v48 = vpop.permute.xlu0 %4070  ;;  %4538 = vperm.xlu1 %5184, %v4524_v1  }
 0xb8a   : > { %v4078_v6 = vsel %vm331_vm1, %v4063_v21, %v4071_v48  ;;  %v4082_v35 = vsel %vm331_vm1, %v4071_v48, %v4063_v21 }
 0xb8b   : > { %v4073_v47 = vpop.permute.xlu1 %4072  ;;  %v4098_v52 = vmul.f32 %v4091_v5, %v4082_v35  ;;  %v4099_v49 = vmul.f32 %v4095_v44, %v4078_v6  ;;  %5186 = vset.pattern.permute.xlu0 %v5389_v9 }
 0xb8c   : > { %v4079_v19 = vsel %vm331_vm1, %v4065_v12, %v4073_v47  ;;  %v4083_v61 = vsel %vm331_vm1, %v4073_v47, %v4065_v12  ;;  %v4978_v12 = vld [vmem:[%s8457_s6 + $0x5] ss:$8 sm:$0x3] }
 0xb8d   : > { %v4100_v27 = vmul.f32 %v4091_v5, %v4083_v61  ;;  %v4101_v23 = vmul.f32 %v4095_v44, %v4079_v19  ;;  %v4123_v54 = vpop.permute.xlu0 %4122  ;;  %5185 = vset.pattern.permute.xlu1 %v5389_v9  ;;  %v8176_v47 = vrot.slane %v4978_v12, %v5696_v15  ;;  %v8179_v19 = vrot.slane %v4978_v12, %v5698_v16 }
 0xb8e   : > { %v4130_v48 = vsel %vm364_vm2, %v8087_v62, %v4123_v54  ;;  %v4134_v6 = vsel %vm364_vm2, %v4123_v54, %v8087_v62  ;;  %4720 = vperm.xlu1 %5185, %v4717_v14  }
 0xb8f   : > { %v4106_v11 = vpack.c.bf16 %v4100_v27, %v4098_v52  ;;  %v4125_v45 = vpop.permute.xlu1 %4124  ;;  %v4107_v46 = vpack.c.bf16 %v4101_v23, %v4099_v49 }
 0xb90   : > { %v4131_v26 = vsel %vm364_vm2, %v8089_v25, %v4125_v45  ;;  %v4135_v61 = vsel %vm364_vm2, %v4125_v45, %v8089_v25  ;;  %v4150_v45 = vmul.f32 %v4143_v55, %v4134_v6 }
 0xb91   : > { %4582 = vmatprep.subr.bf16.mxu0 %v4107_v46  ;;  %v8138_v4 = vpop.permute.xlu0 %4174  ;;  %v4153_v52 = vmul.f32 %v4147_v13, %v4131_v26  ;;  %v4152_v12 = vmul.f32 %v4143_v55, %v4135_v61 }
 0xb92   : > { %4583 = vmatpush1.bf16.msra.mxu0 %v4106_v11 }
 0xb93   : > { %v8140_v29 = vpop.permute.xlu1 %4176 }
 0xb95   : > { %v8142_v58 = vpop.permute.xlu0 %4226 }
 0xb97   : > { %v8144_v50 = vpop.permute.xlu1 %4228 }
 0xb99   : > { %v4067_v17 = vpop.permute.xlu0 %4066 }
 0xb9b   : > { %v4069_v38 = vpop.permute.xlu1 %4068 }
 0xb9d   : > { %v4119_v10 = vpop.permute.xlu0 %4118 }
 0xb9f   : > { %v4121_v63 = vpop.permute.xlu1 %4120 }
 0xba1   : > { %v8146_v24 = vpop.permute.xlu0 %4170 }
 0xba3   : > { %v8148_v40 = vpop.permute.xlu1 %4172 }
 0xba5   : > { %v8150_v42 = vpop.permute.xlu0 %4222 }
 0xba7   : > { %v8155_v21 = vpop.permute.xlu1 %4224 }
 0xba9   : > { %v4075_v3 = vpop.permute.xlu0 %4074 }
 0xbaa   : > { %v4080_v1 = vsel %vm331_vm1, %v4067_v17, %v4075_v3  ;;  %v4084_v43 = vsel %vm331_vm1, %v4075_v3, %v4067_v17  ;;  %v4151_v17 = vmul.f32 %v4147_v13, %v4130_v48 }
 0xbab   : > { %v4077_v35 = vpop.permute.xlu1 %4076  ;;  %v4102_v23 = vmul.f32 %v4091_v5, %v4084_v43  ;;  %v4103_v62 = vmul.f32 %v4095_v44, %v4080_v1 }
 0xbac   : > { %v4081_v49 = vsel %vm331_vm1, %v4069_v38, %v4077_v35  ;;  %v4085_v27 = vsel %vm331_vm1, %v4077_v35, %v4069_v38  ;;  %v4976_v38 = vld [vmem:[%s8457_s6 + $0x2] ss:$8 sm:$0x3]  ;;  %v4159_v43 = vpack.c.bf16 %v4153_v52, %v4151_v17 }
 0xbad   : > { %v4104_v54 = vmul.f32 %v4091_v5, %v4085_v27  ;;  %v4105_v11 = vmul.f32 %v4095_v44, %v4081_v49  ;;  %v4287_v46 = vpop.permute.xlu0 %4286  ;;  %v4183_v44 = vsel %vm398_vm3, %v8097_v22, %v8140_v29  ;;  %v4195_v27 = vrot.slane %v4976_v38, %v5696_v15 }
 0xbae   : > { %v4294_v7 = vsel %vm470_vm5, %v8107_v41, %v4287_v46  ;;  %v4298_v25 = vsel %vm470_vm5, %v4287_v46, %v8107_v41 }
 0xbaf   : > { %v4108_v26 = vpack.c.bf16 %v4104_v54, %v4102_v23  ;;  %v4289_v3 = vpop.permute.xlu1 %4288  ;;  %v4109_v5 = vpack.c.bf16 %v4105_v11, %v4103_v62  ;;  %v8208_v48 = vmul.f32 %v8176_v47, %v4294_v7  ;;  %v8211_v6 = vmul.f32 %v8179_v19, %v4298_v25 }
 0xbb0   : > { %v4295_v1 = vsel %vm470_vm5, %v8118_v30, %v4289_v3  ;;  %v4299_v41 = vsel %vm470_vm5, %v4289_v3, %v8118_v30  ;;  %v4199_v23 = vrot.slane %v4976_v38, %v5698_v16  ;;  %v4158_v62 = vpack.c.bf16 %v4152_v12, %v4150_v45 }
 0xbb1   : > { %v8214_v35 = vmul.f32 %v8176_v47, %v4295_v1  ;;  %v8217_v61 = vmul.f32 %v8179_v19, %v4299_v41  ;;  %4584 = vmatprep.subr.bf16.mxu0 %v4109_v5  ;;  %v4127_v49 = vpop.permute.xlu0 %4126  ;;  %v4182_v54 = vsel %vm398_vm3, %v8095_v60, %v8138_v4  ;;  %v4186_v1 = vsel %vm398_vm3, %v8138_v4, %v8095_v60 }
 0xbb2   : > { %v4132_v30 = vsel %vm364_vm2, %v4119_v10, %v4127_v49  ;;  %v4136_v52 = vsel %vm364_vm2, %v4127_v49, %v4119_v10  ;;  %4585 = vmatpush1.bf16.msra.mxu0 %v4108_v26  ;;  %v4187_v10 = vsel %vm398_vm3, %v8140_v29, %v8097_v22  ;;  %v4205_v7 = vmul.f32 %v4199_v23, %v4183_v44  ;;  %v4977_v29 = vld [vmem:[%s8457_s6 + $0x3] ss:$8 sm:$0x3] }
 0xbb3   : > { %v4322_v11 = vpack.c.bf16 %v8214_v35, %v8208_v48  ;;  %v4129_v46 = vpop.permute.xlu1 %4128  ;;  %4586 = vmatprep.subr.bf16.mxu0 %v4159_v43  ;;  %v4323_v17 = vpack.c.bf16 %v8217_v61, %v8211_v6  ;;  %v4154_v12 = vmul.f32 %v4143_v55, %v4136_v52  ;;  %v4155_v38 = vmul.f32 %v4147_v13, %v4132_v30 }
 0xbb4   : > { %v4133_v25 = vsel %vm364_vm2, %v4121_v63, %v4129_v46  ;;  %v4137_v45 = vsel %vm364_vm2, %v4129_v46, %v4121_v63  ;;  %v4203_v41 = vmul.f32 %v4199_v23, %v4182_v54  ;;  %v4204_v22 = vmul.f32 %v4195_v27, %v4187_v10 }
 0xbb5   : > { %v4156_v26 = vmul.f32 %v4143_v55, %v4137_v45  ;;  %v4157_v3 = vmul.f32 %v4147_v13, %v4133_v25  ;;  %v4179_v5 = vpop.permute.xlu0 %4178  ;;  %v4202_v49 = vmul.f32 %v4195_v27, %v4186_v1  ;;  %v4235_v55 = vsel %vm432_vm4, %v8105_v28, %v8144_v50 }
 0xbb6   : > { %4587 = vmatpush1.bf16.msra.mxu0 %v4158_v62  ;;  %v4211_v60 = vpack.c.bf16 %v4205_v7, %v4203_v41  ;;  %v4251_v4 = vrot.slane %v4977_v29, %v5698_v16  ;;  %v4184_v30 = vsel %vm398_vm3, %v8146_v24, %v4179_v5  ;;  %v4188_v52 = vsel %vm398_vm3, %v4179_v5, %v8146_v24 }
 0xbb7   : > { %v4160_v44 = vpack.c.bf16 %v4156_v26, %v4154_v12  ;;  %v8248_v43 = vpop.permute.xlu1 %4284  ;;  %v4161_v63 = vpack.c.bf16 %v4157_v3, %v4155_v38  ;;  %v4210_v62 = vpack.c.bf16 %v4204_v22, %v4202_v49  ;;  %v4234_v54 = vsel %vm432_vm4, %v8103_v2, %v8142_v58 }
 0xbb8   : > { %v4239_v10 = vsel %vm432_vm4, %v8144_v50, %v8105_v28  ;;  %v4257_v7 = vmul.f32 %v4251_v4, %v4235_v55  ;;  %v4206_v45 = vmul.f32 %v4195_v27, %v4188_v52  ;;  %v4207_v12 = vmul.f32 %v4199_v23, %v4184_v30 }
 0xbb9   : > { %4588 = vmatprep.subr.bf16.mxu0 %v4161_v63  ;;  %v4231_v13 = vpop.permute.xlu0 %4230  ;;  %v4247_v5 = vrot.slane %v4977_v29, %v5696_v15  ;;  %v4238_v28 = vsel %vm432_vm4, %v8142_v58, %v8103_v2  ;;  %v4255_v50 = vmul.f32 %v4251_v4, %v4234_v54 }
 0xbba   : > { %4589 = vmatpush1.bf16.msra.mxu0 %v4160_v44 }
 0xbbb   : > { %v4181_v46 = vpop.permute.xlu1 %4180  ;;  %4590 = vmatprep.subr.bf16.mxu0 %v4211_v60  ;;  %v4256_v44 = vmul.f32 %v4247_v5, %v4239_v10  ;;  %v4263_v63 = vpack.c.bf16 %v4257_v7, %v4255_v50  ;;  %v4254_v49 = vmul.f32 %v4247_v5, %v4238_v28  ;;  %v4271_v7 = vpack.c.bf16 %v7977_v8, %v7973_v56  ;;  %v4979_v56 = vld [vmem:[%s8457_s6 + $0x6] ss:$8 sm:$0x3] }
 0xbbc   : > { %v4185_v25 = vsel %vm398_vm3, %v8148_v40, %v4181_v46  ;;  %v4189_v24 = vsel %vm398_vm3, %v4181_v46, %v8148_v40  ;;  %v4272_v8 = vpack.c.bf16 %v7997_v34, %v7993_v20 }
 0xbbd   : > { %v4208_v38 = vmul.f32 %v4195_v27, %v4189_v24  ;;  %v4209_v26 = vmul.f32 %v4199_v23, %v4185_v25  ;;  %v4283_v3 = vpop.permute.xlu0 %4282  ;;  %v4236_v27 = vsel %vm432_vm4, %v8150_v42, %v4231_v13  ;;  %v4240_v23 = vsel %vm432_vm4, %v4231_v13, %v8150_v42 }
 0xbbe   : > { %4591 = vmatpush1.bf16.msra.mxu0 %v4210_v62  ;;  %v4262_v2 = vpack.c.bf16 %v4256_v44, %v4254_v49  ;;  %v4258_v60 = vmul.f32 %v4247_v5, %v4240_v23  ;;  %v4259_v30 = vmul.f32 %v4251_v4, %v4236_v27 }
 0xbbf   : > { %v4212_v1 = vpack.c.bf16 %v4208_v38, %v4206_v45  ;;  %v4333_v41 = vpop.permute.xlu1 %4332  ;;  %v4213_v22 = vpack.c.bf16 %v4209_v26, %v4207_v12  ;;  %v4363_v26 = vrot.slane %v4979_v56, %v5698_v16 }
 0xbc1   : > { %4592 = vmatprep.subr.bf16.mxu0 %v4213_v22  ;;  %v4291_v40 = vpop.permute.xlu0 %4290 }
 0xbc2   : > { %4593 = vmatpush1.bf16.msra.mxu0 %v4212_v1  ;;  %v4296_v12 = vsel %vm470_vm5, %v4283_v3, %v4291_v40 }
 0xbc3   : > { %v4233_v29 = vpop.permute.xlu1 %4232  ;;  %4594 = vmatprep.subr.bf16.mxu0 %v4263_v63 }
 0xbc4   : > { %v4237_v58 = vsel %vm432_vm4, %v8155_v21, %v4233_v29  ;;  %v4241_v55 = vsel %vm432_vm4, %v4233_v29, %v8155_v21  ;;  %v4270_v21 = vpack.c.bf16 %v7953_v31, %v7951_v51  ;;  %v4300_v51 = vsel %vm470_vm5, %v4291_v40, %v4283_v3 }
 0xbc5   : > { %v4260_v52 = vmul.f32 %v4247_v5, %v4241_v55  ;;  %v4261_v62 = vmul.f32 %v4251_v4, %v4237_v58  ;;  %v4331_v54 = vpop.permute.xlu0 %4330  ;;  %v4273_v4 = vpack.c.bf16 %v8017_v32, %v8013_v39  ;;  %v4318_v39 = vmul.f32 %v8176_v47, %v4296_v12 }
 0xbc6   : > { %4595 = vmatpush1.bf16.msra.mxu0 %v4262_v2  ;;  %v4359_v32 = vrot.slane %v4979_v56, %v5696_v15  ;;  %v4319_v50 = vmul.f32 %v8179_v19, %v4300_v51 }
 0xbc7   : > { %v4264_v46 = vpack.c.bf16 %v4260_v52, %v4258_v60  ;;  %v4341_v42 = vpop.permute.xlu1 %4340  ;;  %v4265_v13 = vpack.c.bf16 %v4261_v62, %v4259_v30 }
 0xbc8   : > { %v4351_v20 = vsel %vm504_vm6, %v4341_v42, %v4333_v41  ;;  %v4347_v22 = vsel %vm504_vm6, %v4333_v41, %v4341_v42 }
 0xbc9   : > { %4596 = vmatprep.subr.bf16.mxu0 %v4265_v13  ;;  %v4339_v10 = vpop.permute.xlu0 %4338  ;;  %v4369_v44 = vmul.f32 %v4363_v26, %v4351_v20 }
 0xbca   : > { %4597 = vmatpush1.bf16.msra.mxu0 %v4264_v46  ;;  %v4350_v31 = vsel %vm504_vm6, %v4339_v10, %v4331_v54  ;;  %v4346_v34 = vsel %vm504_vm6, %v4331_v54, %v4339_v10 }
 0xbcb   : > { %v4337_v25 = vpop.permute.xlu1 %4336  ;;  %4598 = vmatprep.subr.bf16.mxu0 %v4271_v7  ;;  %v4367_v1 = vmul.f32 %v4363_v26, %v4350_v31  ;;  %v4366_v40 = vmul.f32 %v4359_v32, %v4346_v34 }
 0xbcd   : > { %v4335_v24 = vpop.permute.xlu0 %4334  ;;  %v4375_v48 = vpack.c.bf16 %v4369_v44, %v4367_v1 }
 0xbce   : > { %4599 = vmatpush1.bf16.msra.mxu0 %v4270_v21 }
 0xbcf   : > { %v4385_v45 = vpop.permute.xlu1 %4384  ;;  %4600 = vmatprep.subr.bf16.mxu0 %v4273_v4 }
 0xbd1   : > { %v4343_v38 = vpop.permute.xlu0 %4342 }
 0xbd2   : > { %4601 = vmatpush1.bf16.msra.mxu0 %v4272_v8  ;;  %v4348_v27 = vsel %vm504_vm6, %v4335_v24, %v4343_v38  ;;  %v4352_v41 = vsel %vm504_vm6, %v4343_v38, %v4335_v24 }
 0xbd3   : > { %v4293_v5 = vpop.permute.xlu1 %4292  ;;  %4602 = vmatprep.subr.bf16.mxu0 %v4323_v17  ;;  %v4370_v29 = vmul.f32 %v4359_v32, %v4348_v27  ;;  %v4371_v55 = vmul.f32 %v4363_v26, %v4352_v41 }
 0xbd4   : > { %v4297_v3 = vsel %vm470_vm5, %v8248_v43, %v4293_v5  ;;  %v4301_v28 = vsel %vm470_vm5, %v4293_v5, %v8248_v43 }
 0xbd5   : > { %v4320_v6 = vmul.f32 %v8176_v47, %v4297_v3  ;;  %v4321_v61 = vmul.f32 %v8179_v19, %v4301_v28  ;;  %v4383_v17 = vpop.permute.xlu0 %4382  ;;  %v4980_v47 = vld [vmem:[%s8457_s6 + $0x7] ss:$8 sm:$0x3]  ;;  %v4368_v19 = vmul.f32 %v4359_v32, %v4347_v22 }
 0xbd6   : > { %4603 = vmatpush1.bf16.msra.mxu0 %v4322_v11  ;;  %v4415_v2 = vrot.slane %v4980_v47, %v5698_v16  ;;  %v4411_v10 = vrot.slane %v4980_v47, %v5696_v15 }
 0xbd7   : > { %v4324_v63 = vpack.c.bf16 %v4320_v6, %v4318_v39  ;;  %v4393_v49 = vpop.permute.xlu1 %4392  ;;  %v4325_v43 = vpack.c.bf16 %v4321_v61, %v4319_v50  ;;  %v4374_v11 = vpack.c.bf16 %v4368_v19, %v4366_v40  ;;  %v4981_v50 = vld [vmem:[%s8457_s6 + $0x10] ss:$8 sm:$0x3] }
 0xbd8   : > { %v4403_v60 = vsel %vm538_vm7, %v4393_v49, %v4385_v45  ;;  %v4399_v7 = vsel %vm538_vm7, %v4385_v45, %v4393_v49  ;;  %v4467_v22 = vrot.slane %v4981_v50, %v5698_v16  ;;  %v5233_v40 = vld [vmem:[#allocation8 + $0xf0] ss:$12 sps:$4 sm:$0xff]  }
 0xbd9   : > { %v4391_v23 = vpop.permute.xlu0 %4390  ;;  %4604 = vmatprep.subr.bf16.mxu0 %v4325_v43  ;;  %v4421_v21 = vmul.f32 %v4415_v2, %v4403_v60  ;;  %v4420_v38 = vmul.f32 %v4411_v10, %v4399_v7  ;;  %v5236_v43 = vld [vmem:[#allocation8 + $0x10c] ss:$12 sps:$4 sm:$0xff]  }
 0xbda   : > { %v4402_v35 = vsel %vm538_vm7, %v4391_v23, %v4383_v17  ;;  %4605 = vmatpush1.bf16.msra.mxu0 %v4324_v63  ;;  %v4398_v62 = vsel %vm538_vm7, %v4383_v17, %v4391_v23  ;;  %v4463_v17 = vrot.slane %v4981_v50, %v5696_v15 }
 0xbdb   : > { %v4345_v58 = vpop.permute.xlu1 %4344  ;;  %4606 = vmatprep.subr.bf16.mxu0 %v4375_v48  ;;  %v4419_v54 = vmul.f32 %v4415_v2, %v4402_v35  ;;  %v4418_v56 = vmul.f32 %v4411_v10, %v4398_v62 }
 0xbdc   : > { %v4349_v30 = vsel %vm504_vm6, %v4337_v25, %v4345_v58  ;;  %v4353_v52 = vsel %vm504_vm6, %v4345_v58, %v4337_v25  ;;  %v5238_v58 = vld [vmem:[#allocation8 + $0x108] ss:$12 sps:$4 sm:$0xff]  }
 0xbdd   : > { %v4372_v46 = vmul.f32 %v4359_v32, %v4349_v30  ;;  %v4373_v42 = vmul.f32 %v4363_v26, %v4353_v52  ;;  %v4387_v13 = vpop.permute.xlu0 %4386  ;;  %v4427_v25 = vpack.c.bf16 %v4421_v21, %v4419_v54  ;;  %v4426_v32 = vpack.c.bf16 %v4420_v38, %v4418_v56  ;;  %v5239_v21 = vld [vmem:[#allocation8 + $0xf8] ss:$12 sps:$4 sm:$0xff]  }
 0xbde   : > { %4607 = vmatpush1.bf16.msra.mxu0 %v4374_v11 }
 0xbdf   : > { %v4376_v24 = vpack.c.bf16 %v4372_v46, %v4370_v29  ;;  %v4389_v4 = vpop.permute.xlu1 %4388  ;;  %v4377_v12 = vpack.c.bf16 %v4373_v42, %v4371_v55 }
 0xbe1   : > { %v4395_v8 = vpop.permute.xlu0 %4394  ;;  %4608 = vmatprep.subr.bf16.mxu0 %v4377_v12 }
 0xbe2   : > { %v4400_v51 = vsel %vm538_vm7, %v4387_v13, %v4395_v8  ;;  %v4404_v31 = vsel %vm538_vm7, %v4395_v8, %v4387_v13  ;;  %4609 = vmatpush1.bf16.msra.mxu0 %v4376_v24  ;;  %v5240_v24 = vld [vmem:[#allocation8 + $0x110] ss:$12 sps:$4 sm:$0xff]  }
 0xbe3   : > { %v4397_v39 = vpop.permute.xlu1 %4396  ;;  %4610 = vmatprep.subr.bf16.mxu0 %v4427_v25  ;;  %v4422_v5 = vmul.f32 %v4411_v10, %v4400_v51  ;;  %v4423_v20 = vmul.f32 %v4415_v2, %v4404_v31 }
 0xbe4   : > { %v4401_v45 = vsel %vm538_vm7, %v4389_v4, %v4397_v39  ;;  %v4405_v26 = vsel %vm538_vm7, %v4397_v39, %v4389_v4 }
 0xbe5   : > { %v4424_v34 = vmul.f32 %v4411_v10, %v4401_v45  ;;  %v4425_v3 = vmul.f32 %v4415_v2, %v4405_v26  ;;  %v4435_v28 = vpop.permute.xlu0 %4434 }
 0xbe6   : > { %4611 = vmatpush1.bf16.msra.mxu0 %v4426_v32 }
 0xbe7   : > { %v4428_v1 = vpack.c.bf16 %v4424_v34, %v4422_v5  ;;  %v4437_v6 = vpop.permute.xlu1 %4436  ;;  %v4429_v61 = vpack.c.bf16 %v4425_v3, %v4423_v20 }
 0xbe9   : > { %v4443_v44 = vpop.permute.xlu0 %4442  ;;  %4612 = vmatprep.subr.bf16.mxu0 %v4429_v61 }
 0xbea   : > { %v4450_v63 = vsel %vm572_vm8, %v4435_v28, %v4443_v44  ;;  %v4454_v49 = vsel %vm572_vm8, %v4443_v44, %v4435_v28  ;;  %4613 = vmatpush1.bf16.msra.mxu0 %v4428_v1 }
 0xbeb   : > { %v4445_v27 = vpop.permute.xlu1 %4444  ;;  %v4470_v19 = vmul.f32 %v4463_v17, %v4450_v63  ;;  %v4471_v16 = vmul.f32 %v4467_v22, %v4454_v49 }
 0xbec   : > { %v4451_v47 = vsel %vm572_vm8, %v4437_v6, %v4445_v27  ;;  %v4455_v15 = vsel %vm572_vm8, %v4445_v27, %v4437_v6 }
 0xbed   : > { %v4472_v41 = vmul.f32 %v4463_v17, %v4451_v47  ;;  %v4473_v23 = vmul.f32 %v4467_v22, %v4455_v15  ;;  %v4439_v48 = vpop.permute.xlu0 %4438  ;;  %4615 = vmatmul.mubr.bf16.vlgmr.msra.gmra.mrb[24].mxu0 %v5233_v40 }
 0xbee   : > { %4624 = vmatprep.mubr.bf16.mxu0 %v5236_v43 }
 0xbef   : > { %v4478_v35 = vpack.c.bf16 %v4472_v41, %v4470_v19  ;;  %v4441_v11 = vpop.permute.xlu1 %4440  ;;  %v4479_v29 = vpack.c.bf16 %v4473_v23, %v4471_v16 }
 0xbf1   : > { %v4447_v2 = vpop.permute.xlu0 %4446  ;;  %4635 = vmatprep.subr.bf16.mxu0 %v4479_v29 }
 0xbf2   : > { %v4452_v55 = vsel %vm572_vm8, %v4439_v48, %v4447_v2  ;;  %v4456_v60 = vsel %vm572_vm8, %v4447_v2, %v4439_v48  ;;  %4636 = vmatpush1.bf16.msra.mxu0 %v4478_v35  ;;  %v4712_v48 = vld [vmem:[%s8454_s3] sm:$0x1] }
 0xbf3   : > { %v4449_v30 = vpop.permute.xlu1 %4448  ;;  %v4474_v54 = vmul.f32 %v4463_v17, %v4452_v55  ;;  %v4475_v46 = vmul.f32 %v4467_v22, %v4456_v60 }
 0xbf4   : > { %v4453_v52 = vsel %vm572_vm8, %v4441_v11, %v4449_v30  ;;  %v4457_v62 = vsel %vm572_vm8, %v4449_v30, %v4441_v11 }
 0xbf5   : > { %v4476_v42 = vmul.f32 %v4463_v17, %v4453_v52  ;;  %v4477_v13 = vmul.f32 %v4467_v22, %v4457_v62  ;;  %4625 = vmatmul.mubr.bf16.gmra.mrb[28].mxu0 %v5238_v58 }
 0xbf6   : > { %4667 = vmatprep.mubr.bf16.mxu0 %v5389_v9 }
 0xbf7   : > { %v4480_v10 = vpack.c.bf16 %v4476_v42, %v4474_v54  ;;  %v4481_v7 = vpack.c.bf16 %v4477_v13, %v4475_v46 }
 0xbf9   : > { %4637 = vmatprep.subr.bf16.mxu0 %v4481_v7 }
 0xbfa   : > { %4638 = vmatpush1.bf16.msra.mxu0 %v4480_v10 }
 0xbfd   : > { %4988 = vmatmul.mubr.msk.bf16.vlgmr.msra.gmra.mrb[24].mxu0 %vm1264_vm9, %v5239_v21 }
 0xbfe   : > { %4677 = vmatprep.mubr.bf16.mxu0 %v5389_v9 }
 0xc02   : > { %v4529_v4 = vpop.permute.xlu0 %4528 }
 0xc04   : > { %v4534_v12 = vpop.permute.xlu1 %4533 }
 0xc05   : > { %4989 = vmatmul.mubr.msk.bf16.gmra.mrb[28].mxu0 %vm1264_vm9, %v5240_v24 }
 0xc06   : > { %v4544_v22 = vpop.permute.xlu0 %4543 }
 0xc08   : > { %v4539_v5 = vpop.permute.xlu1 %4538 }
 0xc0d   : > { %v4721_v35 = vpop.permute.xlu1 %4720 }
 0xcd0   : > { %v4669_v56 = vpop.f32.mrb[24].mxu0 }
 0xcd1   : > { %v5047_v8 = vadd.f32 %v4669_v56, %v4529_v4  ;;  %v4671_v25 = vpop.f32.mrb[25].mxu0 }
 0xcd2   : > { %v5048_v38 = vadd.f32 %v4671_v25, %v4529_v4  ;;  %v4673_v51 = vpop.f32.mrb[26].mxu0 }
 0xcd3   : > { %v4688_v31 = vmax.f32 %v5047_v8, 0.0  ;;  %v5049_v39 = vadd.f32 %v4673_v51, %v4534_v12  ;;  %v4675_v32 = vpop.f32.mrb[27].mxu0 }
 0xcd4   : > { %v4689_v45 = vmax.f32 %v5048_v38, 0.0  ;;  %v5050_v9 = vadd.f32 %v4675_v32, %v4534_v12 }
 0xcd5   : > { %v4690_v26 = vmax.f32 %v5049_v39, 0.0  ;;  %v4704_v34 = vadd.f32 %v4688_v31, %v7550_v59 }
 0xcd6   : > { %v4691_v20 = vmax.f32 %v5050_v9, 0.0  ;;  %v4705_v28 = vadd.f32 %v4689_v45, %v7572_v57 }
 0xcd7   : > { %v4706_v3 = vadd.f32 %v4690_v26, %v7552_v0 }
 0xcd8   : > { %v4707_v50 = vadd.f32 %v4691_v20, %v7576_v37  ;;  %v4679_v1 = vpop.f32.mrb[28].mxu0 }
 0xcd9   : > { %v4713_v6 = vpack.c.bf16 %v4706_v3, %v4704_v34  ;;  %v5051_v61 = vadd.f32 %v4679_v1, %v4539_v5  ;;  %v4681_v17 = vpop.f32.mrb[29].mxu0 }
 0xcda   : > { %v5052_v44 = vadd.f32 %v4681_v17, %v4539_v5  ;;  %v4683_v40 = vpop.f32.mrb[30].mxu0  ;;  %v4714_v63 = vpack.c.bf16 %v4707_v50, %v4705_v28 }
 0xcdb   : > { %v4692_v49 = vmax.f32 %v5051_v61, 0.0  ;;  %v5053_v43 = vadd.f32 %v4683_v40, %v4544_v22  ;;  %v4685_v27 = vpop.f32.mrb[31].mxu0 }
 0xcdc   : > { %v4693_v47 = vmax.f32 %v5052_v44, 0.0  ;;  %v5054_v15 = vadd.f32 %v4685_v27, %v4544_v22  ;;  %4726 = vmatprep.subr.bf16.mxu1 %v4714_v63 }
 0xcdd   : > { %v4694_v59 = vmax.f32 %v5053_v43, 0.0  ;;  %4727 = vmatpush1.bf16.msra.mxu1 %v4713_v6  ;;  %v4708_v57 = vadd.f32 %v4692_v49, %v7592_v33 }
 0xcde   : > { %v4695_v0 = vmax.f32 %v5054_v15, 0.0  ;;  %v4709_v19 = vadd.f32 %v4693_v47, %v7612_v53 }
 0xcdf   : > { %v4710_v37 = vadd.f32 %v4694_v59, %v7596_v36 }
 0xce0   : > { %v4711_v16 = vadd.f32 %v4695_v0, %v7616_v18 }
 0xce1   : > { %v4715_v41 = vpack.c.bf16 %v4710_v37, %v4708_v57 }
 0xce2   : > { %v4716_v23 = vpack.c.bf16 %v4711_v16, %v4709_v19 }
 0xce4   : > { %4728 = vmatprep.subr.bf16.mxu1 %v4716_v23 }
 0xce5   : > { %4729 = vmatpush1.bf16.msra.mxu1 %v4715_v41 }
 0xce8   : > { %4990 = vmatmul.mubr.msk.bf16.vlgmr.msra.gmra.mrb[32].mxu1 %vm1264_vm9, %v4712_v48 }
 0xdbb   : > { %v4760_v33 = vpop.f32.mrb[32].mxu1 }
 0xdbc   : > { %v4762_v11 = vpop.f32.mrb[33].mxu1  ;;  %v4761_v36 = vadd.f32 %v4760_v33, %v4721_v35 }
 0xdbd   : > { %v4764_v53 = vpop.f32.mrb[34].mxu1  ;;  %v4763_v29 = vadd.f32 %v4762_v11, %v4721_v35 }
 0xdbe   : > { %5241 = vtanh.f32 %v4761_v36  ;;  %v4765_v18 = vpop.f32.mrb[35].mxu1 }
 0xdbf   : > { %5243 = vtanh.f32 %v4763_v29 }
 0xdc8   : > { %v5242_v2 = vpop.eup %5241 }
 0xdc9   : > { %v5244_v58 = vpop.eup %5243 }
 0xdca   : > { %v4771_v55 = vcombine.low %v5242_v2, %v5244_v58 }
 0xdcc   : > { %4991 = vst.sshfl [vmem:[%s311_s15] sm:$0x33 pattern:$0x76325410] %v4771_v55 }
 0xdcd   : > { %5316 = shalt.err (!%p5313_p7)
}
 0xdce   : > { %s5317_s12 = scalar_lea.hbm %s8407_s17, 64  ;;  %s5321_s16 = scalar_lea.hbm %s8458_s7, 128 }
 0xdcf   : > { %p5318_p9 = scmp.ne.s32.totalorder %s8407_s17, %s5317_s12  ;;  %p5322_p5 = scmp.lt.u32.totalorder %s8407_s17, %s8458_s7 }
 0xdd0   : > { %p5323_p1 = scmp.lt.u32.totalorder %s5321_s16, %s5317_s12  ;;  %p5325_p4 = scmp.lt.u32.totalorder %s5317_s12, %s8407_s17 }
 0xdd1   : > { %p5319_p2 = pnand %p5318_p9, %p5528_p12 }
 0xdd2   : > { %p5324_p11 = por %p5323_p1, %p5322_p5 }
 0xdd3   : > { %p5320_p0 = pneg %p5319_p2 }
 0xdd4   : > { %p5326_p6 = por %p5325_p4, %p5324_p11 }
 0xdd6   : > { %p5327_p8 = pnand %p5326_p6, %p5320_p0 }
 0xdd8   : > { %5330 = shalt.err (!%p5327_p8)
}
 0xdd9   : > { %5101 = dma.vmem_to_hbm [thread:$0]  (%p5528_p12), %s8409_s22, 64, %s8407_s17, %s4782_s20  }
 0xdda PF: > { %s4808_s23 = sand.u32 1, %s5361_s24   ;;  %p8482_p10 = scmp.ne.s32.totalorder %s8469_s8, 0 }
 0xddb   : > { %p8483_p13 = scmp.ge.s32.totalorder %s5373_s27, 2  ;;  %s4809_s21 = scalar_lea.sflag [#allocation7], %s4808_s23 }
 0xddd   : > { %p5112_p3 = pnand %p8483_p13, %p8482_p10 }
 0xddf   : > { %5356 = dma.done.wait (!%p5112_p3), %s4809_s21, 64  }
 0xde0   : > { %5358 = vsyncadd (!%p5112_p3), %s4809_s21, 4294967232  ;;  %p21_p7 = scmp.ge.s32.totalorder %s5493_s13, 4   ;;  %s8484_s24 = smov %s5365_s25 }
 0xde1   : > { %s8485_s25 = smov %s5369_s26  ;;  %s8486_s26 = smov %s5524_s18 }
 0xde2   : > { %s8487_s27 = smov %s5493_s13  ;;  %23 = sbr.rel (!%p21_p7) target bundleno = 6 (0x6), region = 109 }
 0xde9   :  { %4814 = vsyncpa [#allocation6], 1 }
 0xdea   :  { %4816 = vsyncpa [#allocation6 + $0x1], 1 }
 0xdeb   :  { %4817 = vsyncpa [#allocation9], 1 }
 0xdec   :  { %4818 = vsyncpa [#allocation7], 1 }
 0xded   :  { %4820 = vsyncpa [#allocation7 + $0x1], 1 }

</bundles_post_ra>
